<compile_context>
chip_gen: v6e
topology: v6e:2x2x1
jax: 0.10.0
libtpu: 0.0.40
codegen_flags: <defaults>
</compile_context>

<pallas_src>
import math

import jax
import jax.numpy as jnp
from jax.experimental import pallas as pl
from jax.experimental.pallas import tpu as pltpu

# ---------------- configuration (small shapes consistent with the module) ---
NTOKEN = 64          # vocab.n_tokens
D_MODEL = 128        # d_model (multiple of 128 lanes)
NHEAD = 4            # nhead
DH = D_MODEL // NHEAD
NUM_LAYERS = 2       # num_encoder_layers
DIM_FF = 256         # dim_feedforward
MAX_DIST = 63        # max_distance (RPE table has MAX_DIST + 1 rows)
BATCH = 2
SEQ = 8
EPS = 1e-5           # PyTorch LayerNorm default

# synthetic vocab ids (stand-ins for vocab.token2id lookups)
BAR_ID = 1           # vocab.token2id['Bar']
VEL_LO = 50          # vocab.token2id['Note-Velocity-MELODY_1']
VEL_HI = 60          # vocab.token2id['Note-Velocity-PIANO_126']

# ---------------- packed-slab layout (all row offsets are multiples of 8) ---
TBL_W = NTOKEN + MAX_DIST + 1          # 128 : fused [embedding; rpe] lookup width
assert TBL_W == 128 and D_MODEL == 128

# w128 slab (width = D_MODEL, bf16)
TBL_OFF = 0
PE_OFF = TBL_OFF + TBL_W
WO_OFF = PE_OFF + SEQ
W2_OFF = WO_OFF + NUM_LAYERS * D_MODEL
FC2_OFF = W2_OFF + NUM_LAYERS * DIM_FF
FC3_OFF = FC2_OFF + 4 * D_MODEL
FC4_OFF = FC3_OFF + D_MODEL
W128_ROWS = FC4_OFF + D_MODEL          # 1672

# wwide slab (width = 4 * D_MODEL, bf16)
W1_OFF = 0                   # w1 of both layers side-by-side: layer l cols [l*F:(l+1)*F]
FC1_OFF = D_MODEL
WWIDE_ROWS = 2 * D_MODEL

# bias slab (width = 4 * D_MODEL, f32) row indices
#   per layer l (base = l * 8):
#     +0 bqkv(3D) +1 bo(D) +2 ln1_g(D) +3 ln1_b(D) +4 b1(F) +5 b2(D) +6 ln2_g(D) +7 ln2_b(D)
ROW_ENC_G = NUM_LAYERS * 8   # 16
ROW_ENC_B = ROW_ENC_G + 1
ROW_FC1B = ROW_ENC_B + 1
ROW_FC2B = ROW_FC1B + 1
ROW_FC3B = ROW_FC2B + 1
ROW_FC4B = ROW_FC3B + 1
BIAS_ROWS = 24


# --------------------------- fused Pallas kernel ---------------------------
def _layer_norm(x, g, b):
    # single-pass stats: var = E[x^2] - mu^2, fused gamma apply
    mu = jnp.mean(x, axis=-1, keepdims=True)
    var = jnp.mean(x * x, axis=-1, keepdims=True) - mu * mu
    return (x - mu) * (jax.lax.rsqrt(var + EPS) * g) + b


def fused_forward_kernel(tok_ref, wqkv_ref, w128_ref, wwide_ref, bias_ref, out_ref):
    B, S = tok_ref.shape
    D = D_MODEL
    BS = B * S

    def bvec(row, width):                      # one bias / LN vector from the f32 slab
        return bias_ref[row:row + 1, 0:width]  # (1, width)

    # ---- src_mask: zero out velocity tokens --------------------------------
    tok = tok_ref[...]                                               # (B,S) int32
    vel = jnp.logical_and(tok >= VEL_LO, tok <= VEL_HI)
    tok = jnp.where(vel, 0, tok)

    # ---- calculate_distances_matrix + clip_matrix (distance since 'Bar') ---
    pos = jax.lax.broadcasted_iota(jnp.int32, (B, S), 1)
    posf = pos.astype(jnp.float32)
    cand = jnp.where(tok == BAR_ID, posf, -1.0)                      # (B,S)
    kk = jax.lax.broadcasted_iota(jnp.int32, (S, S), 1)
    jj = jax.lax.broadcasted_iota(jnp.int32, (S, S), 0)
    tri = kk <= jj                                                   # k <= j
    last = jnp.max(jnp.where(tri[None, :, :], cand[:, None, :], -1.0), axis=-1)
    dist = jnp.where(last >= 0.0, posf - last, float(MAX_DIST))
    dist = jnp.minimum(dist, float(MAX_DIST)).astype(jnp.int32)      # clip

    # ---- fused token-embedding + RPE lookup: ONE 128-lane one-hot matmul ---
    col = jax.lax.broadcasted_iota(jnp.int32, (B, S, TBL_W), 2)
    onehot = jnp.logical_or(col == tok[:, :, None],
                            col == (dist + NTOKEN)[:, :, None])
    onehot = onehot.astype(jnp.bfloat16).reshape(BS, TBL_W)
    table = w128_ref[TBL_OFF:TBL_OFF + TBL_W, :]                     # (128, D) bf16
    x = jnp.dot(onehot, table, preferred_element_type=jnp.float32)   # emb[tok]+rpe[dist]
    pe = w128_ref[PE_OFF:PE_OFF + S, :].astype(jnp.float32)          # (S, D)
    x = (x.reshape(B, S, D) + pe[None, :, :]).reshape(BS, D)

    # ---- NUM_LAYERS post-norm encoder layers, statically unrolled ----------
    for l in range(NUM_LAYERS):
        base = l * 8
        wqkv = wqkv_ref[l * D:(l + 1) * D, :]                            # (D, 3D) bf16
        wo = w128_ref[WO_OFF + l * D:WO_OFF + (l + 1) * D, :]            # (D, D)  bf16
        w1 = wwide_ref[W1_OFF:W1_OFF + D, l * DIM_FF:(l + 1) * DIM_FF]   # (D, F)  bf16
        w2 = w128_ref[W2_OFF + l * DIM_FF:W2_OFF + (l + 1) * DIM_FF, :]  # (F, D)  bf16

        # fused QKV projection (1/sqrt(Dh) pre-folded into the Q block at init)
        qkv = jnp.dot(x.astype(jnp.bfloat16), wqkv,
                      preferred_element_type=jnp.float32) + bvec(base + 0, 3 * D)
        qkv = qkv.astype(jnp.bfloat16)
        q = qkv[:, 0 * D:1 * D].reshape(B, S, D)
        k = qkv[:, 1 * D:2 * D].reshape(B, S, D)
        v = qkv[:, 2 * D:3 * D].reshape(B, S, D)

        # per-head attention; each head's output is folded straight through the
        # matching Wo row-block (no lane concat of 32-wide head outputs)
        attn = jnp.zeros((BS, D), jnp.float32)
        for h in range(NHEAD):
            lo = h * DH
            s = jnp.einsum('bqd,bkd->bqk', q[:, :, lo:lo + DH], k[:, :, lo:lo + DH],
                           preferred_element_type=jnp.float32)        # (B,S,S)
            s = s - jnp.max(s, axis=-1, keepdims=True)
            p = jnp.exp(s)
            p = p * pl.reciprocal(jnp.sum(p, axis=-1, keepdims=True), approx=True)
            oh = jnp.einsum('bqk,bkd->bqd', p.astype(jnp.bfloat16), v[:, :, lo:lo + DH],
                            preferred_element_type=jnp.float32)       # (B,S,DH)
            attn = attn + jnp.dot(oh.reshape(BS, DH).astype(jnp.bfloat16),
                                  wo[lo:lo + DH, :],
                                  preferred_element_type=jnp.float32)
        attn = attn + bvec(base + 1, D)

        # residual + LayerNorm 1
        y = _layer_norm(x + attn, bvec(base + 2, D), bvec(base + 3, D))

        # feed-forward (relu)
        h1 = jnp.dot(y.astype(jnp.bfloat16), w1,
                     preferred_element_type=jnp.float32) + bvec(base + 4, DIM_FF)
        h1 = jnp.maximum(h1, 0.0)
        h2 = jnp.dot(h1.astype(jnp.bfloat16), w2,
                     preferred_element_type=jnp.float32) + bvec(base + 5, D)

        # residual + LayerNorm 2
        x = _layer_norm(y + h2, bvec(base + 6, D), bvec(base + 7, D))

    # ---- final encoder LayerNorm on token-0 slice + fc1..fc4 head ----------
    info = x.reshape(B, S, D)[:, 0, :]                               # (B, D)
    info = _layer_norm(info, bvec(ROW_ENC_G, D), bvec(ROW_ENC_B, D))

    fc1w = wwide_ref[FC1_OFF:FC1_OFF + D, :]                         # (D, 4D)
    fc2w = w128_ref[FC2_OFF:FC2_OFF + 4 * D, :]                      # (4D, D)
    fc3w = w128_ref[FC3_OFF:FC3_OFF + D, :]                          # (D, D) zero-padded cols
    fc4w = w128_ref[FC4_OFF:FC4_OFF + D, :]                          # (D, D) zero-padded

    h = jnp.maximum(jnp.dot(info.astype(jnp.bfloat16), fc1w,
                            preferred_element_type=jnp.float32) + bvec(ROW_FC1B, 4 * D), 0.0)
    h = jnp.maximum(jnp.dot(h.astype(jnp.bfloat16), fc2w,
                            preferred_element_type=jnp.float32) + bvec(ROW_FC2B, D), 0.0)
    h = jnp.maximum(jnp.dot(h.astype(jnp.bfloat16), fc3w,
                            preferred_element_type=jnp.float32) + bvec(ROW_FC3B, D), 0.0)
    out_ref[...] = jnp.dot(h.astype(jnp.bfloat16), fc4w,
                           preferred_element_type=jnp.float32) + bvec(ROW_FC4B, D)


# ------------------------------- wrapper -----------------------------------
_VMEM_SPEC = pl.BlockSpec(memory_space=pltpu.MemorySpace.VMEM)


def pitch_discriminator_rpe(tokens, params):
    """tokens: (B, S) int32 token ids. Returns (B, 2) float32 logits."""
    args = (tokens.astype(jnp.int32), params['wqkv'], params['w128'],
            params['wwide'], params['bias'])
    out = pl.pallas_call(
        fused_forward_kernel,
        out_shape=jax.ShapeDtypeStruct((tokens.shape[0], D_MODEL), jnp.float32),
        in_specs=[_VMEM_SPEC] * len(args),
        out_specs=_VMEM_SPEC,
    )(*args)
    return out[:, :2]           # fc4 is zero-padded to 128 lanes inside the kernel


# --------------------------- parameter init --------------------------------
def _sinusoidal_pe(max_len, d):
    pos = jnp.arange(max_len, dtype=jnp.float32)[:, None]
    div = jnp.exp(jnp.arange(0, d, 2, dtype=jnp.float32) * (-math.log(10000.0) / d))
    pe = jnp.zeros((max_len, d), jnp.float32)
    pe = pe.at[:, 0::2].set(jnp.sin(pos * div))
    pe = pe.at[:, 1::2].set(jnp.cos(pos * div))
    return pe


def init_params(key):
    keys = iter(jax.random.split(key, 64))

    def xavier(fi, fo):
        lim = math.sqrt(6.0 / (fi + fo))
        return jax.random.uniform(next(keys), (fi, fo), jnp.float32, -lim, lim)

    D, F, L, H = D_MODEL, DIM_FF, NUM_LAYERS, NHEAD
    scale = 1.0 / math.sqrt(D // H)          # folded into the Q projection weights

    embedding = 0.02 * jax.random.normal(next(keys), (NTOKEN, D), jnp.float32)
    rpe = 0.02 * jax.random.normal(next(keys), (MAX_DIST + 1, D), jnp.float32)
    pe = _sinusoidal_pe(SEQ, D)              # pre-sliced to the sequence length

    wqkv_l, wo_l, w1_l, w2_l = [], [], [], []
    for _ in range(L):
        wq = xavier(D, D) * scale            # pre-scaled Q block
        wk = xavier(D, D)
        wv = xavier(D, D)
        wqkv_l.append(jnp.concatenate([wq, wk, wv], axis=1))          # (D, 3D)
        wo_l.append(xavier(D, D))
        w1_l.append(xavier(D, F))
        w2_l.append(xavier(F, D))

    fc1_w = xavier(D, 4 * D)
    fc2_w = xavier(4 * D, D)
    fc3_w = xavier(D, D // 4)
    fc4_w = xavier(D // 4, 2)
    # zero-pad fc3/fc4 to 128 output lanes (lane-dense matmuls; wrapper slices)
    fc3_pad = jnp.zeros((D, D), jnp.float32).at[:, :D // 4].set(fc3_w)
    fc4_pad = jnp.zeros((D, D), jnp.float32).at[:D // 4, :2].set(fc4_w)

    # --- packed bf16 weight slabs ---
    wqkv_slab = jnp.concatenate(wqkv_l, axis=0).astype(jnp.bfloat16)  # (L*D, 3D)
    assert wqkv_slab.shape == (NUM_LAYERS * D_MODEL, 3 * D_MODEL)

    w128_slab = jnp.concatenate(
        [embedding, rpe, pe] + wo_l + w2_l + [fc2_w, fc3_pad, fc4_pad],
        axis=0).astype(jnp.bfloat16)
    assert w128_slab.shape == (W128_ROWS, D_MODEL)

    wwide_slab = jnp.concatenate(
        [jnp.concatenate(w1_l, axis=1), fc1_w], axis=0).astype(jnp.bfloat16)
    assert wwide_slab.shape == (WWIDE_ROWS, 4 * D_MODEL)

    # --- f32 bias / LayerNorm slab (each vector is one zero-padded row) ---
    bias = jnp.zeros((BIAS_ROWS, 4 * D_MODEL), jnp.float32)
    for l in range(L):
        base = l * 8
        bias = bias.at[base + 2, :D].set(1.0)     # ln1 gamma
        bias = bias.at[base + 6, :D].set(1.0)     # ln2 gamma
    bias = bias.at[ROW_ENC_G, :D].set(1.0)        # final encoder-norm gamma
    # all Linear / attention biases are zero-initialised (rows already zero)

    return dict(wqkv=wqkv_slab, w128=w128_slab, wwide=wwide_slab, bias=bias)


if __name__ == "__main__":
    key = jax.random.PRNGKey(0)
    pkey, dkey = jax.random.split(key)
    params = init_params(pkey)
    tokens = jax.random.randint(dkey, (BATCH, SEQ), 0, NTOKEN, dtype=jnp.int32)
    # ensure a 'Bar' token appears so both branches of the RPE distance run
    tokens = tokens.at[:, 2].set(BAR_ID)

    out = pitch_discriminator_rpe(tokens, params)
    out = jax.block_until_ready(out)
    assert out.shape == (BATCH, 2) and out.dtype == jnp.float32
    assert bool(jnp.all(jnp.isfinite(out)))
    print("KERNEL_OK")
</pallas_src>

<mosaic_0001>
module attributes {stable_mosaic.version = 11 : i64} {
  func.func @fused_forward_kernel(%arg0: memref<2x8xi32, #tpu.memory_space<vmem>>, %arg1: memref<256x384xbf16, #tpu.memory_space<vmem>>, %arg2: memref<1672x128xbf16, #tpu.memory_space<vmem>>, %arg3: memref<256x512xbf16, #tpu.memory_space<vmem>>, %arg4: memref<24x512xf32, #tpu.memory_space<vmem>>, %arg5: memref<2x128xf32, #tpu.memory_space<vmem>>) attributes {dimension_semantics = [], scalar_prefetch = 0 : i64, scratch_operands = 0 : i64, tpu.core_type = #tpu.core_type<tc>} {
    %c0 = arith.constant 0 : index
    %c0_0 = arith.constant 0 : index
    %0 = vector.load %arg0[%c0, %c0_0] : memref<2x8xi32, #tpu.memory_space<vmem>>, vector<2x8xi32>
    %c50_i32 = arith.constant 50 : i32
    %1 = vector.broadcast %c50_i32 : i32 to vector<2x8xi32>
    %2 = arith.cmpi sge, %0, %1 : vector<2x8xi32>
    %c60_i32 = arith.constant 60 : i32
    %3 = vector.broadcast %c60_i32 : i32 to vector<2x8xi32>
    %4 = arith.cmpi sle, %0, %3 : vector<2x8xi32>
    %5 = arith.andi %2, %4 : vector<2x8xi1>
    %c0_i32 = arith.constant 0 : i32
    %6 = vector.broadcast %c0_i32 : i32 to vector<2x8xi32>
    %7 = arith.select %5, %6, %0 : vector<2x8xi1>, vector<2x8xi32>
    %8 = tpu.iota {dimensions = array<i32: 1>} : vector<2x8xi32>
    %9 = arith.sitofp %8 : vector<2x8xi32> to vector<2x8xf32>
    %c1_i32 = arith.constant 1 : i32
    %10 = vector.broadcast %c1_i32 : i32 to vector<2x8xi32>
    %11 = arith.cmpi eq, %7, %10 : vector<2x8xi32>
    %cst = arith.constant -1.000000e+00 : f32
    %12 = vector.broadcast %cst : f32 to vector<2x8xf32>
    %13 = arith.select %11, %9, %12 : vector<2x8xi1>, vector<2x8xf32>
    %14 = tpu.iota {dimensions = array<i32: 1>} : vector<8x8xi32>
    %15 = tpu.iota {dimensions = array<i32: 0>} : vector<8x8xi32>
    %16 = arith.cmpi sle, %14, %15 : vector<8x8xi32>
    %17 = vector.shape_cast %16 : vector<8x8xi1> to vector<1x8x8xi1>
    %18 = vector.shape_cast %13 : vector<2x8xf32> to vector<2x1x8xf32>
    %cst_1 = arith.constant -1.000000e+00 : f32
    %19 = vector.shape_cast %17 : vector<1x8x8xi1> to vector<1x8x8xi1>
    %20 = vector.broadcast %19 : vector<1x8x8xi1> to vector<2x8x8xi1>
    %21 = vector.shape_cast %18 : vector<2x1x8xf32> to vector<2x1x8xf32>
    %22 = vector.broadcast %21 : vector<2x1x8xf32> to vector<2x8x8xf32>
    %23 = vector.broadcast %cst_1 : f32 to vector<2x8x8xf32>
    %24 = arith.select %20, %22, %23 : vector<2x8x8xi1>, vector<2x8x8xf32>
    %cst_2 = arith.constant dense<0xFF800000> : vector<2x8xf32>
    %25 = vector.multi_reduction <maximumf>, %24, %cst_2 [2] : vector<2x8x8xf32> to vector<2x8xf32>
    %cst_3 = arith.constant 0.000000e+00 : f32
    %26 = vector.broadcast %cst_3 : f32 to vector<2x8xf32>
    %27 = arith.cmpf oge, %25, %26 : vector<2x8xf32>
    %28 = arith.subf %9, %25 : vector<2x8xf32>
    %cst_4 = arith.constant 6.300000e+01 : f32
    %29 = vector.broadcast %cst_4 : f32 to vector<2x8xf32>
    %30 = arith.select %27, %28, %29 : vector<2x8xi1>, vector<2x8xf32>
    %cst_5 = arith.constant 6.300000e+01 : f32
    %31 = vector.broadcast %cst_5 : f32 to vector<2x8xf32>
    %32 = arith.minimumf %30, %31 : vector<2x8xf32>
    %33 = arith.fptosi %32 : vector<2x8xf32> to vector<2x8xi32>
    %34 = tpu.iota {dimensions = array<i32: 2>} : vector<2x8x128xi32>
    %35 = vector.shape_cast %7 : vector<2x8xi32> to vector<2x8x1xi32>
    %36 = vector.broadcast %35 : vector<2x8x1xi32> to vector<2x8x128xi32>
    %37 = arith.cmpi eq, %34, %36 : vector<2x8x128xi32>
    %c64_i32 = arith.constant 64 : i32
    %38 = vector.broadcast %c64_i32 : i32 to vector<2x8xi32>
    %39 = arith.addi %33, %38 : vector<2x8xi32>
    %40 = vector.shape_cast %39 : vector<2x8xi32> to vector<2x8x1xi32>
    %41 = vector.broadcast %40 : vector<2x8x1xi32> to vector<2x8x128xi32>
    %42 = arith.cmpi eq, %34, %41 : vector<2x8x128xi32>
    %43 = arith.ori %37, %42 : vector<2x8x128xi1>
    %44 = arith.extui %43 : vector<2x8x128xi1> to vector<2x8x128xi32>
    %45 = arith.sitofp %44 : vector<2x8x128xi32> to vector<2x8x128xf32>
    %46 = arith.truncf %45 : vector<2x8x128xf32> to vector<2x8x128xbf16>
    %47 = vector.shape_cast %46 : vector<2x8x128xbf16> to vector<16x128xbf16>
    %c0_6 = arith.constant 0 : index
    %c0_7 = arith.constant 0 : index
    %48 = vector.load %arg2[%c0_6, %c0_7] : memref<1672x128xbf16, #tpu.memory_space<vmem>>, vector<128x128xbf16>
    %cst_8 = arith.constant dense<0.000000e+00> : vector<16x128xf32>
    %49 = tpu.matmul %47, %48, %cst_8 {dimension_numbers = #tpu.dot_dimension_numbers<[1], [0], [0], [1], [0, 0, 1, 1], [], []>} : vector<16x128xbf16>, vector<128x128xbf16>, vector<16x128xf32> -> vector<16x128xf32>
    %c128 = arith.constant 128 : index
    %c0_9 = arith.constant 0 : index
    %50 = vector.load %arg2[%c128, %c0_9] : memref<1672x128xbf16, #tpu.memory_space<vmem>>, vector<8x128xbf16>
    %51 = arith.extf %50 : vector<8x128xbf16> to vector<8x128xf32>
    %52 = vector.shape_cast %49 : vector<16x128xf32> to vector<2x8x128xf32>
    %53 = vector.shape_cast %51 : vector<8x128xf32> to vector<1x8x128xf32>
    %54 = vector.broadcast %53 : vector<1x8x128xf32> to vector<2x8x128xf32>
    %55 = arith.addf %52, %54 : vector<2x8x128xf32>
    %56 = vector.shape_cast %55 : vector<2x8x128xf32> to vector<16x128xf32>
    %c0_10 = arith.constant 0 : index
    %c0_11 = arith.constant 0 : index
    %57 = vector.load %arg1[%c0_10, %c0_11] : memref<256x384xbf16, #tpu.memory_space<vmem>>, vector<128x384xbf16>
    %c136 = arith.constant 136 : index
    %c0_12 = arith.constant 0 : index
    %58 = vector.load %arg2[%c136, %c0_12] : memref<1672x128xbf16, #tpu.memory_space<vmem>>, vector<128x128xbf16>
    %c0_13 = arith.constant 0 : index
    %c0_14 = arith.constant 0 : index
    %59 = vector.load %arg3[%c0_13, %c0_14] : memref<256x512xbf16, #tpu.memory_space<vmem>>, vector<128x256xbf16>
    %c392 = arith.constant 392 : index
    %c0_15 = arith.constant 0 : index
    %60 = vector.load %arg2[%c392, %c0_15] : memref<1672x128xbf16, #tpu.memory_space<vmem>>, vector<256x128xbf16>
    %61 = arith.truncf %56 : vector<16x128xf32> to vector<16x128xbf16>
    %cst_16 = arith.constant dense<0.000000e+00> : vector<16x384xf32>
    %62 = tpu.matmul %61, %57, %cst_16 {dimension_numbers = #tpu.dot_dimension_numbers<[1], [0], [0], [1], [0, 0, 1, 1], [], []>} : vector<16x128xbf16>, vector<128x384xbf16>, vector<16x384xf32> -> vector<16x384xf32>
    %c0_17 = arith.constant 0 : index
    %c0_18 = arith.constant 0 : index
    %63 = vector.load %arg4[%c0_17, %c0_18] : memref<24x512xf32, #tpu.memory_space<vmem>>, vector<1x384xf32>
    %64 = vector.broadcast %63 : vector<1x384xf32> to vector<16x384xf32>
    %65 = arith.addf %62, %64 : vector<16x384xf32>
    %66 = arith.truncf %65 : vector<16x384xf32> to vector<16x384xbf16>
    %67 = vector.extract_strided_slice %66 {offsets = [0, 0], sizes = [16, 128], strides = [1, 1]} : vector<16x384xbf16> to vector<16x128xbf16>
    %68 = vector.shape_cast %67 : vector<16x128xbf16> to vector<2x8x128xbf16>
    %69 = vector.extract_strided_slice %66 {offsets = [0, 128], sizes = [16, 128], strides = [1, 1]} : vector<16x384xbf16> to vector<16x128xbf16>
    %70 = vector.shape_cast %69 : vector<16x128xbf16> to vector<2x8x128xbf16>
    %71 = vector.extract_strided_slice %66 {offsets = [0, 256], sizes = [16, 128], strides = [1, 1]} : vector<16x384xbf16> to vector<16x128xbf16>
    %72 = vector.shape_cast %71 : vector<16x128xbf16> to vector<2x8x128xbf16>
    %cst_19 = arith.constant 0.000000e+00 : f32
    %73 = vector.broadcast %cst_19 : f32 to vector<16x128xf32>
    %74 = vector.extract_strided_slice %68 {offsets = [0, 0, 0], sizes = [2, 8, 32], strides = [1, 1, 1]} : vector<2x8x128xbf16> to vector<2x8x32xbf16>
    %75 = vector.extract_strided_slice %70 {offsets = [0, 0, 0], sizes = [2, 8, 32], strides = [1, 1, 1]} : vector<2x8x128xbf16> to vector<2x8x32xbf16>
    "tpu.trace_start"() <{level = 10 : i32, message = "bqd,bkd->bqk"}> : () -> ()
    %cst_20 = arith.constant dense<0.000000e+00> : vector<2x8x8xf32>
    %76 = tpu.matmul %74, %75, %cst_20 {dimension_numbers = #tpu.dot_dimension_numbers<[2], [2], [1], [1], [0, 0, 0, 1, 1, 1], [0], [0]>} : vector<2x8x32xbf16>, vector<2x8x32xbf16>, vector<2x8x8xf32> -> vector<2x8x8xf32>
    "tpu.trace_stop"() : () -> ()
    %cst_21 = arith.constant dense<0xFF800000> : vector<2x8xf32>
    %77 = vector.multi_reduction <maximumf>, %76, %cst_21 [2] : vector<2x8x8xf32> to vector<2x8xf32>
    %78 = vector.shape_cast %77 : vector<2x8xf32> to vector<2x8x1xf32>
    %79 = vector.broadcast %78 : vector<2x8x1xf32> to vector<2x8x8xf32>
    %80 = arith.subf %76, %79 : vector<2x8x8xf32>
    %81 = math.exp %80 : vector<2x8x8xf32>
    %cst_22 = arith.constant dense<0.000000e+00> : vector<2x8xf32>
    %82 = vector.multi_reduction <add>, %81, %cst_22 [2] : vector<2x8x8xf32> to vector<2x8xf32>
    %83 = vector.shape_cast %82 : vector<2x8xf32> to vector<2x8x1xf32>
    %84 = tpu.reciprocal %83 {approx = true} : vector<2x8x1xf32> -> vector<2x8x1xf32>
    %85 = vector.broadcast %84 : vector<2x8x1xf32> to vector<2x8x8xf32>
    %86 = arith.mulf %81, %85 : vector<2x8x8xf32>
    %87 = arith.truncf %86 : vector<2x8x8xf32> to vector<2x8x8xbf16>
    %88 = vector.extract_strided_slice %72 {offsets = [0, 0, 0], sizes = [2, 8, 32], strides = [1, 1, 1]} : vector<2x8x128xbf16> to vector<2x8x32xbf16>
    "tpu.trace_start"() <{level = 10 : i32, message = "bqk,bkd->bqd"}> : () -> ()
    %cst_23 = arith.constant dense<0.000000e+00> : vector<2x8x32xf32>
    %89 = tpu.matmul %87, %88, %cst_23 {dimension_numbers = #tpu.dot_dimension_numbers<[2], [1], [1], [2], [0, 0, 0, 1, 1, 2], [0], [0]>} : vector<2x8x8xbf16>, vector<2x8x32xbf16>, vector<2x8x32xf32> -> vector<2x8x32xf32>
    "tpu.trace_stop"() : () -> ()
    %90 = vector.shape_cast %89 : vector<2x8x32xf32> to vector<16x32xf32>
    %91 = arith.truncf %90 : vector<16x32xf32> to vector<16x32xbf16>
    %92 = vector.extract_strided_slice %58 {offsets = [0, 0], sizes = [32, 128], strides = [1, 1]} : vector<128x128xbf16> to vector<32x128xbf16>
    %cst_24 = arith.constant dense<0.000000e+00> : vector<16x128xf32>
    %93 = tpu.matmul %91, %92, %cst_24 {dimension_numbers = #tpu.dot_dimension_numbers<[1], [0], [0], [1], [0, 0, 1, 1], [], []>} : vector<16x32xbf16>, vector<32x128xbf16>, vector<16x128xf32> -> vector<16x128xf32>
    %94 = arith.addf %73, %93 : vector<16x128xf32>
    %95 = vector.extract_strided_slice %68 {offsets = [0, 0, 32], sizes = [2, 8, 32], strides = [1, 1, 1]} : vector<2x8x128xbf16> to vector<2x8x32xbf16>
    %96 = vector.extract_strided_slice %70 {offsets = [0, 0, 32], sizes = [2, 8, 32], strides = [1, 1, 1]} : vector<2x8x128xbf16> to vector<2x8x32xbf16>
    "tpu.trace_start"() <{level = 10 : i32, message = "bqd,bkd->bqk"}> : () -> ()
    %cst_25 = arith.constant dense<0.000000e+00> : vector<2x8x8xf32>
    %97 = tpu.matmul %95, %96, %cst_25 {dimension_numbers = #tpu.dot_dimension_numbers<[2], [2], [1], [1], [0, 0, 0, 1, 1, 1], [0], [0]>} : vector<2x8x32xbf16>, vector<2x8x32xbf16>, vector<2x8x8xf32> -> vector<2x8x8xf32>
    "tpu.trace_stop"() : () -> ()
    %cst_26 = arith.constant dense<0xFF800000> : vector<2x8xf32>
    %98 = vector.multi_reduction <maximumf>, %97, %cst_26 [2] : vector<2x8x8xf32> to vector<2x8xf32>
    %99 = vector.shape_cast %98 : vector<2x8xf32> to vector<2x8x1xf32>
    %100 = vector.broadcast %99 : vector<2x8x1xf32> to vector<2x8x8xf32>
    %101 = arith.subf %97, %100 : vector<2x8x8xf32>
    %102 = math.exp %101 : vector<2x8x8xf32>
    %cst_27 = arith.constant dense<0.000000e+00> : vector<2x8xf32>
    %103 = vector.multi_reduction <add>, %102, %cst_27 [2] : vector<2x8x8xf32> to vector<2x8xf32>
    %104 = vector.shape_cast %103 : vector<2x8xf32> to vector<2x8x1xf32>
    %105 = tpu.reciprocal %104 {approx = true} : vector<2x8x1xf32> -> vector<2x8x1xf32>
    %106 = vector.broadcast %105 : vector<2x8x1xf32> to vector<2x8x8xf32>
    %107 = arith.mulf %102, %106 : vector<2x8x8xf32>
    %108 = arith.truncf %107 : vector<2x8x8xf32> to vector<2x8x8xbf16>
    %109 = vector.extract_strided_slice %72 {offsets = [0, 0, 32], sizes = [2, 8, 32], strides = [1, 1, 1]} : vector<2x8x128xbf16> to vector<2x8x32xbf16>
    "tpu.trace_start"() <{level = 10 : i32, message = "bqk,bkd->bqd"}> : () -> ()
    %cst_28 = arith.constant dense<0.000000e+00> : vector<2x8x32xf32>
    %110 = tpu.matmul %108, %109, %cst_28 {dimension_numbers = #tpu.dot_dimension_numbers<[2], [1], [1], [2], [0, 0, 0, 1, 1, 2], [0], [0]>} : vector<2x8x8xbf16>, vector<2x8x32xbf16>, vector<2x8x32xf32> -> vector<2x8x32xf32>
    "tpu.trace_stop"() : () -> ()
    %111 = vector.shape_cast %110 : vector<2x8x32xf32> to vector<16x32xf32>
    %112 = arith.truncf %111 : vector<16x32xf32> to vector<16x32xbf16>
    %113 = vector.extract_strided_slice %58 {offsets = [32, 0], sizes = [32, 128], strides = [1, 1]} : vector<128x128xbf16> to vector<32x128xbf16>
    %cst_29 = arith.constant dense<0.000000e+00> : vector<16x128xf32>
    %114 = tpu.matmul %112, %113, %cst_29 {dimension_numbers = #tpu.dot_dimension_numbers<[1], [0], [0], [1], [0, 0, 1, 1], [], []>} : vector<16x32xbf16>, vector<32x128xbf16>, vector<16x128xf32> -> vector<16x128xf32>
    %115 = arith.addf %94, %114 : vector<16x128xf32>
    %116 = vector.extract_strided_slice %68 {offsets = [0, 0, 64], sizes = [2, 8, 32], strides = [1, 1, 1]} : vector<2x8x128xbf16> to vector<2x8x32xbf16>
    %117 = vector.extract_strided_slice %70 {offsets = [0, 0, 64], sizes = [2, 8, 32], strides = [1, 1, 1]} : vector<2x8x128xbf16> to vector<2x8x32xbf16>
    "tpu.trace_start"() <{level = 10 : i32, message = "bqd,bkd->bqk"}> : () -> ()
    %cst_30 = arith.constant dense<0.000000e+00> : vector<2x8x8xf32>
    %118 = tpu.matmul %116, %117, %cst_30 {dimension_numbers = #tpu.dot_dimension_numbers<[2], [2], [1], [1], [0, 0, 0, 1, 1, 1], [0], [0]>} : vector<2x8x32xbf16>, vector<2x8x32xbf16>, vector<2x8x8xf32> -> vector<2x8x8xf32>
    "tpu.trace_stop"() : () -> ()
    %cst_31 = arith.constant dense<0xFF800000> : vector<2x8xf32>
    %119 = vector.multi_reduction <maximumf>, %118, %cst_31 [2] : vector<2x8x8xf32> to vector<2x8xf32>
    %120 = vector.shape_cast %119 : vector<2x8xf32> to vector<2x8x1xf32>
    %121 = vector.broadcast %120 : vector<2x8x1xf32> to vector<2x8x8xf32>
    %122 = arith.subf %118, %121 : vector<2x8x8xf32>
    %123 = math.exp %122 : vector<2x8x8xf32>
    %cst_32 = arith.constant dense<0.000000e+00> : vector<2x8xf32>
    %124 = vector.multi_reduction <add>, %123, %cst_32 [2] : vector<2x8x8xf32> to vector<2x8xf32>
    %125 = vector.shape_cast %124 : vector<2x8xf32> to vector<2x8x1xf32>
    %126 = tpu.reciprocal %125 {approx = true} : vector<2x8x1xf32> -> vector<2x8x1xf32>
    %127 = vector.broadcast %126 : vector<2x8x1xf32> to vector<2x8x8xf32>
    %128 = arith.mulf %123, %127 : vector<2x8x8xf32>
    %129 = arith.truncf %128 : vector<2x8x8xf32> to vector<2x8x8xbf16>
    %130 = vector.extract_strided_slice %72 {offsets = [0, 0, 64], sizes = [2, 8, 32], strides = [1, 1, 1]} : vector<2x8x128xbf16> to vector<2x8x32xbf16>
    "tpu.trace_start"() <{level = 10 : i32, message = "bqk,bkd->bqd"}> : () -> ()
    %cst_33 = arith.constant dense<0.000000e+00> : vector<2x8x32xf32>
    %131 = tpu.matmul %129, %130, %cst_33 {dimension_numbers = #tpu.dot_dimension_numbers<[2], [1], [1], [2], [0, 0, 0, 1, 1, 2], [0], [0]>} : vector<2x8x8xbf16>, vector<2x8x32xbf16>, vector<2x8x32xf32> -> vector<2x8x32xf32>
    "tpu.trace_stop"() : () -> ()
    %132 = vector.shape_cast %131 : vector<2x8x32xf32> to vector<16x32xf32>
    %133 = arith.truncf %132 : vector<16x32xf32> to vector<16x32xbf16>
    %134 = vector.extract_strided_slice %58 {offsets = [64, 0], sizes = [32, 128], strides = [1, 1]} : vector<128x128xbf16> to vector<32x128xbf16>
    %cst_34 = arith.constant dense<0.000000e+00> : vector<16x128xf32>
    %135 = tpu.matmul %133, %134, %cst_34 {dimension_numbers = #tpu.dot_dimension_numbers<[1], [0], [0], [1], [0, 0, 1, 1], [], []>} : vector<16x32xbf16>, vector<32x128xbf16>, vector<16x128xf32> -> vector<16x128xf32>
    %136 = arith.addf %115, %135 : vector<16x128xf32>
    %137 = vector.extract_strided_slice %68 {offsets = [0, 0, 96], sizes = [2, 8, 32], strides = [1, 1, 1]} : vector<2x8x128xbf16> to vector<2x8x32xbf16>
    %138 = vector.extract_strided_slice %70 {offsets = [0, 0, 96], sizes = [2, 8, 32], strides = [1, 1, 1]} : vector<2x8x128xbf16> to vector<2x8x32xbf16>
    "tpu.trace_start"() <{level = 10 : i32, message = "bqd,bkd->bqk"}> : () -> ()
    %cst_35 = arith.constant dense<0.000000e+00> : vector<2x8x8xf32>
    %139 = tpu.matmul %137, %138, %cst_35 {dimension_numbers = #tpu.dot_dimension_numbers<[2], [2], [1], [1], [0, 0, 0, 1, 1, 1], [0], [0]>} : vector<2x8x32xbf16>, vector<2x8x32xbf16>, vector<2x8x8xf32> -> vector<2x8x8xf32>
    "tpu.trace_stop"() : () -> ()
    %cst_36 = arith.constant dense<0xFF800000> : vector<2x8xf32>
    %140 = vector.multi_reduction <maximumf>, %139, %cst_36 [2] : vector<2x8x8xf32> to vector<2x8xf32>
    %141 = vector.shape_cast %140 : vector<2x8xf32> to vector<2x8x1xf32>
    %142 = vector.broadcast %141 : vector<2x8x1xf32> to vector<2x8x8xf32>
    %143 = arith.subf %139, %142 : vector<2x8x8xf32>
    %144 = math.exp %143 : vector<2x8x8xf32>
    %cst_37 = arith.constant dense<0.000000e+00> : vector<2x8xf32>
    %145 = vector.multi_reduction <add>, %144, %cst_37 [2] : vector<2x8x8xf32> to vector<2x8xf32>
    %146 = vector.shape_cast %145 : vector<2x8xf32> to vector<2x8x1xf32>
    %147 = tpu.reciprocal %146 {approx = true} : vector<2x8x1xf32> -> vector<2x8x1xf32>
    %148 = vector.broadcast %147 : vector<2x8x1xf32> to vector<2x8x8xf32>
    %149 = arith.mulf %144, %148 : vector<2x8x8xf32>
    %150 = arith.truncf %149 : vector<2x8x8xf32> to vector<2x8x8xbf16>
    %151 = vector.extract_strided_slice %72 {offsets = [0, 0, 96], sizes = [2, 8, 32], strides = [1, 1, 1]} : vector<2x8x128xbf16> to vector<2x8x32xbf16>
    "tpu.trace_start"() <{level = 10 : i32, message = "bqk,bkd->bqd"}> : () -> ()
    %cst_38 = arith.constant dense<0.000000e+00> : vector<2x8x32xf32>
    %152 = tpu.matmul %150, %151, %cst_38 {dimension_numbers = #tpu.dot_dimension_numbers<[2], [1], [1], [2], [0, 0, 0, 1, 1, 2], [0], [0]>} : vector<2x8x8xbf16>, vector<2x8x32xbf16>, vector<2x8x32xf32> -> vector<2x8x32xf32>
    "tpu.trace_stop"() : () -> ()
    %153 = vector.shape_cast %152 : vector<2x8x32xf32> to vector<16x32xf32>
    %154 = arith.truncf %153 : vector<16x32xf32> to vector<16x32xbf16>
    %155 = vector.extract_strided_slice %58 {offsets = [96, 0], sizes = [32, 128], strides = [1, 1]} : vector<128x128xbf16> to vector<32x128xbf16>
    %cst_39 = arith.constant dense<0.000000e+00> : vector<16x128xf32>
    %156 = tpu.matmul %154, %155, %cst_39 {dimension_numbers = #tpu.dot_dimension_numbers<[1], [0], [0], [1], [0, 0, 1, 1], [], []>} : vector<16x32xbf16>, vector<32x128xbf16>, vector<16x128xf32> -> vector<16x128xf32>
    %157 = arith.addf %136, %156 : vector<16x128xf32>
    %c1 = arith.constant 1 : index
    %c0_40 = arith.constant 0 : index
    %158 = vector.load %arg4[%c1, %c0_40] : memref<24x512xf32, #tpu.memory_space<vmem>>, vector<1x128xf32>
    %159 = vector.broadcast %158 : vector<1x128xf32> to vector<16x128xf32>
    %160 = arith.addf %157, %159 : vector<16x128xf32>
    %161 = arith.addf %56, %160 : vector<16x128xf32>
    %c2 = arith.constant 2 : index
    %c0_41 = arith.constant 0 : index
    %162 = vector.load %arg4[%c2, %c0_41] : memref<24x512xf32, #tpu.memory_space<vmem>>, vector<1x128xf32>
    %c3 = arith.constant 3 : index
    %c0_42 = arith.constant 0 : index
    %163 = vector.load %arg4[%c3, %c0_42] : memref<24x512xf32, #tpu.memory_space<vmem>>, vector<1x128xf32>
    %cst_43 = arith.constant dense<0.000000e+00> : vector<16xf32>
    %164 = vector.multi_reduction <add>, %161, %cst_43 [1] : vector<16x128xf32> to vector<16xf32>
    %165 = vector.shape_cast %164 : vector<16xf32> to vector<16x1xf32>
    %cst_44 = arith.constant 1.280000e+02 : f32
    %166 = vector.broadcast %cst_44 : f32 to vector<16x1xf32>
    %167 = arith.divf %165, %166 : vector<16x1xf32>
    %168 = arith.mulf %161, %161 : vector<16x128xf32>
    %cst_45 = arith.constant dense<0.000000e+00> : vector<16xf32>
    %169 = vector.multi_reduction <add>, %168, %cst_45 [1] : vector<16x128xf32> to vector<16xf32>
    %170 = vector.shape_cast %169 : vector<16xf32> to vector<16x1xf32>
    %cst_46 = arith.constant 1.280000e+02 : f32
    %171 = vector.broadcast %cst_46 : f32 to vector<16x1xf32>
    %172 = arith.divf %170, %171 : vector<16x1xf32>
    %173 = arith.mulf %167, %167 : vector<16x1xf32>
    %174 = arith.subf %172, %173 : vector<16x1xf32>
    %175 = vector.broadcast %167 : vector<16x1xf32> to vector<16x128xf32>
    %176 = arith.subf %161, %175 : vector<16x128xf32>
    %cst_47 = arith.constant 9.99999974E-6 : f32
    %177 = vector.broadcast %cst_47 : f32 to vector<16x1xf32>
    %178 = arith.addf %174, %177 : vector<16x1xf32>
    %179 = math.rsqrt %178 : vector<16x1xf32>
    %180 = vector.broadcast %179 : vector<16x1xf32> to vector<16x128xf32>
    %181 = vector.broadcast %162 : vector<1x128xf32> to vector<16x128xf32>
    %182 = arith.mulf %180, %181 : vector<16x128xf32>
    %183 = arith.mulf %176, %182 : vector<16x128xf32>
    %184 = vector.broadcast %163 : vector<1x128xf32> to vector<16x128xf32>
    %185 = arith.addf %183, %184 : vector<16x128xf32>
    %186 = arith.truncf %185 : vector<16x128xf32> to vector<16x128xbf16>
    %cst_48 = arith.constant dense<0.000000e+00> : vector<16x256xf32>
    %187 = tpu.matmul %186, %59, %cst_48 {dimension_numbers = #tpu.dot_dimension_numbers<[1], [0], [0], [1], [0, 0, 1, 1], [], []>} : vector<16x128xbf16>, vector<128x256xbf16>, vector<16x256xf32> -> vector<16x256xf32>
    %c4 = arith.constant 4 : index
    %c0_49 = arith.constant 0 : index
    %188 = vector.load %arg4[%c4, %c0_49] : memref<24x512xf32, #tpu.memory_space<vmem>>, vector<1x256xf32>
    %189 = vector.broadcast %188 : vector<1x256xf32> to vector<16x256xf32>
    %190 = arith.addf %187, %189 : vector<16x256xf32>
    %cst_50 = arith.constant 0.000000e+00 : f32
    %191 = vector.broadcast %cst_50 : f32 to vector<16x256xf32>
    %192 = arith.maximumf %190, %191 : vector<16x256xf32>
    %193 = arith.truncf %192 : vector<16x256xf32> to vector<16x256xbf16>
    %cst_51 = arith.constant dense<0.000000e+00> : vector<16x128xf32>
    %194 = tpu.matmul %193, %60, %cst_51 {dimension_numbers = #tpu.dot_dimension_numbers<[1], [0], [0], [1], [0, 0, 1, 1], [], []>} : vector<16x256xbf16>, vector<256x128xbf16>, vector<16x128xf32> -> vector<16x128xf32>
    %c5 = arith.constant 5 : index
    %c0_52 = arith.constant 0 : index
    %195 = vector.load %arg4[%c5, %c0_52] : memref<24x512xf32, #tpu.memory_space<vmem>>, vector<1x128xf32>
    %196 = vector.broadcast %195 : vector<1x128xf32> to vector<16x128xf32>
    %197 = arith.addf %194, %196 : vector<16x128xf32>
    %198 = arith.addf %185, %197 : vector<16x128xf32>
    %c6 = arith.constant 6 : index
    %c0_53 = arith.constant 0 : index
    %199 = vector.load %arg4[%c6, %c0_53] : memref<24x512xf32, #tpu.memory_space<vmem>>, vector<1x128xf32>
    %c7 = arith.constant 7 : index
    %c0_54 = arith.constant 0 : index
    %200 = vector.load %arg4[%c7, %c0_54] : memref<24x512xf32, #tpu.memory_space<vmem>>, vector<1x128xf32>
    %cst_55 = arith.constant dense<0.000000e+00> : vector<16xf32>
    %201 = vector.multi_reduction <add>, %198, %cst_55 [1] : vector<16x128xf32> to vector<16xf32>
    %202 = vector.shape_cast %201 : vector<16xf32> to vector<16x1xf32>
    %cst_56 = arith.constant 1.280000e+02 : f32
    %203 = vector.broadcast %cst_56 : f32 to vector<16x1xf32>
    %204 = arith.divf %202, %203 : vector<16x1xf32>
    %205 = arith.mulf %198, %198 : vector<16x128xf32>
    %cst_57 = arith.constant dense<0.000000e+00> : vector<16xf32>
    %206 = vector.multi_reduction <add>, %205, %cst_57 [1] : vector<16x128xf32> to vector<16xf32>
    %207 = vector.shape_cast %206 : vector<16xf32> to vector<16x1xf32>
    %cst_58 = arith.constant 1.280000e+02 : f32
    %208 = vector.broadcast %cst_58 : f32 to vector<16x1xf32>
    %209 = arith.divf %207, %208 : vector<16x1xf32>
    %210 = arith.mulf %204, %204 : vector<16x1xf32>
    %211 = arith.subf %209, %210 : vector<16x1xf32>
    %212 = vector.broadcast %204 : vector<16x1xf32> to vector<16x128xf32>
    %213 = arith.subf %198, %212 : vector<16x128xf32>
    %cst_59 = arith.constant 9.99999974E-6 : f32
    %214 = vector.broadcast %cst_59 : f32 to vector<16x1xf32>
    %215 = arith.addf %211, %214 : vector<16x1xf32>
    %216 = math.rsqrt %215 : vector<16x1xf32>
    %217 = vector.broadcast %216 : vector<16x1xf32> to vector<16x128xf32>
    %218 = vector.broadcast %199 : vector<1x128xf32> to vector<16x128xf32>
    %219 = arith.mulf %217, %218 : vector<16x128xf32>
    %220 = arith.mulf %213, %219 : vector<16x128xf32>
    %221 = vector.broadcast %200 : vector<1x128xf32> to vector<16x128xf32>
    %222 = arith.addf %220, %221 : vector<16x128xf32>
    %c128_60 = arith.constant 128 : index
    %c0_61 = arith.constant 0 : index
    %223 = vector.load %arg1[%c128_60, %c0_61] : memref<256x384xbf16, #tpu.memory_space<vmem>>, vector<128x384xbf16>
    %c264 = arith.constant 264 : index
    %c0_62 = arith.constant 0 : index
    %224 = vector.load %arg2[%c264, %c0_62] : memref<1672x128xbf16, #tpu.memory_space<vmem>>, vector<128x128xbf16>
    %c0_63 = arith.constant 0 : index
    %c256 = arith.constant 256 : index
    %225 = vector.load %arg3[%c0_63, %c256] : memref<256x512xbf16, #tpu.memory_space<vmem>>, vector<128x256xbf16>
    %c648 = arith.constant 648 : index
    %c0_64 = arith.constant 0 : index
    %226 = vector.load %arg2[%c648, %c0_64] : memref<1672x128xbf16, #tpu.memory_space<vmem>>, vector<256x128xbf16>
    %227 = arith.truncf %222 : vector<16x128xf32> to vector<16x128xbf16>
    %cst_65 = arith.constant dense<0.000000e+00> : vector<16x384xf32>
    %228 = tpu.matmul %227, %223, %cst_65 {dimension_numbers = #tpu.dot_dimension_numbers<[1], [0], [0], [1], [0, 0, 1, 1], [], []>} : vector<16x128xbf16>, vector<128x384xbf16>, vector<16x384xf32> -> vector<16x384xf32>
    %c8 = arith.constant 8 : index
    %c0_66 = arith.constant 0 : index
    %229 = vector.load %arg4[%c8, %c0_66] : memref<24x512xf32, #tpu.memory_space<vmem>>, vector<1x384xf32>
    %230 = vector.broadcast %229 : vector<1x384xf32> to vector<16x384xf32>
    %231 = arith.addf %228, %230 : vector<16x384xf32>
    %232 = arith.truncf %231 : vector<16x384xf32> to vector<16x384xbf16>
    %233 = vector.extract_strided_slice %232 {offsets = [0, 0], sizes = [16, 128], strides = [1, 1]} : vector<16x384xbf16> to vector<16x128xbf16>
    %234 = vector.shape_cast %233 : vector<16x128xbf16> to vector<2x8x128xbf16>
    %235 = vector.extract_strided_slice %232 {offsets = [0, 128], sizes = [16, 128], strides = [1, 1]} : vector<16x384xbf16> to vector<16x128xbf16>
    %236 = vector.shape_cast %235 : vector<16x128xbf16> to vector<2x8x128xbf16>
    %237 = vector.extract_strided_slice %232 {offsets = [0, 256], sizes = [16, 128], strides = [1, 1]} : vector<16x384xbf16> to vector<16x128xbf16>
    %238 = vector.shape_cast %237 : vector<16x128xbf16> to vector<2x8x128xbf16>
    %cst_67 = arith.constant 0.000000e+00 : f32
    %239 = vector.broadcast %cst_67 : f32 to vector<16x128xf32>
    %240 = vector.extract_strided_slice %234 {offsets = [0, 0, 0], sizes = [2, 8, 32], strides = [1, 1, 1]} : vector<2x8x128xbf16> to vector<2x8x32xbf16>
    %241 = vector.extract_strided_slice %236 {offsets = [0, 0, 0], sizes = [2, 8, 32], strides = [1, 1, 1]} : vector<2x8x128xbf16> to vector<2x8x32xbf16>
    "tpu.trace_start"() <{level = 10 : i32, message = "bqd,bkd->bqk"}> : () -> ()
    %cst_68 = arith.constant dense<0.000000e+00> : vector<2x8x8xf32>
    %242 = tpu.matmul %240, %241, %cst_68 {dimension_numbers = #tpu.dot_dimension_numbers<[2], [2], [1], [1], [0, 0, 0, 1, 1, 1], [0], [0]>} : vector<2x8x32xbf16>, vector<2x8x32xbf16>, vector<2x8x8xf32> -> vector<2x8x8xf32>
    "tpu.trace_stop"() : () -> ()
    %cst_69 = arith.constant dense<0xFF800000> : vector<2x8xf32>
    %243 = vector.multi_reduction <maximumf>, %242, %cst_69 [2] : vector<2x8x8xf32> to vector<2x8xf32>
    %244 = vector.shape_cast %243 : vector<2x8xf32> to vector<2x8x1xf32>
    %245 = vector.broadcast %244 : vector<2x8x1xf32> to vector<2x8x8xf32>
    %246 = arith.subf %242, %245 : vector<2x8x8xf32>
    %247 = math.exp %246 : vector<2x8x8xf32>
    %cst_70 = arith.constant dense<0.000000e+00> : vector<2x8xf32>
    %248 = vector.multi_reduction <add>, %247, %cst_70 [2] : vector<2x8x8xf32> to vector<2x8xf32>
    %249 = vector.shape_cast %248 : vector<2x8xf32> to vector<2x8x1xf32>
    %250 = tpu.reciprocal %249 {approx = true} : vector<2x8x1xf32> -> vector<2x8x1xf32>
    %251 = vector.broadcast %250 : vector<2x8x1xf32> to vector<2x8x8xf32>
    %252 = arith.mulf %247, %251 : vector<2x8x8xf32>
    %253 = arith.truncf %252 : vector<2x8x8xf32> to vector<2x8x8xbf16>
    %254 = vector.extract_strided_slice %238 {offsets = [0, 0, 0], sizes = [2, 8, 32], strides = [1, 1, 1]} : vector<2x8x128xbf16> to vector<2x8x32xbf16>
    "tpu.trace_start"() <{level = 10 : i32, message = "bqk,bkd->bqd"}> : () -> ()
    %cst_71 = arith.constant dense<0.000000e+00> : vector<2x8x32xf32>
    %255 = tpu.matmul %253, %254, %cst_71 {dimension_numbers = #tpu.dot_dimension_numbers<[2], [1], [1], [2], [0, 0, 0, 1, 1, 2], [0], [0]>} : vector<2x8x8xbf16>, vector<2x8x32xbf16>, vector<2x8x32xf32> -> vector<2x8x32xf32>
    "tpu.trace_stop"() : () -> ()
    %256 = vector.shape_cast %255 : vector<2x8x32xf32> to vector<16x32xf32>
    %257 = arith.truncf %256 : vector<16x32xf32> to vector<16x32xbf16>
    %258 = vector.extract_strided_slice %224 {offsets = [0, 0], sizes = [32, 128], strides = [1, 1]} : vector<128x128xbf16> to vector<32x128xbf16>
    %cst_72 = arith.constant dense<0.000000e+00> : vector<16x128xf32>
    %259 = tpu.matmul %257, %258, %cst_72 {dimension_numbers = #tpu.dot_dimension_numbers<[1], [0], [0], [1], [0, 0, 1, 1], [], []>} : vector<16x32xbf16>, vector<32x128xbf16>, vector<16x128xf32> -> vector<16x128xf32>
    %260 = arith.addf %239, %259 : vector<16x128xf32>
    %261 = vector.extract_strided_slice %234 {offsets = [0, 0, 32], sizes = [2, 8, 32], strides = [1, 1, 1]} : vector<2x8x128xbf16> to vector<2x8x32xbf16>
    %262 = vector.extract_strided_slice %236 {offsets = [0, 0, 32], sizes = [2, 8, 32], strides = [1, 1, 1]} : vector<2x8x128xbf16> to vector<2x8x32xbf16>
    "tpu.trace_start"() <{level = 10 : i32, message = "bqd,bkd->bqk"}> : () -> ()
    %cst_73 = arith.constant dense<0.000000e+00> : vector<2x8x8xf32>
    %263 = tpu.matmul %261, %262, %cst_73 {dimension_numbers = #tpu.dot_dimension_numbers<[2], [2], [1], [1], [0, 0, 0, 1, 1, 1], [0], [0]>} : vector<2x8x32xbf16>, vector<2x8x32xbf16>, vector<2x8x8xf32> -> vector<2x8x8xf32>
    "tpu.trace_stop"() : () -> ()
    %cst_74 = arith.constant dense<0xFF800000> : vector<2x8xf32>
    %264 = vector.multi_reduction <maximumf>, %263, %cst_74 [2] : vector<2x8x8xf32> to vector<2x8xf32>
    %265 = vector.shape_cast %264 : vector<2x8xf32> to vector<2x8x1xf32>
    %266 = vector.broadcast %265 : vector<2x8x1xf32> to vector<2x8x8xf32>
    %267 = arith.subf %263, %266 : vector<2x8x8xf32>
    %268 = math.exp %267 : vector<2x8x8xf32>
    %cst_75 = arith.constant dense<0.000000e+00> : vector<2x8xf32>
    %269 = vector.multi_reduction <add>, %268, %cst_75 [2] : vector<2x8x8xf32> to vector<2x8xf32>
    %270 = vector.shape_cast %269 : vector<2x8xf32> to vector<2x8x1xf32>
    %271 = tpu.reciprocal %270 {approx = true} : vector<2x8x1xf32> -> vector<2x8x1xf32>
    %272 = vector.broadcast %271 : vector<2x8x1xf32> to vector<2x8x8xf32>
    %273 = arith.mulf %268, %272 : vector<2x8x8xf32>
    %274 = arith.truncf %273 : vector<2x8x8xf32> to vector<2x8x8xbf16>
    %275 = vector.extract_strided_slice %238 {offsets = [0, 0, 32], sizes = [2, 8, 32], strides = [1, 1, 1]} : vector<2x8x128xbf16> to vector<2x8x32xbf16>
    "tpu.trace_start"() <{level = 10 : i32, message = "bqk,bkd->bqd"}> : () -> ()
    %cst_76 = arith.constant dense<0.000000e+00> : vector<2x8x32xf32>
    %276 = tpu.matmul %274, %275, %cst_76 {dimension_numbers = #tpu.dot_dimension_numbers<[2], [1], [1], [2], [0, 0, 0, 1, 1, 2], [0], [0]>} : vector<2x8x8xbf16>, vector<2x8x32xbf16>, vector<2x8x32xf32> -> vector<2x8x32xf32>
    "tpu.trace_stop"() : () -> ()
    %277 = vector.shape_cast %276 : vector<2x8x32xf32> to vector<16x32xf32>
    %278 = arith.truncf %277 : vector<16x32xf32> to vector<16x32xbf16>
    %279 = vector.extract_strided_slice %224 {offsets = [32, 0], sizes = [32, 128], strides = [1, 1]} : vector<128x128xbf16> to vector<32x128xbf16>
    %cst_77 = arith.constant dense<0.000000e+00> : vector<16x128xf32>
    %280 = tpu.matmul %278, %279, %cst_77 {dimension_numbers = #tpu.dot_dimension_numbers<[1], [0], [0], [1], [0, 0, 1, 1], [], []>} : vector<16x32xbf16>, vector<32x128xbf16>, vector<16x128xf32> -> vector<16x128xf32>
    %281 = arith.addf %260, %280 : vector<16x128xf32>
    %282 = vector.extract_strided_slice %234 {offsets = [0, 0, 64], sizes = [2, 8, 32], strides = [1, 1, 1]} : vector<2x8x128xbf16> to vector<2x8x32xbf16>
    %283 = vector.extract_strided_slice %236 {offsets = [0, 0, 64], sizes = [2, 8, 32], strides = [1, 1, 1]} : vector<2x8x128xbf16> to vector<2x8x32xbf16>
    "tpu.trace_start"() <{level = 10 : i32, message = "bqd,bkd->bqk"}> : () -> ()
    %cst_78 = arith.constant dense<0.000000e+00> : vector<2x8x8xf32>
    %284 = tpu.matmul %282, %283, %cst_78 {dimension_numbers = #tpu.dot_dimension_numbers<[2], [2], [1], [1], [0, 0, 0, 1, 1, 1], [0], [0]>} : vector<2x8x32xbf16>, vector<2x8x32xbf16>, vector<2x8x8xf32> -> vector<2x8x8xf32>
    "tpu.trace_stop"() : () -> ()
    %cst_79 = arith.constant dense<0xFF800000> : vector<2x8xf32>
    %285 = vector.multi_reduction <maximumf>, %284, %cst_79 [2] : vector<2x8x8xf32> to vector<2x8xf32>
    %286 = vector.shape_cast %285 : vector<2x8xf32> to vector<2x8x1xf32>
    %287 = vector.broadcast %286 : vector<2x8x1xf32> to vector<2x8x8xf32>
    %288 = arith.subf %284, %287 : vector<2x8x8xf32>
    %289 = math.exp %288 : vector<2x8x8xf32>
    %cst_80 = arith.constant dense<0.000000e+00> : vector<2x8xf32>
    %290 = vector.multi_reduction <add>, %289, %cst_80 [2] : vector<2x8x8xf32> to vector<2x8xf32>
    %291 = vector.shape_cast %290 : vector<2x8xf32> to vector<2x8x1xf32>
    %292 = tpu.reciprocal %291 {approx = true} : vector<2x8x1xf32> -> vector<2x8x1xf32>
    %293 = vector.broadcast %292 : vector<2x8x1xf32> to vector<2x8x8xf32>
    %294 = arith.mulf %289, %293 : vector<2x8x8xf32>
    %295 = arith.truncf %294 : vector<2x8x8xf32> to vector<2x8x8xbf16>
    %296 = vector.extract_strided_slice %238 {offsets = [0, 0, 64], sizes = [2, 8, 32], strides = [1, 1, 1]} : vector<2x8x128xbf16> to vector<2x8x32xbf16>
    "tpu.trace_start"() <{level = 10 : i32, message = "bqk,bkd->bqd"}> : () -> ()
    %cst_81 = arith.constant dense<0.000000e+00> : vector<2x8x32xf32>
    %297 = tpu.matmul %295, %296, %cst_81 {dimension_numbers = #tpu.dot_dimension_numbers<[2], [1], [1], [2], [0, 0, 0, 1, 1, 2], [0], [0]>} : vector<2x8x8xbf16>, vector<2x8x32xbf16>, vector<2x8x32xf32> -> vector<2x8x32xf32>
    "tpu.trace_stop"() : () -> ()
    %298 = vector.shape_cast %297 : vector<2x8x32xf32> to vector<16x32xf32>
    %299 = arith.truncf %298 : vector<16x32xf32> to vector<16x32xbf16>
    %300 = vector.extract_strided_slice %224 {offsets = [64, 0], sizes = [32, 128], strides = [1, 1]} : vector<128x128xbf16> to vector<32x128xbf16>
    %cst_82 = arith.constant dense<0.000000e+00> : vector<16x128xf32>
    %301 = tpu.matmul %299, %300, %cst_82 {dimension_numbers = #tpu.dot_dimension_numbers<[1], [0], [0], [1], [0, 0, 1, 1], [], []>} : vector<16x32xbf16>, vector<32x128xbf16>, vector<16x128xf32> -> vector<16x128xf32>
    %302 = arith.addf %281, %301 : vector<16x128xf32>
    %303 = vector.extract_strided_slice %234 {offsets = [0, 0, 96], sizes = [2, 8, 32], strides = [1, 1, 1]} : vector<2x8x128xbf16> to vector<2x8x32xbf16>
    %304 = vector.extract_strided_slice %236 {offsets = [0, 0, 96], sizes = [2, 8, 32], strides = [1, 1, 1]} : vector<2x8x128xbf16> to vector<2x8x32xbf16>
    "tpu.trace_start"() <{level = 10 : i32, message = "bqd,bkd->bqk"}> : () -> ()
    %cst_83 = arith.constant dense<0.000000e+00> : vector<2x8x8xf32>
    %305 = tpu.matmul %303, %304, %cst_83 {dimension_numbers = #tpu.dot_dimension_numbers<[2], [2], [1], [1], [0, 0, 0, 1, 1, 1], [0], [0]>} : vector<2x8x32xbf16>, vector<2x8x32xbf16>, vector<2x8x8xf32> -> vector<2x8x8xf32>
    "tpu.trace_stop"() : () -> ()
    %cst_84 = arith.constant dense<0xFF800000> : vector<2x8xf32>
    %306 = vector.multi_reduction <maximumf>, %305, %cst_84 [2] : vector<2x8x8xf32> to vector<2x8xf32>
    %307 = vector.shape_cast %306 : vector<2x8xf32> to vector<2x8x1xf32>
    %308 = vector.broadcast %307 : vector<2x8x1xf32> to vector<2x8x8xf32>
    %309 = arith.subf %305, %308 : vector<2x8x8xf32>
    %310 = math.exp %309 : vector<2x8x8xf32>
    %cst_85 = arith.constant dense<0.000000e+00> : vector<2x8xf32>
    %311 = vector.multi_reduction <add>, %310, %cst_85 [2] : vector<2x8x8xf32> to vector<2x8xf32>
    %312 = vector.shape_cast %311 : vector<2x8xf32> to vector<2x8x1xf32>
    %313 = tpu.reciprocal %312 {approx = true} : vector<2x8x1xf32> -> vector<2x8x1xf32>
    %314 = vector.broadcast %313 : vector<2x8x1xf32> to vector<2x8x8xf32>
    %315 = arith.mulf %310, %314 : vector<2x8x8xf32>
    %316 = arith.truncf %315 : vector<2x8x8xf32> to vector<2x8x8xbf16>
    %317 = vector.extract_strided_slice %238 {offsets = [0, 0, 96], sizes = [2, 8, 32], strides = [1, 1, 1]} : vector<2x8x128xbf16> to vector<2x8x32xbf16>
    "tpu.trace_start"() <{level = 10 : i32, message = "bqk,bkd->bqd"}> : () -> ()
    %cst_86 = arith.constant dense<0.000000e+00> : vector<2x8x32xf32>
    %318 = tpu.matmul %316, %317, %cst_86 {dimension_numbers = #tpu.dot_dimension_numbers<[2], [1], [1], [2], [0, 0, 0, 1, 1, 2], [0], [0]>} : vector<2x8x8xbf16>, vector<2x8x32xbf16>, vector<2x8x32xf32> -> vector<2x8x32xf32>
    "tpu.trace_stop"() : () -> ()
    %319 = vector.shape_cast %318 : vector<2x8x32xf32> to vector<16x32xf32>
    %320 = arith.truncf %319 : vector<16x32xf32> to vector<16x32xbf16>
    %321 = vector.extract_strided_slice %224 {offsets = [96, 0], sizes = [32, 128], strides = [1, 1]} : vector<128x128xbf16> to vector<32x128xbf16>
    %cst_87 = arith.constant dense<0.000000e+00> : vector<16x128xf32>
    %322 = tpu.matmul %320, %321, %cst_87 {dimension_numbers = #tpu.dot_dimension_numbers<[1], [0], [0], [1], [0, 0, 1, 1], [], []>} : vector<16x32xbf16>, vector<32x128xbf16>, vector<16x128xf32> -> vector<16x128xf32>
    %323 = arith.addf %302, %322 : vector<16x128xf32>
    %c9 = arith.constant 9 : index
    %c0_88 = arith.constant 0 : index
    %324 = vector.load %arg4[%c9, %c0_88] : memref<24x512xf32, #tpu.memory_space<vmem>>, vector<1x128xf32>
    %325 = vector.broadcast %324 : vector<1x128xf32> to vector<16x128xf32>
    %326 = arith.addf %323, %325 : vector<16x128xf32>
    %327 = arith.addf %222, %326 : vector<16x128xf32>
    %c10 = arith.constant 10 : index
    %c0_89 = arith.constant 0 : index
    %328 = vector.load %arg4[%c10, %c0_89] : memref<24x512xf32, #tpu.memory_space<vmem>>, vector<1x128xf32>
    %c11 = arith.constant 11 : index
    %c0_90 = arith.constant 0 : index
    %329 = vector.load %arg4[%c11, %c0_90] : memref<24x512xf32, #tpu.memory_space<vmem>>, vector<1x128xf32>
    %cst_91 = arith.constant dense<0.000000e+00> : vector<16xf32>
    %330 = vector.multi_reduction <add>, %327, %cst_91 [1] : vector<16x128xf32> to vector<16xf32>
    %331 = vector.shape_cast %330 : vector<16xf32> to vector<16x1xf32>
    %cst_92 = arith.constant 1.280000e+02 : f32
    %332 = vector.broadcast %cst_92 : f32 to vector<16x1xf32>
    %333 = arith.divf %331, %332 : vector<16x1xf32>
    %334 = arith.mulf %327, %327 : vector<16x128xf32>
    %cst_93 = arith.constant dense<0.000000e+00> : vector<16xf32>
    %335 = vector.multi_reduction <add>, %334, %cst_93 [1] : vector<16x128xf32> to vector<16xf32>
    %336 = vector.shape_cast %335 : vector<16xf32> to vector<16x1xf32>
    %cst_94 = arith.constant 1.280000e+02 : f32
    %337 = vector.broadcast %cst_94 : f32 to vector<16x1xf32>
    %338 = arith.divf %336, %337 : vector<16x1xf32>
    %339 = arith.mulf %333, %333 : vector<16x1xf32>
    %340 = arith.subf %338, %339 : vector<16x1xf32>
    %341 = vector.broadcast %333 : vector<16x1xf32> to vector<16x128xf32>
    %342 = arith.subf %327, %341 : vector<16x128xf32>
    %cst_95 = arith.constant 9.99999974E-6 : f32
    %343 = vector.broadcast %cst_95 : f32 to vector<16x1xf32>
    %344 = arith.addf %340, %343 : vector<16x1xf32>
    %345 = math.rsqrt %344 : vector<16x1xf32>
    %346 = vector.broadcast %345 : vector<16x1xf32> to vector<16x128xf32>
    %347 = vector.broadcast %328 : vector<1x128xf32> to vector<16x128xf32>
    %348 = arith.mulf %346, %347 : vector<16x128xf32>
    %349 = arith.mulf %342, %348 : vector<16x128xf32>
    %350 = vector.broadcast %329 : vector<1x128xf32> to vector<16x128xf32>
    %351 = arith.addf %349, %350 : vector<16x128xf32>
    %352 = arith.truncf %351 : vector<16x128xf32> to vector<16x128xbf16>
    %cst_96 = arith.constant dense<0.000000e+00> : vector<16x256xf32>
    %353 = tpu.matmul %352, %225, %cst_96 {dimension_numbers = #tpu.dot_dimension_numbers<[1], [0], [0], [1], [0, 0, 1, 1], [], []>} : vector<16x128xbf16>, vector<128x256xbf16>, vector<16x256xf32> -> vector<16x256xf32>
    %c12 = arith.constant 12 : index
    %c0_97 = arith.constant 0 : index
    %354 = vector.load %arg4[%c12, %c0_97] : memref<24x512xf32, #tpu.memory_space<vmem>>, vector<1x256xf32>
    %355 = vector.broadcast %354 : vector<1x256xf32> to vector<16x256xf32>
    %356 = arith.addf %353, %355 : vector<16x256xf32>
    %cst_98 = arith.constant 0.000000e+00 : f32
    %357 = vector.broadcast %cst_98 : f32 to vector<16x256xf32>
    %358 = arith.maximumf %356, %357 : vector<16x256xf32>
    %359 = arith.truncf %358 : vector<16x256xf32> to vector<16x256xbf16>
    %cst_99 = arith.constant dense<0.000000e+00> : vector<16x128xf32>
    %360 = tpu.matmul %359, %226, %cst_99 {dimension_numbers = #tpu.dot_dimension_numbers<[1], [0], [0], [1], [0, 0, 1, 1], [], []>} : vector<16x256xbf16>, vector<256x128xbf16>, vector<16x128xf32> -> vector<16x128xf32>
    %c13 = arith.constant 13 : index
    %c0_100 = arith.constant 0 : index
    %361 = vector.load %arg4[%c13, %c0_100] : memref<24x512xf32, #tpu.memory_space<vmem>>, vector<1x128xf32>
    %362 = vector.broadcast %361 : vector<1x128xf32> to vector<16x128xf32>
    %363 = arith.addf %360, %362 : vector<16x128xf32>
    %364 = arith.addf %351, %363 : vector<16x128xf32>
    %c14 = arith.constant 14 : index
    %c0_101 = arith.constant 0 : index
    %365 = vector.load %arg4[%c14, %c0_101] : memref<24x512xf32, #tpu.memory_space<vmem>>, vector<1x128xf32>
    %c15 = arith.constant 15 : index
    %c0_102 = arith.constant 0 : index
    %366 = vector.load %arg4[%c15, %c0_102] : memref<24x512xf32, #tpu.memory_space<vmem>>, vector<1x128xf32>
    %cst_103 = arith.constant dense<0.000000e+00> : vector<16xf32>
    %367 = vector.multi_reduction <add>, %364, %cst_103 [1] : vector<16x128xf32> to vector<16xf32>
    %368 = vector.shape_cast %367 : vector<16xf32> to vector<16x1xf32>
    %cst_104 = arith.constant 1.280000e+02 : f32
    %369 = vector.broadcast %cst_104 : f32 to vector<16x1xf32>
    %370 = arith.divf %368, %369 : vector<16x1xf32>
    %371 = arith.mulf %364, %364 : vector<16x128xf32>
    %cst_105 = arith.constant dense<0.000000e+00> : vector<16xf32>
    %372 = vector.multi_reduction <add>, %371, %cst_105 [1] : vector<16x128xf32> to vector<16xf32>
    %373 = vector.shape_cast %372 : vector<16xf32> to vector<16x1xf32>
    %cst_106 = arith.constant 1.280000e+02 : f32
    %374 = vector.broadcast %cst_106 : f32 to vector<16x1xf32>
    %375 = arith.divf %373, %374 : vector<16x1xf32>
    %376 = arith.mulf %370, %370 : vector<16x1xf32>
    %377 = arith.subf %375, %376 : vector<16x1xf32>
    %378 = vector.broadcast %370 : vector<16x1xf32> to vector<16x128xf32>
    %379 = arith.subf %364, %378 : vector<16x128xf32>
    %cst_107 = arith.constant 9.99999974E-6 : f32
    %380 = vector.broadcast %cst_107 : f32 to vector<16x1xf32>
    %381 = arith.addf %377, %380 : vector<16x1xf32>
    %382 = math.rsqrt %381 : vector<16x1xf32>
    %383 = vector.broadcast %382 : vector<16x1xf32> to vector<16x128xf32>
    %384 = vector.broadcast %365 : vector<1x128xf32> to vector<16x128xf32>
    %385 = arith.mulf %383, %384 : vector<16x128xf32>
    %386 = arith.mulf %379, %385 : vector<16x128xf32>
    %387 = vector.broadcast %366 : vector<1x128xf32> to vector<16x128xf32>
    %388 = arith.addf %386, %387 : vector<16x128xf32>
    %389 = vector.shape_cast %388 : vector<16x128xf32> to vector<2x8x128xf32>
    %390 = vector.extract_strided_slice %389 {offsets = [0, 0, 0], sizes = [2, 1, 128], strides = [1, 1, 1]} : vector<2x8x128xf32> to vector<2x1x128xf32>
    %391 = vector.shape_cast %390 : vector<2x1x128xf32> to vector<2x128xf32>
    %c16 = arith.constant 16 : index
    %c0_108 = arith.constant 0 : index
    %392 = vector.load %arg4[%c16, %c0_108] : memref<24x512xf32, #tpu.memory_space<vmem>>, vector<1x128xf32>
    %c17 = arith.constant 17 : index
    %c0_109 = arith.constant 0 : index
    %393 = vector.load %arg4[%c17, %c0_109] : memref<24x512xf32, #tpu.memory_space<vmem>>, vector<1x128xf32>
    %cst_110 = arith.constant dense<0.000000e+00> : vector<2xf32>
    %394 = vector.multi_reduction <add>, %391, %cst_110 [1] : vector<2x128xf32> to vector<2xf32>
    %395 = vector.shape_cast %394 : vector<2xf32> to vector<2x1xf32>
    %cst_111 = arith.constant 1.280000e+02 : f32
    %396 = vector.broadcast %cst_111 : f32 to vector<2x1xf32>
    %397 = arith.divf %395, %396 : vector<2x1xf32>
    %398 = arith.mulf %391, %391 : vector<2x128xf32>
    %cst_112 = arith.constant dense<0.000000e+00> : vector<2xf32>
    %399 = vector.multi_reduction <add>, %398, %cst_112 [1] : vector<2x128xf32> to vector<2xf32>
    %400 = vector.shape_cast %399 : vector<2xf32> to vector<2x1xf32>
    %cst_113 = arith.constant 1.280000e+02 : f32
    %401 = vector.broadcast %cst_113 : f32 to vector<2x1xf32>
    %402 = arith.divf %400, %401 : vector<2x1xf32>
    %403 = arith.mulf %397, %397 : vector<2x1xf32>
    %404 = arith.subf %402, %403 : vector<2x1xf32>
    %405 = vector.broadcast %397 : vector<2x1xf32> to vector<2x128xf32>
    %406 = arith.subf %391, %405 : vector<2x128xf32>
    %cst_114 = arith.constant 9.99999974E-6 : f32
    %407 = vector.broadcast %cst_114 : f32 to vector<2x1xf32>
    %408 = arith.addf %404, %407 : vector<2x1xf32>
    %409 = math.rsqrt %408 : vector<2x1xf32>
    %410 = vector.broadcast %409 : vector<2x1xf32> to vector<2x128xf32>
    %411 = vector.broadcast %392 : vector<1x128xf32> to vector<2x128xf32>
    %412 = arith.mulf %410, %411 : vector<2x128xf32>
    %413 = arith.mulf %406, %412 : vector<2x128xf32>
    %414 = vector.broadcast %393 : vector<1x128xf32> to vector<2x128xf32>
    %415 = arith.addf %413, %414 : vector<2x128xf32>
    %c128_115 = arith.constant 128 : index
    %c0_116 = arith.constant 0 : index
    %416 = vector.load %arg3[%c128_115, %c0_116] : memref<256x512xbf16, #tpu.memory_space<vmem>>, vector<128x512xbf16>
    %c904 = arith.constant 904 : index
    %c0_117 = arith.constant 0 : index
    %417 = vector.load %arg2[%c904, %c0_117] : memref<1672x128xbf16, #tpu.memory_space<vmem>>, vector<512x128xbf16>
    %c1416 = arith.constant 1416 : index
    %c0_118 = arith.constant 0 : index
    %418 = vector.load %arg2[%c1416, %c0_118] : memref<1672x128xbf16, #tpu.memory_space<vmem>>, vector<128x128xbf16>
    %c1544 = arith.constant 1544 : index
    %c0_119 = arith.constant 0 : index
    %419 = vector.load %arg2[%c1544, %c0_119] : memref<1672x128xbf16, #tpu.memory_space<vmem>>, vector<128x128xbf16>
    %420 = arith.truncf %415 : vector<2x128xf32> to vector<2x128xbf16>
    %cst_120 = arith.constant dense<0.000000e+00> : vector<2x512xf32>
    %421 = tpu.matmul %420, %416, %cst_120 {dimension_numbers = #tpu.dot_dimension_numbers<[1], [0], [0], [1], [0, 0, 1, 1], [], []>} : vector<2x128xbf16>, vector<128x512xbf16>, vector<2x512xf32> -> vector<2x512xf32>
    %c18 = arith.constant 18 : index
    %c0_121 = arith.constant 0 : index
    %422 = vector.load %arg4[%c18, %c0_121] : memref<24x512xf32, #tpu.memory_space<vmem>>, vector<1x512xf32>
    %423 = vector.broadcast %422 : vector<1x512xf32> to vector<2x512xf32>
    %424 = arith.addf %421, %423 : vector<2x512xf32>
    %cst_122 = arith.constant 0.000000e+00 : f32
    %425 = vector.broadcast %cst_122 : f32 to vector<2x512xf32>
    %426 = arith.maximumf %424, %425 : vector<2x512xf32>
    %427 = arith.truncf %426 : vector<2x512xf32> to vector<2x512xbf16>
    %cst_123 = arith.constant dense<0.000000e+00> : vector<2x128xf32>
    %428 = tpu.matmul %427, %417, %cst_123 {dimension_numbers = #tpu.dot_dimension_numbers<[1], [0], [0], [1], [0, 0, 1, 1], [], []>} : vector<2x512xbf16>, vector<512x128xbf16>, vector<2x128xf32> -> vector<2x128xf32>
    %c19 = arith.constant 19 : index
    %c0_124 = arith.constant 0 : index
    %429 = vector.load %arg4[%c19, %c0_124] : memref<24x512xf32, #tpu.memory_space<vmem>>, vector<1x128xf32>
    %430 = vector.broadcast %429 : vector<1x128xf32> to vector<2x128xf32>
    %431 = arith.addf %428, %430 : vector<2x128xf32>
    %cst_125 = arith.constant 0.000000e+00 : f32
    %432 = vector.broadcast %cst_125 : f32 to vector<2x128xf32>
    %433 = arith.maximumf %431, %432 : vector<2x128xf32>
    %434 = arith.truncf %433 : vector<2x128xf32> to vector<2x128xbf16>
    %cst_126 = arith.constant dense<0.000000e+00> : vector<2x128xf32>
    %435 = tpu.matmul %434, %418, %cst_126 {dimension_numbers = #tpu.dot_dimension_numbers<[1], [0], [0], [1], [0, 0, 1, 1], [], []>} : vector<2x128xbf16>, vector<128x128xbf16>, vector<2x128xf32> -> vector<2x128xf32>
    %c20 = arith.constant 20 : index
    %c0_127 = arith.constant 0 : index
    %436 = vector.load %arg4[%c20, %c0_127] : memref<24x512xf32, #tpu.memory_space<vmem>>, vector<1x128xf32>
    %437 = vector.broadcast %436 : vector<1x128xf32> to vector<2x128xf32>
    %438 = arith.addf %435, %437 : vector<2x128xf32>
    %cst_128 = arith.constant 0.000000e+00 : f32
    %439 = vector.broadcast %cst_128 : f32 to vector<2x128xf32>
    %440 = arith.maximumf %438, %439 : vector<2x128xf32>
    %441 = arith.truncf %440 : vector<2x128xf32> to vector<2x128xbf16>
    %cst_129 = arith.constant dense<0.000000e+00> : vector<2x128xf32>
    %442 = tpu.matmul %441, %419, %cst_129 {dimension_numbers = #tpu.dot_dimension_numbers<[1], [0], [0], [1], [0, 0, 1, 1], [], []>} : vector<2x128xbf16>, vector<128x128xbf16>, vector<2x128xf32> -> vector<2x128xf32>
    %c21 = arith.constant 21 : index
    %c0_130 = arith.constant 0 : index
    %443 = vector.load %arg4[%c21, %c0_130] : memref<24x512xf32, #tpu.memory_space<vmem>>, vector<1x128xf32>
    %444 = vector.broadcast %443 : vector<1x128xf32> to vector<2x128xf32>
    %445 = arith.addf %442, %444 : vector<2x128xf32>
    %c0_131 = arith.constant 0 : index
    %c0_132 = arith.constant 0 : index
    %446 = vector.load %arg5[%c0_131, %c0_132] : memref<2x128xf32, #tpu.memory_space<vmem>>, vector<2x128xf32>
    tpu.vector_store %arg5[%c0_131, %c0_132], %445 {strides = array<i32>} : memref<2x128xf32, #tpu.memory_space<vmem>>, vector<2x128xf32>,
    return
  }
}

</mosaic_0001>

<bundles_post_ra>
// kernel: tpu_custom_call.1
= control target key start
LH: loop header
LB: loop body
LE: loop exit
PB: predicated region body
PF: predicated region fallthrough
CT: control target
= control target key end

     0   :  { %10 = vsyncpa [#allocation3], 0  ;;  %s6842_s0 = inlined_call_operand.hbm [shape: s32[2,8], index: 0, kind: input, shape index: {}]   ;;  %s6843_s1 = inlined_call_operand.hbm [shape: bf16[256,384], index: 1, kind: input, shape index: {}]   ;;  %s6844_s2 = inlined_call_operand.hbm [shape: bf16[1672,128], index: 2, kind: input, shape index: {}]   ;;  %s6845_s3 = inlined_call_operand.hbm [shape: bf16[256,512], index: 3, kind: input, shape index: {}]   ;;  %s6846_s4 = inlined_call_operand.hbm [shape: f32[24,512], index: 4, kind: input, shape index: {}]   ;;  %s6847_s5 = inlined_call_operand.hbm [shape: f32[2,128], index: 5, kind: output, shape index: {}]  }
   0x1   :  { %11 = vsyncpa [#allocation6], 0 }
   0x2   :  { %12 = vsyncpa [#allocation9], 0 }
   0x3   :  { %13 = vsyncpa [#allocation4], 0  ;;  %s6218_s18 = smov [#allocation5]  }
   0x4   :  { %s29_s19 = sshll.u32 %s6218_s18, 4  ;;  %s30_s19 = int_to_ptr.vmem [resolvable:$true] %s29_s19 }
   0x5   :  { %s6098_s20 = scalar_lea.vmem %s30_s19, 6144  ;;  %p6103_p1 = scmp.lt.s32.totalorder %s30_s19, %s30_s19 }
   0x6   :  { %p6099_p0 = scmp.ne.s32.totalorder %s30_s19, %s6098_s20  ;;  %p6104_p2 = scmp.lt.s32.totalorder %s6098_s20, %s6098_s20 }
   0x8   :  { %p6105_p3 = por %p6104_p2, %p6103_p1 }
   0xa   :  { %p6106_p4 = pnand %p6105_p3, %p6099_p0 }
   0xc   :  { %6109 = shalt.err (!%p6106_p4)
}
   0xd   :  { %s6219_s21 = smov 192   ;;  %s6220_s22 = smov 12  }
   0xe   :  { %35 = dma.hbm_to_vmem [thread:$0]  %s6843_s1, 6144, %s30_s19, [#allocation6], %s6219_s21, %s6219_s21, %s6220_s22  }
   0xf   :  { %s6221_s25 = smov [#allocation8]  }
  0x10   :  { %s53_s26 = sshll.u32 %s6221_s25, 4  ;;  %s54_s26 = int_to_ptr.vmem [resolvable:$true] %s53_s26 }
  0x11   :  { %s6118_s27 = scalar_lea.vmem %s54_s26, 8192  ;;  %p6123_p6 = scmp.lt.s32.totalorder %s54_s26, %s54_s26 }
  0x12   :  { %p6119_p5 = scmp.ne.s32.totalorder %s54_s26, %s6118_s27  ;;  %p6124_p7 = scmp.lt.s32.totalorder %s6118_s27, %s6118_s27 }
  0x14   :  { %p6125_p8 = por %p6124_p7, %p6123_p6 }
  0x16   :  { %p6126_p9 = pnand %p6125_p8, %p6119_p5 }
  0x18   :  { %6129 = shalt.err (!%p6126_p9)
}
  0x19   :  { %s6222_s28 = smov 256   ;;  %s6223_s29 = smov 16  }
  0x1a   :  { %59 = dma.hbm_to_vmem [thread:$0]  %s6845_s3, 8192, %s54_s26, [#allocation9], %s6222_s28, %s6222_s28, %s6223_s29  }
  0x1b   :  { %s6224_s7 = smov [#allocation2]   ;;  %s6225_s9 = smov [#allocation7]  }
  0x1c   :  { %s20_s8 = sshll.u32 %s6224_s7, 4  ;;  %s41_s1 = sshll.u32 %s6225_s9, 4  ;;  %s21_s8 = int_to_ptr.vmem [resolvable:$true] %s20_s8  ;;  %s42_s1 = int_to_ptr.vmem [resolvable:$true] %s41_s1 }
  0x1d   :  { %s6138_s10 = scalar_lea.vmem %s21_s8, 32  ;;  %p6143_p11 = scmp.lt.s32.totalorder %s21_s8, %s21_s8 }
  0x1e   :  { %p6139_p10 = scmp.ne.s32.totalorder %s21_s8, %s6138_s10  ;;  %p6144_p12 = scmp.lt.s32.totalorder %s6138_s10, %s6138_s10 }
  0x20   :  { %p6145_p13 = por %p6144_p12, %p6143_p11 }
  0x22   :  { %p6146_p0 = pnand %p6145_p13, %p6139_p10 }
  0x24   :  { %6149 = shalt.err (!%p6146_p0)
}
  0x25   :  { %23 = dma.hbm_to_vmem [thread:$0]  %s6842_s0, 32, %s21_s8, [#allocation3]  }
  0x26   :  { %s6158_s13 = scalar_lea.vmem %s42_s1, 13376  ;;  %p6163_p2 = scmp.lt.s32.totalorder %s42_s1, %s42_s1 }
  0x27   :  { %p6159_p1 = scmp.ne.s32.totalorder %s42_s1, %s6158_s13  ;;  %p6164_p3 = scmp.lt.s32.totalorder %s6158_s13, %s6158_s13 }
  0x29   :  { %p6165_p4 = por %p6164_p3, %p6163_p2 }
  0x2b   :  { %p6166_p5 = pnand %p6165_p4, %p6159_p1 }
  0x2d   :  { %6169 = shalt.err (!%p6166_p5)
}
  0x2e   :  { %s6226_s3 = smov 64   ;;  %s6227_s14 = smov 4  }
  0x2f   :  { %47 = dma.hbm_to_vmem [thread:$0]  %s6844_s2, 13376, %s42_s1, [#allocation6], %s6226_s3, %s6226_s3, %s6227_s14  }
  0x30   :  { %s6228_s17 = smov [#allocation10]  }
  0x31   :  { %s65_s18 = sshll.u32 %s6228_s17, 4  ;;  %s66_s18 = int_to_ptr.vmem [resolvable:$true] %s65_s18 }
  0x32   :  { %s6178_s19 = scalar_lea.vmem %s66_s18, 1536  ;;  %p6183_p7 = scmp.lt.s32.totalorder %s66_s18, %s66_s18 }
  0x33   :  { %p6179_p6 = scmp.ne.s32.totalorder %s66_s18, %s6178_s19  ;;  %p6184_p8 = scmp.lt.s32.totalorder %s6178_s19, %s6178_s19 }
  0x35   :  { %p6185_p9 = por %p6184_p8, %p6183_p7 }
  0x37   :  { %p6186_p10 = pnand %p6185_p9, %p6179_p6 }
  0x39   :  { %6189 = shalt.err (!%p6186_p10)
}
  0x3a   :  { %s6229_s0 = smov 512   ;;  %s6230_s20 = smov 32  }
  0x3b   :  { %71 = dma.hbm_to_vmem [thread:$0]  %s6846_s4, 1536, %s66_s18, [#allocation9], %s6229_s0, %s6229_s0, %s6230_s20  }
  0x3c   :  { %6210 = dma.done.wait [#allocation3], 32  }
  0x3d   :  { %6211 = vsyncadd [#allocation3], 4294967264 }
  0x3e   :  { %6212 = dma.done.wait [#allocation6], 19520  }
  0x3f   :  { %6213 = vsyncadd [#allocation6], 4294947776 }
  0x40   :  { %6214 = dma.done.wait [#allocation9], 9728  }
  0x41   :  { %6215 = vsyncadd [#allocation9], 4294957568  ;;  %v93_v0 = vlaneseq  ;;  %v6231_v1 = vmov 1966171168   ;;  %v88_v6 = vld [vmem:[#allocation2] sm:$0x3] }
  0x42   :  { %v103_v2 = vunpack.c.l.s4 %v6231_v1  ;;  %vm89_vm0 = vcmp.ge.s32.totalorder %v88_v6, 50  ;;  %vm90_vm1 = vcmp.le.s32.totalorder %v88_v6, 60  ;;  %vm138_vm5 = vcmask 64512   ;;  %v5744_v33 = vld [vmem:[#allocation7 + $0x38] sm:$0xff]   ;;  %v5745_v35 = vld [vmem:[#allocation7 + $0x30] sm:$0xff]   ;;  %v5746_v36 = vld [vmem:[#allocation7 + $0x28] sm:$0xff]  }
  0x43   :  { %v6286_v3 = vand.u32 127, %v93_v0  ;;  %v6288_v4 = vshrl.u32 %v93_v0, 7  ;;  %vm91_vm2 = vmand %vm89_vm0, %vm90_vm1  ;;  %vm157_vm6 = vcmask 1041409   ;;  %v6232_v28 = vmov 0   ;;  %v5747_v37 = vld [vmem:[#allocation7 + $0x20] sm:$0xff]   ;;  %v5748_v43 = vld [vmem:[#allocation7 + $0x18] sm:$0xff]  }
  0x44   :  { %v104_v5 = vunpack.c.0.s8 %v103_v2  ;;  %v6295_v10 = vsel %vm91_vm2, 0, %v88_v6  ;;  %5742 = vset.pattern.permute.xlu0 %v6232_v28  ;;  %5743 = vset.pattern.permute.xlu1 %v6232_v28  ;;  %v6233_v34 = vmov 0.0   ;;  %v5749_v49 = vld [vmem:[#allocation7 + $0x10] sm:$0xff]   ;;  %v5750_v52 = vld [vmem:[#allocation7 + $0x8] sm:$0xff]   ;;  %v5751_v54 = vld [vmem:[#allocation7] sm:$0xff]   ;;  %vm6234_vm9 = vmmov 0  }
  0x45   :  { %v95_v7 = vcvt.s32.f32 %v6286_v3  ;;  %v6293_v9 = vsub.s32 0, %v6288_v4  ;;  %vm96_vm3 = vcmp.eq.s32.totalorder %v6295_v10, 1  ;;  %vm100_vm4 = vcmp.le.s32.totalorder %v6286_v3, %v6288_v4  ;;  %607 = vmatprep.mubr.bf16.mxu1 %v6232_v28  ;;  %5362 = vmatprep.subr.bf16.mxu0 %v6233_v34  ;;  %v5752_v56 = vld [vmem:[#allocation5 + $0xac] ss:$12 sps:$4 sm:$0xff]   ;;  %v5754_v57 = vld [vmem:[#allocation5 + $0xa8] ss:$12 sps:$4 sm:$0xff]  }
  0x46   :  { %v107_v8 = vsub.s32 %v104_v5, %v6288_v4  ;;  %v151_v23 = vsub.s32 %v6286_v3, %v6288_v4  ;;  %v6312_v31 = vsub.s32 1, %v6288_v4  ;;  %5363 = vmatpush3.bf16.msra.mxu0 %v5744_v33  ;;  %5378 = vmatprep.mubr.msk.bf16.mxu0 %vm6234_vm9, %v6233_v34  ;;  %v5756_v58 = vld [vmem:[#allocation5 + $0x94] ss:$12 sps:$4 sm:$0xff]   ;;  %v5758_v59 = vld [vmem:[#allocation5 + $0x90] ss:$12 sps:$4 sm:$0xff]   ;;  %vm677_vm1 = vcmask 261120  }
  0x47   :  { %v97_v11 = vsel %vm96_vm3, %v95_v7, -1.0  ;;  %5364 = vmatprep.subr.bf16.mxu0 %v6233_v34  ;;  %v187_v53 = vrot.slane %v6295_v10, %v6293_v9  ;;  %575 = vmatprep.subr.bf16.mxu1 %v5752_v56  ;;  %v5760_v60 = vld [vmem:[#allocation5 + $0x7c] ss:$12 sps:$4 sm:$0xff]   ;;  %v5762_v61 = vld [vmem:[#allocation5 + $0x78] ss:$12 sps:$4 sm:$0xff]   ;;  %vm797_vm2 = vcmask 1043456  }
  0x48   :  { %v108_v12 = vrot.slane %v97_v11, %v107_v8  ;;  %v194_v55 = vrot.slane %v6295_v10, %v6312_v31  ;;  %576 = vmatpush1.bf16.msra.mxu1 %v5754_v57  ;;  %v5764_v62 = vld [vmem:[#allocation5 + $0x64] ss:$12 sps:$4 sm:$0xff]   ;;  %v5766_v63 = vld [vmem:[#allocation5 + $0x60] ss:$12 sps:$4 sm:$0xff]   ;;  %v5770_v1 = vld [vmem:[#allocation5 + $0x48] ss:$12 sps:$4 sm:$0xff]  }
  0x49   :  { %577 = vmatprep.subr.bf16.mxu1 %v5756_v58  ;;  %v5768_v0 = vld [vmem:[#allocation5 + $0x4c] ss:$12 sps:$4 sm:$0xff]   ;;  %v5772_v2 = vld [vmem:[#allocation5 + $0x34] ss:$12 sps:$4 sm:$0xff]   ;;  %v5774_v5 = vld [vmem:[#allocation5 + $0x30] ss:$12 sps:$4 sm:$0xff]  }
  0x4a   :  { %v116_v13 = vrot.slane %v108_v12, %v107_v8  ;;  %v109_v14 = vcombine.high %v108_v12, %v108_v12  ;;  %5365 = vmatpush3.bf16.msra.mxu0 %v5745_v35  ;;  %v5755_v11 = vld [vmem:[#allocation5 + $0xb0] ss:$12 sps:$4 sm:$0xff]   ;;  %v6235_v12 = vmov 1.0|1.0   ;;  %s6236_s2 = smov 96   ;;  %vm3936_vm3 = vcmask 1041408  }
  0x4b   :  { %5366 = vmatprep.subr.bf16.mxu0 %v6233_v34  ;;  %v430_v35 = vld [vmem:[#allocation10] ss:$8 sm:$0x7]  ;;  %s6237_s4 = smov [#allocation11]  }
  0x4c   :  { %v129_v15 = vrot.slane %v116_v13, %v6293_v9  ;;  %v123_v16 = vrot.slane %v109_v14, %v107_v8  ;;  %578 = vmatpush1.bf16.msra.mxu1 %v5758_v59  ;;  %v5759_v13 = vld [vmem:[#allocation5 + $0x98] ss:$12 sps:$4 sm:$0xff]   ;;  %v5763_v14 = vld [vmem:[#allocation5 + $0x80] ss:$12 sps:$4 sm:$0xff]   ;;  %s4844_s23 = sshll.u32 %s6237_s4, 4  ;;  %s4845_s23 = int_to_ptr.vmem [resolvable:$true] %s4844_s23 }
  0x4d   :  { %579 = vmatprep.subr.bf16.mxu1 %v5760_v60  ;;  %s6190_s24 = scalar_lea.vmem %s4845_s23, 32  ;;  %p6195_p12 = scmp.lt.s32.totalorder %s4845_s23, %s4845_s23 }
  0x4e   :  { %v136_v17 = vsel %vm100_vm4, %v129_v15, -1.0  ;;  %v133_v18 = vrot.slane %v123_v16, %v6293_v9  ;;  %5367 = vmatpush3.bf16.msra.mxu0 %v5746_v36  ;;  %v5767_v15 = vld [vmem:[#allocation5 + $0x68] ss:$12 sps:$4 sm:$0xff]   ;;  %v5775_v16 = vld [vmem:[#allocation5 + $0x38] ss:$12 sps:$4 sm:$0xff]   ;;  %v6356_v36 = vsub.s32 2, %v6288_v4  ;;  %p6191_p11 = scmp.ne.s32.totalorder %s4845_s23, %s6190_s24  ;;  %p6196_p13 = scmp.lt.s32.totalorder %s6190_s24, %s6190_s24 }
  0x4f   :  { %v139_v19 = vsel %vm138_vm5, %v136_v17, -inf  ;;  %5368 = vmatprep.subr.bf16.mxu0 %v6233_v34  ;;  %v5776_v17 = vld [vmem:[#allocation5 + $0x1c] ss:$12 sps:$4 sm:$0xff]  }
  0x50   :  { %140 = vmax.xlane.f32.xlu0 %v139_v19  ;;  %v137_v20 = vsel %vm100_vm4, %v133_v18, -1.0  ;;  %580 = vmatpush1.bf16.msra.mxu1 %v5762_v61  ;;  %v5778_v18 = vld [vmem:[#allocation5 + $0x18] ss:$12 sps:$4 sm:$0xff]   ;;  %v5779_v19 = vld [vmem:[#allocation5 + $0x20] ss:$12 sps:$4 sm:$0xff]   ;;  %p6197_p0 = por %p6196_p13, %p6195_p12 }
  0x51   :  { %v142_v21 = vsel %vm138_vm5, %v137_v20, -inf  ;;  %581 = vmatprep.subr.bf16.mxu1 %v5764_v62  ;;  %v5780_v20 = vld [vmem:[#allocation5 + $0x4] ss:$12 sps:$4 sm:$0xff]  }
  0x52   :  { %5369 = vmatpush3.bf16.msra.mxu0 %v5747_v37  ;;  %v439_v37 = vrot.slane %v430_v35, %v6312_v31  ;;  %p6198_p1 = pnand %p6197_p0, %p6191_p11 }
  0x53   :  { %5370 = vmatprep.subr.bf16.mxu0 %v6233_v34 }
  0x54   :  { %143 = vmax.xlane.f32.xlu0 %v142_v21  ;;  %582 = vmatpush1.bf16.msra.mxu1 %v5766_v63  ;;  %v5782_v21 = vld [vmem:[#allocation5] ss:$12 sps:$4 sm:$0xff]  }
  0x55   :  { %583 = vmatprep.subr.bf16.mxu1 %v5768_v0 }
  0x56   :  { %5371 = vmatpush3.bf16.msra.mxu0 %v5748_v43 }
  0x57   :  { %5372 = vmatprep.subr.bf16.mxu0 %v6233_v34 }
  0x58   :  { %584 = vmatpush1.bf16.msra.mxu1 %v5770_v1 }
  0x59   :  { %585 = vmatprep.subr.bf16.mxu1 %v5772_v2 }
  0x5a   :  { %5373 = vmatpush3.bf16.msra.mxu0 %v5749_v49 }
  0x5b   :  { %5374 = vmatprep.subr.bf16.mxu0 %v6233_v34 }
  0x5c   :  { %586 = vmatpush1.bf16.msra.mxu1 %v5774_v5 }
  0x5d   :  { %587 = vmatprep.subr.bf16.mxu1 %v5776_v17 }
  0x5e   :  { %5375 = vmatpush3.bf16.msra.mxu0 %v5750_v52 }
  0x5f   :  { %5376 = vmatprep.subr.bf16.mxu0 %v6233_v34 }
  0x60   :  { %588 = vmatpush1.bf16.msra.mxu1 %v5778_v18 }
  0x61   :  { %589 = vmatprep.subr.bf16.mxu1 %v5780_v20 }
  0x62   :  { %5377 = vmatpush3.bf16.msra.mxu0 %v5751_v54 }
  0x63   :  { %5382 = vmatprep.subr.bf16.mxu0 %v6233_v34 }
  0x64   :  { %590 = vmatpush1.bf16.msra.mxu1 %v5782_v21 }
  0x65   :  { %5402 = vmatprep.subr.bf16.mxu1 %v6233_v34 }
  0xd9   :  { %v141_v22 = vpop.xlane.xlu0 %140 }
  0xda   :  { %v152_v25 = vrot.slane %v141_v22, %v151_v23  ;;  %vm145_vm7 = vcmp.ge.f32.partialorder %v141_v22, 0.0  ;;  %v5783_v22 = vld [vmem:[#allocation5 + $0x8] ss:$12 sps:$4 sm:$0xff]  }
  0xdd   :  { %v144_v24 = vpop.xlane.xlu0 %143 }
  0xde   :  { %v156_v26 = vrot.slane %v144_v24, %v151_v23  ;;  %vm146_vm8 = vcmp.ge.f32.partialorder %v144_v24, 0.0  ;;  %v329_v23 = vld [vmem:[#allocation7 + $0x40] sm:$0xf] }
  0xe0   :  { %v158_v27 = vsel %vm157_vm6, %v156_v26, %v152_v25  ;;  %v330_v25 = vunpack.c.l.bf16 %v329_v23 }
  0xe1   :  { %v160_v29 = vsub.f32 %v95_v7, %v158_v27 }
  0xe3   :  { %v165_v30 = vrot.slane %v160_v29, %v6293_v9  ;;  %v172_v32 = vrot.slane %v160_v29, %v6312_v31 }
  0xe5   :  { %167 = vbcast.lane.b32.xlu1 %v165_v30, 256 }
  0xe9   :  { %174 = vbcast.lane.b32.xlu1 %v172_v32, 256 }
 0x157   :  { %v168_v38 = vpop.permute.xlu1 %167 }
 0x158   :  { %v178_v39 = vsel %vm145_vm7, %v168_v38, 63.0 }
 0x159   :  { %v180_v40 = vmin.f32 %v178_v39, 63.0 }
 0x15b   :  { %v5718_v41 = vtrunc.f32 %v180_v40  ;;  %v175_v42 = vpop.permute.xlu1 %174 }
 0x15c   :  { %v179_v44 = vsel %vm146_vm8, %v175_v42, 63.0  ;;  %v443_v42 = vrot.slane %v430_v35, %v6356_v36 }
 0x15d   :  { %v5719_v45 = vcvt.f32.s32 %v5718_v41  ;;  %v181_v46 = vmin.f32 %v179_v44, 63.0 }
 0x15f   :  { %v200_v47 = vadd.s32 64, %v5719_v45  ;;  %v5720_v48 = vtrunc.f32 %v181_v46  ;;  %v435_v46 = vrot.slane %v430_v35, %v6293_v9 }
 0x161   :  { %v5721_v50 = vcvt.f32.s32 %v5720_v48  ;;  %203 = vperm.xlu0 %5742, %v200_v47  }
 0x163   :  { %v201_v51 = vadd.s32 64, %v5721_v50 }
 0x165   :  { %206 = vperm.xlu1 %5743, %v201_v51  }
 0x169   :  { %189 = vbcast.lane.b32.xlu1 %v187_v53, 256 }
 0x16d   :  { %196 = vbcast.lane.b32.xlu1 %v194_v55, 256 }
 0x1dc   :  { %v204_v8 = vpop.permute.xlu0 %203 }
 0x1dd   :  { %vm208_vm11 = vcmp.eq.s32.totalorder %v6286_v3, %v204_v8 }
 0x1e0   :  { %v207_v6 = vpop.permute.xlu1 %206 }
 0x1e1   :  { %vm209_vm12 = vcmp.eq.s32.totalorder %v6286_v3, %v207_v6 }
 0x1e4   :  { %v190_v7 = vpop.permute.xlu1 %189 }
 0x1e5   :  { %vm198_vm10 = vcmp.eq.s32.totalorder %v6286_v3, %v190_v7 }
 0x1e6   :  { %vm210_vm13 = vmor %vm198_vm10, %vm208_vm11 }
 0x1e8   :  { %v197_v10 = vpop.permute.xlu1 %196 }
 0x1e9   :  { %vm199_vm14 = vcmp.eq.s32.totalorder %v6286_v3, %v197_v10  ;;  %v5771_v3 = vld [vmem:[#allocation5 + $0x50] ss:$12 sps:$4 sm:$0xff]  }
 0x1ea   :  { %vm211_vm15 = vmor %vm199_vm14, %vm209_vm12 }
 0x1eb   :  { %vm5127_vm0 = vmpackc.low %vm211_vm15, %vm210_vm13 }
 0x1ec   :  { %5379 = vmatmul.mubr.msk.bf16.vlgmr.msra.gmra.mxu0 %vm5127_vm0, %v6235_v12 }
 0x1ed   :  { %5383 = vmatpush3.bf16.msra.mxu0 %v5755_v11  ;;  %5398 = vmatprep.mubr.msk.bf16.mxu0 %vm6234_vm9, %v6233_v34 }
 0x1ee   :  { %5384 = vmatprep.subr.bf16.mxu0 %v6233_v34 }
 0x1f1   :  { %5385 = vmatpush3.bf16.msra.mxu0 %v5759_v13 }
 0x1f2   :  { %5386 = vmatprep.subr.bf16.mxu0 %v6233_v34 }
 0x1f5   :  { %5387 = vmatpush3.bf16.msra.mxu0 %v5763_v14 }
 0x1f6   :  { %5388 = vmatprep.subr.bf16.mxu0 %v6233_v34 }
 0x1f9   :  { %5389 = vmatpush3.bf16.msra.mxu0 %v5767_v15 }
 0x1fa   :  { %5390 = vmatprep.subr.bf16.mxu0 %v6233_v34 }
 0x1fd   :  { %5391 = vmatpush3.bf16.msra.mxu0 %v5771_v3 }
 0x1fe   :  { %5392 = vmatprep.subr.bf16.mxu0 %v6233_v34 }
 0x201   :  { %5393 = vmatpush3.bf16.msra.mxu0 %v5775_v16 }
 0x202   :  { %5394 = vmatprep.subr.bf16.mxu0 %v6233_v34 }
 0x205   :  { %5395 = vmatpush3.bf16.msra.mxu0 %v5779_v19 }
 0x206   :  { %5396 = vmatprep.subr.bf16.mxu0 %v6233_v34 }
 0x209   :  { %5397 = vmatpush3.bf16.msra.mxu0 %v5783_v22 }
 0x20a   :  { %5426 = vmatprep.subr.bf16.mxu0 %v6233_v34 }
 0x2ac   :  { %v322_v24 = vpop.f32.mrf.mxu0 }
 0x2ad   :  { %v6345_v29 = vadd.f32 %v330_v25, %v322_v24 }
 0x2ae   :  { %v5380_v26 = vpop.f32.mrf.mxu0 }
 0x2b0   :  { %v325_v27 = vpop.f32.mrf.mxu0 }
 0x2b1   :  { %v6347_v30 = vadd.f32 %v330_v25, %v325_v27 }
 0x2b2   :  { %v5381_v32 = vpop.f32.mrf.mxu0 }
 0x2b3   :  { %v429_v33 = vpack.c.bf16 %v6347_v30, %v6345_v29 }
 0x2b5   :  { %608 = vmatmul.mubr.bf16.vlgmr.msra.gmra.mxu1 %v429_v33  ;;  %5399 = vmatmul.mubr.bf16.vlgmr.msra.gmra.mxu0 %v429_v33 }
 0x2b6   :  { %5404 = vmatprep.mubr.msk.bf16.mxu1 %vm6234_vm9, %v6233_v34  ;;  %5428 = vmatprep.mubr.msk.bf16.mxu0 %vm6234_vm9, %v6233_v34 }
 0x375   :  { %v609_v38 = vpop.f32.mrf.mxu1  ;;  %v652_v39 = vpop.f32.mrf.mxu0 }
 0x376   :  { %v610_v53 = vadd.f32 %v609_v38, %v435_v46  ;;  %v653_v56 = vadd.f32 %v652_v39, %v443_v42 }
 0x377   :  { %v611_v40 = vpop.f32.mrf.mxu1  ;;  %v5400_v41 = vpop.f32.mrf.mxu0 }
 0x378   :  { %v612_v43 = vadd.f32 %v611_v40, %v439_v37  ;;  %v6370_v55 = vpack.c.bf16 %v610_v53, %v610_v53  ;;  %v6379_v59 = vpack.c.bf16 %v653_v56, %v653_v56 }
 0x379   :  { %v613_v44 = vpop.f32.mrf.mxu1  ;;  %v655_v45 = vpop.f32.mrf.mxu0 }
 0x37a   :  { %v6361_v47 = vpack.c.bf16 %v612_v43, %v612_v43  ;;  %v6363_v48 = vadd.f32 %v655_v45, %v443_v42  ;;  %v614_v58 = vadd.f32 %v613_v44, %v435_v46  ;;  %v799_v61 = vsel %vm797_vm2, %v6379_v59, 0 }
 0x37b   :  { %v615_v49 = vpop.f32.mrf.mxu1  ;;  %v5401_v50 = vpop.f32.mrf.mxu0 }
 0x37c   :  { %v616_v51 = vadd.f32 %v615_v49, %v439_v37  ;;  %v682_v52 = vsel %vm677_vm1, %v6361_v47, 0  ;;  %v6381_v60 = vpack.c.bf16 %v614_v58, %v614_v58  ;;  %v6409_v26 = vpack.c.bf16 %v6363_v48, %v6363_v48 }
 0x37d   :  { %5403 = vmatpush3.bf16.xpose.msra.mxu1 %v682_v52 }
 0x37e   :  { %5408 = vmatprep.subr.bf16.mxu1 %v6233_v34  ;;  %v6368_v54 = vpack.c.bf16 %v616_v51, %v616_v51  ;;  %v845_v33 = vsel %vm797_vm2, %v6409_v26, 0 }
 0x380   :  { %v728_v57 = vsel %vm677_vm1, %v6368_v54, 0 }
 0x384   :  { %5405 = vmatmul.mubr.msk.bf16.vlgmr.msra.gmra.mxu1 %vm677_vm1, %v6370_v55 }
 0x385   :  { %5409 = vmatpush3.bf16.xpose.msra.mxu1 %v728_v57  ;;  %5410 = vmatprep.mubr.msk.bf16.mxu1 %vm6234_vm9, %v6233_v34 }
 0x386   :  { %5414 = vmatprep.subr.bf16.mxu1 %v6233_v34 }
 0x38c   :  { %5411 = vmatmul.mubr.msk.bf16.vlgmr.msra.gmra.mxu1 %vm677_vm1, %v6381_v60 }
 0x38d   :  { %5415 = vmatpush3.bf16.msra.mxu1 %v799_v61  ;;  %5416 = vmatprep.mubr.msk.bf16.mxu1 %vm6234_vm9, %v6233_v34 }
 0x38e   :  { %5420 = vmatprep.subr.bf16.mxu1 %v6233_v34 }
 0x444   :  { %v718_v62 = vpop.f32.mrf.mxu1 }
 0x445   :  { %v770_v63 = vsel %vm138_vm5, %v718_v62, -inf }
 0x446   :  { %771 = vmax.xlane.f32.xlu1 %v770_v63  ;;  %v5406_v0 = vpop.f32.mrf.mxu1 }
 0x448   :  { %v721_v1 = vpop.f32.mrf.mxu1 }
 0x44a   :  { %v5407_v2 = vpop.f32.mrf.mxu1 }
 0x44c   :  { %v764_v5 = vpop.f32.mrf.mxu1 }
 0x44d   :  { %v773_v6 = vsel %vm138_vm5, %v764_v5, -inf }
 0x44e   :  { %774 = vmax.xlane.f32.xlu0 %v773_v6  ;;  %v5412_v7 = vpop.f32.mrf.mxu1 }
 0x450   :  { %v767_v8 = vpop.f32.mrf.mxu1 }
 0x452   :  { %v5413_v10 = vpop.f32.mrf.mxu1 }
 0x457   :  { %890 = vrot.lane.b32.xlu1 %v6361_v47, %s6236_s2 }
 0x464   :  { %888 = vrot.lane.b32.xlu0 %v6370_v55, %s6236_s2 }
 0x4cf   :  { %v772_v11 = vpop.xlane.xlu1 %771 }
 0x4d0   :  { %v776_v12 = vsub.f32 %v718_v62, %v772_v11 }
 0x4d2   :  { %v778_v13 = vmul.f32 1.442695, %v776_v12 }
 0x4d3   :  { %v891_v14 = vpop.permute.xlu1 %890 }
 0x4d4   :  { %6008 = vpow2.f32 %v778_v13  ;;  %v896_v15 = vsel %vm677_vm1, %v891_v14, 0 }
 0x4d5   :  { %5427 = vmatpush3.bf16.xpose.msra.mxu0 %v896_v15 }
 0x4d6   :  { %5438 = vmatprep.subr.bf16.mxu0 %v6233_v34 }
 0x4d7   :  { %v775_v3 = vpop.xlane.xlu0 %774 }
 0x4d8   :  { %v777_v16 = vsub.f32 %v764_v5, %v775_v3 }
 0x4da   :  { %v780_v17 = vmul.f32 1.442695, %v777_v16 }
 0x4db   :  { %v889_v18 = vpop.permute.xlu0 %888 }
 0x4dc   :  { %6010 = vpow2.f32 %v780_v17  ;;  %5429 = vmatmul.mubr.msk.bf16.vlgmr.msra.gmra.mxu0 %vm677_vm1, %v889_v18 }
 0x4dd   :  { %5440 = vmatprep.mubr.msk.bf16.mxu0 %vm6234_vm9, %v6233_v34 }
 0x4e1   :  { %v6009_v19 = vpop.eup %6008 }
 0x4e2   :  { %v782_v20 = vsel %vm138_vm5, %v6009_v19, 0.0 }
 0x4e3   :  { %783 = vadd.xlane.f32.xlu1 %v782_v20 }
 0x4e9   :  { %v6011_v21 = vpop.eup %6010 }
 0x4ea   :  { %v785_v22 = vsel %vm138_vm5, %v6011_v21, 0.0 }
 0x4eb   :  { %786 = vadd.xlane.f32.xlu1 %v785_v22 }
 0x4fc   :  { %940 = vrot.lane.b32.xlu1 %v6368_v54, %s6236_s2 }
 0x500   :  { %938 = vrot.lane.b32.xlu1 %v6381_v60, %s6236_s2 }
 0x56c   :  { %v784_v23 = vpop.xlane.xlu1 %783 }
 0x56d   :  { %6012 = vrcp.f32 %v784_v23 }
 0x574   :  { %v787_v24 = vpop.xlane.xlu1 %786 }
 0x575   :  { %6014 = vrcp.f32 %v787_v24 }
 0x578   :  { %v941_v38 = vpop.permute.xlu1 %940 }
 0x579   :  { %v946_v40 = vsel %vm677_vm1, %v941_v38, 0 }
 0x57a   :  { %v6013_v25 = vpop.eup %6012 }
 0x57b   :  { %v790_v27 = vmul.f32 %v6013_v25, %v6009_v19  ;;  %v5784_v25 = vld [vmem:[#allocation7 + $0x4c] sm:$0xff]  }
 0x57c   :  { %v939_v41 = vpop.permute.xlu1 %938 }
 0x57d   :  { %v792_v32 = vpack.c.bf16 %v790_v27, %v790_v27 }
 0x57f   :  { %5417 = vmatmul.mubr.msk.bf16.vlgmr.msra.gmra.mxu1 %vm138_vm5, %v792_v32 }
 0x580   :  { %5421 = vmatpush3.bf16.msra.mxu1 %v845_v33  ;;  %5422 = vmatprep.mubr.msk.bf16.mxu1 %vm6234_vm9, %v6233_v34  ;;  %v5785_v33 = vld [vmem:[#allocation7 + $0x44] sm:$0xff]  }
 0x581   :  { %5432 = vmatprep.subr.bf16.mxu1 %v6233_v34 }
 0x582   :  { %v6015_v35 = vpop.eup %6014 }
 0x583   :  { %v791_v37 = vmul.f32 %v6015_v35, %v6011_v21 }
 0x585   :  { %v793_v39 = vpack.c.bf16 %v791_v37, %v791_v37 }
 0x587   :  { %5423 = vmatmul.mubr.msk.bf16.vlgmr.msra.gmra.mxu1 %vm138_vm5, %v793_v39  ;;  %v5786_v39 = vld [vmem:[#allocation7 + $0x5c] sm:$0xff]  }
 0x588   :  { %5433 = vmatpush3.bf16.xpose.msra.mxu1 %v946_v40  ;;  %5434 = vmatprep.mubr.msk.bf16.mxu1 %vm6234_vm9, %v6233_v34  ;;  %v5787_v40 = vld [vmem:[#allocation7 + $0x54] sm:$0xff]  }
 0x589   :  { %5444 = vmatprep.subr.bf16.mxu1 %v6233_v34 }
 0x58f   :  { %5435 = vmatmul.mubr.msk.bf16.vlgmr.msra.gmra.mxu1 %vm677_vm1, %v939_v41 }
 0x590   :  { %5446 = vmatprep.mubr.msk.bf16.mxu1 %vm6234_vm9, %v6233_v34 }
 0x59c   :  { %v932_v42 = vpop.f32.mrf.mxu0 }
 0x59d   :  { %v988_v43 = vsel %vm138_vm5, %v932_v42, -inf }
 0x59e   :  { %989 = vmax.xlane.f32.xlu1 %v988_v43  ;;  %v5430_v44 = vpop.f32.mrf.mxu0 }
 0x5a0   :  { %v935_v45 = vpop.f32.mrf.mxu0 }
 0x5a2   :  { %v5431_v46 = vpop.f32.mrf.mxu0 }
 0x627   :  { %v990_v48 = vpop.xlane.xlu1 %989 }
 0x628   :  { %v994_v49 = vsub.f32 %v932_v42, %v990_v48 }
 0x62a   :  { %v996_v50 = vmul.f32 1.442695, %v994_v49 }
 0x62c   :  { %6016 = vpow2.f32 %v996_v50 }
 0x639   :  { %v6017_v51 = vpop.eup %6016 }
 0x63a   :  { %v1000_v52 = vsel %vm138_vm5, %v6017_v51, 0.0 }
 0x63b   :  { %1001 = vadd.xlane.f32.xlu1 %v1000_v52 }
 0x63f   :  { %v835_v53 = vpop.f32.mrf.mxu1 }
 0x641   :  { %v5418_v56 = vpop.f32.mrf.mxu1 }
 0x643   :  { %v838_v57 = vpop.f32.mrf.mxu1 }
 0x645   :  { %v5419_v58 = vpop.f32.mrf.mxu1 }
 0x647   :  { %v881_v61 = vpop.f32.mrf.mxu1 }
 0x648   :  { %v887_v62 = vpack.c.bf16 %v881_v61, %v835_v53 }
 0x649   :  { %v5424_v63 = vpop.f32.mrf.mxu1 }
 0x64b   :  { %v884_v0 = vpop.f32.mrf.mxu1 }
 0x64d   :  { %v5425_v1 = vpop.f32.mrf.mxu1 }
 0x64f   :  { %v982_v2 = vpop.f32.mrf.mxu1 }
 0x650   :  { %v991_v5 = vsel %vm138_vm5, %v982_v2, -inf }
 0x651   :  { %992 = vmax.xlane.f32.xlu0 %v991_v5  ;;  %v5436_v6 = vpop.f32.mrf.mxu1 }
 0x653   :  { %v985_v7 = vpop.f32.mrf.mxu1 }
 0x655   :  { %v5437_v8 = vpop.f32.mrf.mxu1 }
 0x667   :  { %1060 = vrot.lane.b32.xlu0 %v6409_v26, %s6236_s2 }
 0x66b   :  { %1221 = vrot.lane.b32.xlu0 %v6370_v55, %s6226_s3 }
 0x6c4   :  { %v1002_v16 = vpop.xlane.xlu1 %1001 }
 0x6da   :  { %v993_v10 = vpop.xlane.xlu0 %992 }
 0x6db   :  { %v995_v11 = vsub.f32 %v982_v2, %v993_v10 }
 0x6dd   :  { %v998_v12 = vmul.f32 1.442695, %v995_v11 }
 0x6de   :  { %v1061_v13 = vpop.permute.xlu0 %1060 }
 0x6df   :  { %6018 = vpow2.f32 %v998_v12  ;;  %v1066_v14 = vsel %vm797_vm2, %v1061_v13, 0 }
 0x6e0   :  { %5445 = vmatpush3.bf16.msra.mxu1 %v1066_v14  ;;  %6020 = vrcp.f32 %v1002_v16 }
 0x6e1   :  { %5458 = vmatprep.subr.bf16.mxu1 %v6233_v34 }
 0x6e2   :  { %v1222_v53 = vpop.permute.xlu0 %1221 }
 0x6ec   :  { %v6019_v15 = vpop.eup %6018 }
 0x6ed   :  { %v1003_v3 = vsel %vm138_vm5, %v6019_v15, 0.0  ;;  %v6021_v17 = vpop.eup %6020 }
 0x6ee   :  { %1004 = vadd.xlane.f32.xlu1 %v1003_v3  ;;  %v1008_v19 = vmul.f32 %v6021_v17, %v6017_v51 }
 0x6f0   :  { %v1010_v22 = vpack.c.bf16 %v1008_v19, %v1008_v19 }
 0x6ff   :  { %1012 = vrot.lane.b32.xlu1 %v6379_v59, %s6236_s2 }
 0x703   :  { %1223 = vrot.lane.b32.xlu1 %v6361_v47, %s6226_s3 }
 0x707   :  { %1273 = vrot.lane.b32.xlu1 %v6368_v54, %s6226_s3 }
 0x70b   :  { %1271 = vrot.lane.b32.xlu1 %v6381_v60, %s6226_s3 }
 0x777   :  { %v1005_v18 = vpop.xlane.xlu1 %1004 }
 0x778   :  { %6022 = vrcp.f32 %v1005_v18 }
 0x77b   :  { %v1013_v20 = vpop.permute.xlu1 %1012 }
 0x77c   :  { %v1018_v21 = vsel %vm797_vm2, %v1013_v20, 0 }
 0x77d   :  { %5439 = vmatpush3.bf16.msra.mxu0 %v1018_v21 }
 0x77e   :  { %5450 = vmatprep.subr.bf16.mxu0 %v6233_v34 }
 0x77f   :  { %v1224_v32 = vpop.permute.xlu1 %1223 }
 0x780   :  { %5441 = vmatmul.mubr.msk.bf16.vlgmr.msra.gmra.mxu0 %vm138_vm5, %v1010_v22  ;;  %v1229_v49 = vsel %vm677_vm1, %v1224_v32, 0 }
 0x781   :  { %5454 = vmatprep.mubr.msk.bf16.mxu0 %vm6234_vm9, %v6233_v34  ;;  %5451 = vmatpush3.bf16.msra.mxu0 %v5786_v39 }
 0x782   :  { %5452 = vmatprep.subr.bf16.mxu0 %v6233_v34 }
 0x783   :  { %v1274_v35 = vpop.permute.xlu1 %1273 }
 0x784   :  { %v1279_v37 = vsel %vm677_vm1, %v1274_v35, 0 }
 0x785   :  { %v6023_v23 = vpop.eup %6022  ;;  %5453 = vmatpush3.bf16.msra.mxu0 %v5787_v40 }
 0x786   :  { %v1009_v24 = vmul.f32 %v6023_v23, %v6019_v15  ;;  %5466 = vmatprep.subr.bf16.mxu0 %v6233_v34 }
 0x787   :  { %v1272_v38 = vpop.permute.xlu1 %1271 }
 0x788   :  { %v1011_v27 = vpack.c.bf16 %v1009_v24, %v1009_v24 }
 0x78a   :  { %5447 = vmatmul.mubr.msk.bf16.vlgmr.msra.gmra.mxu1 %vm138_vm5, %v1011_v27 }
 0x78b   :  { %5459 = vmatpush3.bf16.msra.mxu1 %v5784_v25  ;;  %5462 = vmatprep.mubr.msk.bf16.mxu1 %vm6234_vm9, %v6233_v34 }
 0x78c   :  { %5460 = vmatprep.subr.bf16.mxu1 %v6233_v34 }
 0x78f   :  { %5461 = vmatpush3.bf16.msra.mxu1 %v5785_v33 }
 0x790   :  { %5472 = vmatprep.subr.bf16.mxu1 %v6233_v34 }
 0x792   :  { %5463 = vmatmul.mubr.msk.bf16.vlgmr.msra.gmra.mxu1 %vm677_vm1, %v887_v62 }
 0x793   :  { %5473 = vmatpush3.bf16.xpose.msra.mxu1 %v1279_v37  ;;  %5474 = vmatprep.mubr.msk.bf16.mxu1 %vm6234_vm9, %v6233_v34 }
 0x794   :  { %5484 = vmatprep.subr.bf16.mxu1 %v6233_v34 }
 0x79a   :  { %5475 = vmatmul.mubr.msk.bf16.vlgmr.msra.gmra.mxu1 %vm677_vm1, %v1272_v38 }
 0x79b   :  { %5486 = vmatprep.mubr.msk.bf16.mxu1 %vm6234_vm9, %v6233_v34 }
 0x840   :  { %v1054_v41 = vpop.f32.mrf.mxu0 }
 0x842   :  { %v5442_v42 = vpop.f32.mrf.mxu0 }
 0x843   :  { %v5789_v42 = vld [vmem:[#allocation7 + $0x64] sm:$0xff]  }
 0x844   :  { %v1057_v43 = vpop.f32.mrf.mxu0 }
 0x846   :  { %v5443_v44 = vpop.f32.mrf.mxu0 }
 0x84a   :  { %v1102_v45 = vpop.f32.mrf.mxu1 }
 0x84b   :  { %v1108_v46 = vpack.c.bf16 %v1102_v45, %v1054_v41  ;;  %v5788_v41 = vld [vmem:[#allocation7 + $0x6c] sm:$0xff]  }
 0x84c   :  { %v5448_v48 = vpop.f32.mrf.mxu1 }
 0x84d   :  { %5455 = vmatmul.mubr.msk.bf16.vlgmr.msra.gmra.mxu0 %vm677_vm1, %v1108_v46 }
 0x84e   :  { %5467 = vmatpush3.bf16.xpose.msra.mxu0 %v1229_v49  ;;  %v1105_v50 = vpop.f32.mrf.mxu1  ;;  %5468 = vmatprep.mubr.msk.bf16.mxu0 %vm6234_vm9, %v6233_v34 }
 0x84f   :  { %5478 = vmatprep.subr.bf16.mxu0 %v6233_v34 }
 0x850   :  { %v5449_v51 = vpop.f32.mrf.mxu1 }
 0x852   :  { %v6468_v52 = vpop.f32.mrf.mxu1 }
 0x854   :  { %v5464_v56 = vpop.f32.mrf.mxu1 }
 0x855   :  { %5469 = vmatmul.mubr.msk.bf16.vlgmr.msra.gmra.mxu0 %vm677_vm1, %v1222_v53 }
 0x856   :  { %v6471_v57 = vpop.f32.mrf.mxu1  ;;  %5480 = vmatprep.mubr.msk.bf16.mxu0 %vm6234_vm9, %v6233_v34 }
 0x858   :  { %v5465_v58 = vpop.f32.mrf.mxu1 }
 0x85a   :  { %v1315_v61 = vpop.f32.mrf.mxu1 }
 0x85b   :  { %v1324_v62 = vsel %vm138_vm5, %v1315_v61, -inf }
 0x85c   :  { %1325 = vmax.xlane.f32.xlu1 %v1324_v62  ;;  %v5476_v63 = vpop.f32.mrf.mxu1 }
 0x85e   :  { %v1318_v0 = vpop.f32.mrf.mxu1 }
 0x860   :  { %v5477_v1 = vpop.f32.mrf.mxu1 }
 0x86d   :  { %1345 = vrot.lane.b32.xlu1 %v6379_v59, %s6226_s3 }
 0x871   :  { %1502 = vrot.lane.b32.xlu1 %v6361_v47, %s6230_s20 }
 0x875   :  { %1552 = vrot.lane.b32.xlu1 %v6368_v54, %s6230_s20 }
 0x879   :  { %1550 = vrot.lane.b32.xlu1 %v6381_v60, %s6230_s20 }
 0x8e5   :  { %v1326_v2 = vpop.xlane.xlu1 %1325 }
 0x8e6   :  { %v1328_v7 = vsub.f32 %v1315_v61, %v1326_v2 }
 0x8e8   :  { %v1331_v8 = vmul.f32 1.442695, %v1328_v7 }
 0x8e9   :  { %v1346_v5 = vpop.permute.xlu1 %1345 }
 0x8ea   :  { %v1351_v6 = vsel %vm797_vm2, %v1346_v5, 0  ;;  %6024 = vpow2.f32 %v1331_v8 }
 0x8eb   :  { %5479 = vmatpush3.bf16.msra.mxu0 %v1351_v6 }
 0x8ec   :  { %5490 = vmatprep.subr.bf16.mxu0 %v6233_v34 }
 0x8ed   :  { %v1503_v33 = vpop.permute.xlu1 %1502 }
 0x8ee   :  { %v1508_v37 = vsel %vm677_vm1, %v1503_v33, 0  ;;  %v5790_v33 = vld [vmem:[#allocation7 + $0x7c] sm:$0xff]  }
 0x8f1   :  { %v1553_v49 = vpop.permute.xlu1 %1552 }
 0x8f2   :  { %v1558_v62 = vsel %vm677_vm1, %v1553_v49, 0 }
 0x8f5   :  { %v1551_v2 = vpop.permute.xlu1 %1550 }
 0x8f7   :  { %v6025_v60 = vpop.eup %6024 }
 0x8f8   :  { %v1336_v3 = vsel %vm138_vm5, %v6025_v60, 0.0 }
 0x90d   :  { %v6486_v10 = vpop.f32.mrf.mxu0 }
 0x90f   :  { %v5456_v11 = vpop.f32.mrf.mxu0 }
 0x911   :  { %v6488_v47 = vpop.f32.mrf.mxu0 }
 0x913   :  { %v5457_v12 = vpop.f32.mrf.mxu0 }
 0x914   :  { %v1215_v12 = vadd.f32 %v6468_v52, %v6486_v10 }
 0x915   :  { %v1265_v54 = vpop.f32.mrf.mxu0 }
 0x916   :  { %v1321_v13 = vsel %vm138_vm5, %v1265_v54, -inf }
 0x917   :  { %1322 = vmax.xlane.f32.xlu0 %v1321_v13  ;;  %v5470_v14 = vpop.f32.mrf.mxu0 }
 0x918   :  { %v1218_v14 = vadd.f32 %v6471_v57, %v6488_v47 }
 0x919   :  { %v1268_v15 = vpop.f32.mrf.mxu0 }
 0x91b   :  { %1337 = vadd.xlane.f32.xlu0 %v1336_v3  ;;  %v5471_v16 = vpop.f32.mrf.mxu0 }
 0x9a0   :  { %v1323_v17 = vpop.xlane.xlu0 %1322 }
 0x9a1   :  { %v1327_v18 = vsub.f32 %v1265_v54, %v1323_v17 }
 0x9a3   :  { %v1329_v19 = vmul.f32 1.442695, %v1327_v18 }
 0x9a4   :  { %v1338_v22 = vpop.xlane.xlu0 %1337 }
 0x9a5   :  { %6026 = vpow2.f32 %v1329_v19 }
 0x9a6   :  { %6028 = vrcp.f32 %v1338_v22 }
 0x9b2   :  { %v6027_v20 = vpop.eup %6026 }
 0x9b3   :  { %v1333_v21 = vsel %vm138_vm5, %v6027_v20, 0.0  ;;  %v6029_v23 = vpop.eup %6028 }
 0x9b4   :  { %1334 = vadd.xlane.f32.xlu0 %v1333_v21  ;;  %v1342_v25 = vmul.f32 %v6029_v23, %v6025_v60 }
 0x9b6   :  { %v1344_v35 = vpack.c.bf16 %v1342_v25, %v1342_v25 }
 0x9ca   :  { %1393 = vrot.lane.b32.xlu0 %v6409_v26, %s6226_s3 }
 0x9ce   :  { %1500 = vrot.lane.b32.xlu0 %v6370_v55, %s6230_s20 }
 0xa3d   :  { %v1335_v24 = vpop.xlane.xlu0 %1334 }
 0xa3e   :  { %6030 = vrcp.f32 %v1335_v24 }
 0xa41   :  { %v1394_v27 = vpop.permute.xlu0 %1393 }
 0xa42   :  { %v1399_v32 = vsel %vm797_vm2, %v1394_v27, 0 }
 0xa43   :  { %5485 = vmatpush3.bf16.msra.mxu1 %v1399_v32 }
 0xa44   :  { %5498 = vmatprep.subr.bf16.mxu1 %v6233_v34 }
 0xa45   :  { %v1501_v39 = vpop.permute.xlu0 %1500 }
 0xa46   :  { %5487 = vmatmul.mubr.msk.bf16.vlgmr.msra.gmra.mxu1 %vm138_vm5, %v1344_v35 }
 0xa47   :  { %5499 = vmatpush3.bf16.xpose.msra.mxu1 %v1508_v37  ;;  %5500 = vmatprep.mubr.msk.bf16.mxu1 %vm6234_vm9, %v6233_v34 }
 0xa48   :  { %5510 = vmatprep.subr.bf16.mxu1 %v6233_v34 }
 0xa4b   :  { %v6031_v55 = vpop.eup %6030 }
 0xa4c   :  { %v1341_v38 = vmul.f32 %v6031_v55, %v6027_v20 }
 0xa4e   :  { %5501 = vmatmul.mubr.msk.bf16.vlgmr.msra.gmra.mxu1 %vm677_vm1, %v1501_v39  ;;  %v1343_v40 = vpack.c.bf16 %v1341_v38, %v1341_v38 }
 0xa4f   :  { %5512 = vmatprep.mubr.msk.bf16.mxu1 %vm6234_vm9, %v6233_v34 }
 0xa50   :  { %5481 = vmatmul.mubr.msk.bf16.vlgmr.msra.gmra.mxu0 %vm138_vm5, %v1343_v40 }
 0xa51   :  { %5494 = vmatprep.mubr.msk.bf16.mxu0 %vm6234_vm9, %v6233_v34  ;;  %5491 = vmatpush3.bf16.msra.mxu0 %v5788_v41 }
 0xa52   :  { %5492 = vmatprep.subr.bf16.mxu0 %v6233_v34 }
 0xa55   :  { %5493 = vmatpush3.bf16.msra.mxu0 %v5789_v42 }
 0xa56   :  { %5504 = vmatprep.subr.bf16.mxu0 %v6233_v34 }
 0xb06   :  { %v1435_v43 = vpop.f32.mrf.mxu1 }
 0xb08   :  { %v5488_v44 = vpop.f32.mrf.mxu1 }
 0xb09   :  { %v5791_v44 = vld [vmem:[#allocation7 + $0x74] sm:$0xff]  }
 0xb0a   :  { %v1438_v45 = vpop.f32.mrf.mxu1 }
 0xb0c   :  { %v5489_v46 = vpop.f32.mrf.mxu1 }
 0xb0e   :  { %v1544_v48 = vpop.f32.mrf.mxu1 }
 0xb0f   :  { %v1600_v50 = vsel %vm138_vm5, %v1544_v48, -inf }
 0xb10   :  { %1601 = vmax.xlane.f32.xlu0 %v1600_v50  ;;  %v1387_v51 = vpop.f32.mrf.mxu0  ;;  %v5502_v53 = vpop.f32.mrf.mxu1 }
 0xb11   :  { %v1441_v56 = vpack.c.bf16 %v1435_v43, %v1387_v51  ;;  %v1779_v53 = vld [vmem:[#allocation10 + $0x1] ss:$0 sm:$0xff] }
 0xb12   :  { %v5482_v58 = vpop.f32.mrf.mxu0  ;;  %v1547_v61 = vpop.f32.mrf.mxu1 }
 0xb13   :  { %5495 = vmatmul.mubr.msk.bf16.vlgmr.msra.gmra.mxu0 %vm677_vm1, %v1441_v56 }
 0xb14   :  { %5505 = vmatpush3.bf16.xpose.msra.mxu0 %v1558_v62  ;;  %v1390_v63 = vpop.f32.mrf.mxu0  ;;  %v5503_v0 = vpop.f32.mrf.mxu1  ;;  %5506 = vmatprep.mubr.msk.bf16.mxu0 %vm6234_vm9, %v6233_v34 }
 0xb15   :  { %5516 = vmatprep.subr.bf16.mxu0 %v6233_v34 }
 0xb16   :  { %v5483_v1 = vpop.f32.mrf.mxu0 }
 0xb1b   :  { %5507 = vmatmul.mubr.msk.bf16.vlgmr.msra.gmra.mxu0 %vm677_vm1, %v1551_v2 }
 0xb1c   :  { %5518 = vmatprep.mubr.msk.bf16.mxu0 %vm6234_vm9, %v6233_v34 }
 0xb99   :  { %v1602_v5 = vpop.xlane.xlu0 %1601 }
 0xb9a   :  { %v1606_v6 = vsub.f32 %v1544_v48, %v1602_v5 }
 0xb9c   :  { %v1608_v7 = vmul.f32 1.442695, %v1606_v6 }
 0xb9e   :  { %6032 = vpow2.f32 %v1608_v7 }
 0xbab   :  { %v6033_v8 = vpop.eup %6032 }
 0xbac   :  { %v1612_v11 = vsel %vm138_vm5, %v6033_v8, 0.0 }
 0xbad   :  { %1613 = vadd.xlane.f32.xlu0 %v1612_v11  ;;  %v5797_v11 = vld [vmem:[#allocation8 + $0xc4] ss:$16 sps:$4 sm:$0xff]  }
 0xbd3   :  { %v1491_v54 = vpop.f32.mrf.mxu0 }
 0xbd4   :  { %v1498_v13 = vadd.f32 %v1491_v54, %v1215_v12  ;;  %v5795_v12 = vld [vmem:[#allocation8 + $0xc0] ss:$16 sps:$4 sm:$0xff]   ;;  %v5800_v54 = vld [vmem:[#allocation8 + $0xa4] ss:$16 sps:$4 sm:$0xff]  }
 0xbd5   :  { %v5496_v60 = vpop.f32.mrf.mxu0 }
 0xbd6   :  { %v5803_v60 = vld [vmem:[#allocation8 + $0x84] ss:$16 sps:$4 sm:$0xff]  }
 0xbd7   :  { %v1494_v15 = vpop.f32.mrf.mxu0 }
 0xbd8   :  { %v1499_v3 = vadd.f32 %v1494_v15, %v1218_v14  ;;  %v5806_v14 = vld [vmem:[#allocation8 + $0x64] ss:$16 sps:$4 sm:$0xff]   ;;  %v5804_v15 = vld [vmem:[#allocation8 + $0x60] ss:$16 sps:$4 sm:$0xff]  }
 0xbd9   :  { %v5497_v16 = vpop.f32.mrf.mxu0 }
 0xbda   :  { %v5807_v16 = vld [vmem:[#allocation8 + $0x40] ss:$16 sps:$4 sm:$0xff]  }
 0xbdb   :  { %v1594_v17 = vpop.f32.mrf.mxu0 }
 0xbdc   :  { %v1603_v18 = vsel %vm138_vm5, %v1594_v17, -inf }
 0xbdd   :  { %1604 = vmax.xlane.f32.xlu1 %v1603_v18  ;;  %v5508_v19 = vpop.f32.mrf.mxu0  ;;  %v5810_v18 = vld [vmem:[#allocation8 + $0x20] ss:$16 sps:$4 sm:$0xff]  }
 0xbde   :  { %v5815_v19 = vld [vmem:[#allocation8 + $0x4] ss:$16 sps:$4 sm:$0xff]  }
 0xbdf   :  { %v1597_v20 = vpop.f32.mrf.mxu0 }
 0xbe0   :  { %v5813_v20 = vld [vmem:[#allocation8] ss:$16 sps:$4 sm:$0xff]  }
 0xbe1   :  { %v5509_v21 = vpop.f32.mrf.mxu0 }
 0xbe2   :  { %v5816_v21 = vld [vmem:[#allocation7 + $0x13c] sm:$0xff]  }
 0xbee   :  { %1624 = vrot.lane.b32.xlu1 %v6379_v59, %s6230_s20 }
 0xc36   :  { %v1614_v52 = vpop.xlane.xlu0 %1613 }
 0xc37   :  { %6034 = vrcp.f32 %v1614_v52  ;;  %v5817_v52 = vld [vmem:[#allocation7 + $0xfc] sm:$0xff]  }
 0xc44   :  { %v6035_v10 = vpop.eup %6034 }
 0xc45   :  { %v1620_v57 = vmul.f32 %v6035_v10, %v6033_v8  ;;  %v5794_v8 = vld [vmem:[#allocation8 + $0xe4] ss:$16 sps:$4 sm:$0xff]  }
 0xc46   :  { %v5818_v10 = vld [vmem:[#allocation7 + $0x134] sm:$0xff]  }
 0xc47   :  { %v1622_v27 = vpack.c.bf16 %v1620_v57, %v1620_v57  ;;  %v5822_v57 = vld [vmem:[#allocation7 + $0x124] sm:$0xff]  }
 0xc66   :  { %v1605_v22 = vpop.xlane.xlu1 %1604 }
 0xc67   :  { %v1607_v23 = vsub.f32 %v1594_v17, %v1605_v22  ;;  %v5812_v17 = vld [vmem:[#allocation8 + $0x24] ss:$16 sps:$4 sm:$0xff]  }
 0xc68   :  { %v5819_v22 = vld [vmem:[#allocation7 + $0xf4] sm:$0xff]  }
 0xc69   :  { %v1610_v24 = vmul.f32 1.442695, %v1607_v23  ;;  %v5820_v23 = vld [vmem:[#allocation7 + $0x12c] sm:$0xff]  }
 0xc6a   :  { %v1625_v47 = vpop.permute.xlu1 %1624 }
 0xc6b   :  { %6036 = vpow2.f32 %v1610_v24  ;;  %v1630_v25 = vsel %vm797_vm2, %v1625_v47, 0  ;;  %v5821_v24 = vld [vmem:[#allocation7 + $0xec] sm:$0xff]   ;;  %v5823_v47 = vld [vmem:[#allocation7 + $0xe4] sm:$0xff]  }
 0xc6c   :  { %5511 = vmatpush3.bf16.msra.mxu1 %v1630_v25  ;;  %v5824_v25 = vld [vmem:[#allocation7 + $0x11c] sm:$0xff]  }
 0xc6d   :  { %5522 = vmatprep.subr.bf16.mxu1 %v6233_v34 }
 0xc6f   :  { %5513 = vmatmul.mubr.msk.bf16.vlgmr.msra.gmra.mxu1 %vm138_vm5, %v1622_v27  ;;  %v5825_v27 = vld [vmem:[#allocation7 + $0xdc] sm:$0xff]  }
 0xc70   :  { %5526 = vmatprep.mubr.msk.bf16.mxu1 %vm6234_vm9, %v6233_v34  ;;  %5523 = vmatpush3.bf16.msra.mxu1 %v5790_v33 }
 0xc71   :  { %5524 = vmatprep.subr.bf16.mxu1 %v6233_v34 }
 0xc74   :  { %5525 = vmatpush3.bf16.msra.mxu1 %v5791_v44 }
 0xc75   :  { %5203 = vmatprep.subr.bf16.mxu1 %v5816_v21 }
 0xc78   :  { %v6037_v59 = vpop.eup %6036 }
 0xc79   :  { %v1615_v32 = vsel %vm138_vm5, %v6037_v59, 0.0 }
 0xc7a   :  { %1616 = vadd.xlane.f32.xlu0 %v1615_v32 }
 0xc90   :  { %1672 = vrot.lane.b32.xlu0 %v6409_v26, %s6230_s20 }
 0xd03   :  { %v1617_v35 = vpop.xlane.xlu0 %1616 }
 0xd04   :  { %6038 = vrcp.f32 %v1617_v35 }
 0xd07   :  { %v1673_v37 = vpop.permute.xlu0 %1672 }
 0xd08   :  { %v1678_v55 = vsel %vm797_vm2, %v1673_v37, 0 }
 0xd09   :  { %5517 = vmatpush3.bf16.msra.mxu0 %v1678_v55 }
 0xd0a   :  { %1911 = vmatprep.subr.bf16.mxu0 %v5794_v8  ;;  %v5829_v8 = vld [vmem:[#allocation7 + $0xcc] sm:$0xff]  }
 0xd11   :  { %v6039_v38 = vpop.eup %6038 }
 0xd12   :  { %v1621_v39 = vmul.f32 %v6039_v38, %v6037_v59 }
 0xd14   :  { %v1623_v40 = vpack.c.bf16 %v1621_v39, %v1621_v39 }
 0xd16   :  { %5519 = vmatmul.mubr.msk.bf16.vlgmr.msra.gmra.mxu0 %vm138_vm5, %v1623_v40 }
 0xd17   :  { %1943 = vmatprep.mubr.bf16.mxu0 %v6232_v28 }
 0xd2f   :  { %v1666_v41 = vpop.f32.mrf.mxu1 }
 0xd31   :  { %v5514_v42 = vpop.f32.mrf.mxu1 }
 0xd33   :  { %v1669_v26 = vpop.f32.mrf.mxu1 }
 0xd35   :  { %v5515_v43 = vpop.f32.mrf.mxu1 }
 0xdd6   :  { %v1714_v45 = vpop.f32.mrf.mxu0 }
 0xdd7   :  { %v1720_v46 = vpack.c.bf16 %v1714_v45, %v1666_v41  ;;  %v1784_v45 = vld [vmem:[#allocation10 + $0x2] ss:$0 sm:$0xff] }
 0xdd8   :  { %v5520_v48 = vpop.f32.mrf.mxu0 }
 0xdd9   :  { %5527 = vmatmul.mubr.msk.bf16.vlgmr.msra.gmra.mxu1 %vm677_vm1, %v1720_v46 }
 0xdda   :  { %v1717_v49 = vpop.f32.mrf.mxu0  ;;  %5204 = vmatpush3.bf16.msra.mxu1 %v5817_v52 }
 0xddb   :  { %5205 = vmatprep.subr.bf16.mxu1 %v5818_v10 }
 0xddc   :  { %v5521_v50 = vpop.f32.mrf.mxu0 }
 0xdde   :  { %5206 = vmatpush3.bf16.msra.mxu1 %v5819_v22  ;;  %v1960_v22 = vld [vmem:[#allocation10 + $0x5] ss:$0 sm:$0xff] }
 0xddf   :  { %5207 = vmatprep.subr.bf16.mxu1 %v5820_v23 }
 0xde2   :  { %5208 = vmatpush3.bf16.msra.mxu1 %v5821_v24 }
 0xde3   :  { %5209 = vmatprep.subr.bf16.mxu1 %v5822_v57 }
 0xde6   :  { %5210 = vmatpush3.bf16.msra.mxu1 %v5823_v47 }
 0xde7   :  { %5211 = vmatprep.subr.bf16.mxu1 %v5824_v25 }
 0xdea   :  { %5212 = vmatpush3.bf16.msra.mxu1 %v5825_v27 }
 0xe99   :  { %v1770_v51 = vpop.f32.mrf.mxu1 }
 0xe9a   :  { %v1777_v56 = vadd.f32 %v1770_v51, %v1498_v13  ;;  %v5798_v13 = vld [vmem:[#allocation8 + $0xa0] ss:$16 sps:$4 sm:$0xff]  }
 0xe9b   :  { %v5528_v58 = vpop.f32.mrf.mxu1 }
 0xe9c   :  { %v1780_v61 = vadd.f32 %v1779_v53, %v1777_v56  ;;  %v1785_v58 = vld [vmem:[#allocation10 + $0x3] ss:$0 sm:$0xff] }
 0xe9d   :  { %v1773_v62 = vpop.f32.mrf.mxu1 }
 0xe9e   :  { %v1778_v63 = vadd.f32 %v1773_v62, %v1499_v3  ;;  %v6543_v0 = vadd.f32 %v1780_v61, %v6345_v29  ;;  %v5792_v29 = vld [vmem:[#allocation8 + $0xe0] ss:$16 sps:$4 sm:$0xff]   ;;  %v5809_v3 = vld [vmem:[#allocation8 + $0x44] ss:$16 sps:$4 sm:$0xff]  }
 0xe9f   :  { %v5529_v1 = vpop.f32.mrf.mxu1  ;;  %1912 = vmatpush1.bf16.msra.mxu0 %v5792_v29  ;;  %v1819_v29 = vld [vmem:[#allocation10 + $0x4] ss:$8 sm:$0x3] }
 0xea0   :  { %v1781_v2 = vadd.f32 %v1779_v53, %v1778_v63  ;;  %1786 = vadd.xlane.f32.xlu1 %v6543_v0  ;;  %v1793_v5 = vmul.f32 %v6543_v0, %v6543_v0  ;;  %1913 = vmatprep.subr.bf16.mxu0 %v5797_v11 }
 0xea2   :  { %v6549_v6 = vadd.f32 %v1781_v2, %v6347_v30  ;;  %v5801_v30 = vld [vmem:[#allocation8 + $0x80] ss:$16 sps:$4 sm:$0xff]  }
 0xea3   :  { %1914 = vmatpush1.bf16.msra.mxu0 %v5795_v12  ;;  %v5826_v2 = vld [vmem:[#allocation7 + $0x114] sm:$0xff]   ;;  %v1828_v12 = vrot.slane %v1819_v29, %v6312_v31 }
 0xea4   :  { %1795 = vadd.xlane.f32.xlu1 %v1793_v5  ;;  %1788 = vadd.xlane.f32.xlu0 %v6549_v6  ;;  %v1794_v7 = vmul.f32 %v6549_v6, %v6549_v6  ;;  %v5827_v5 = vld [vmem:[#allocation7 + $0xd4] sm:$0xff]  }
 0xea5   :  { %1915 = vmatprep.subr.bf16.mxu0 %v5800_v54  ;;  %5213 = vmatprep.subr.bf16.mxu1 %v5826_v2  ;;  %v1824_v54 = vrot.slane %v1819_v29, %v6293_v9  ;;  %v5860_v2 = vld [vmem:[#allocation5 + $0xc0] ss:$12 sps:$4 sm:$0xff]  }
 0xea6   :  { %5214 = vmatpush3.bf16.msra.mxu1 %v5827_v5  ;;  %v5863_v5 = vld [vmem:[#allocation5 + $0xc8] ss:$12 sps:$4 sm:$0xff]  }
 0xea7   :  { %1916 = vmatpush1.bf16.msra.mxu0 %v5798_v13 }
 0xea8   :  { %1797 = vadd.xlane.f32.xlu0 %v1794_v7  ;;  %1917 = vmatprep.subr.bf16.mxu0 %v5803_v60  ;;  %v5828_v7 = vld [vmem:[#allocation7 + $0x10c] sm:$0xff]  }
 0xea9   :  { %5215 = vmatprep.subr.bf16.mxu1 %v5828_v7 }
 0xeaa   :  { %5216 = vmatpush3.bf16.msra.mxu1 %v5829_v8 }
 0xeab   :  { %1918 = vmatpush1.bf16.msra.mxu0 %v5801_v30 }
 0xeac   :  { %1919 = vmatprep.subr.bf16.mxu0 %v5806_v14 }
 0xeaf   :  { %1920 = vmatpush1.bf16.msra.mxu0 %v5804_v15 }
 0xeb0   :  { %1921 = vmatprep.subr.bf16.mxu0 %v5809_v3 }
 0xeb3   :  { %1922 = vmatpush1.bf16.msra.mxu0 %v5807_v16 }
 0xeb4   :  { %1923 = vmatprep.subr.bf16.mxu0 %v5812_v17 }
 0xeb7   :  { %1924 = vmatpush1.bf16.msra.mxu0 %v5810_v18 }
 0xeb8   :  { %1925 = vmatprep.subr.bf16.mxu0 %v5815_v19 }
 0xebb   :  { %1926 = vmatpush1.bf16.msra.mxu0 %v5813_v20 }
 0xf29   :  { %v1787_v59 = vpop.xlane.xlu1 %1786 }
 0xf2a   :  { %v1791_v32 = vmul.f32 0.0078125, %v1787_v59 }
 0xf2c   :  { %v1801_v37 = vmul.f32 %v1791_v32, %v1791_v32  ;;  %v1805_v49 = vsub.f32 %v6543_v0, %v1791_v32  ;;  %v5830_v0 = vld [vmem:[#allocation7 + $0x104] sm:$0xff]  }
 0xf2d   :  { %v1796_v33 = vpop.xlane.xlu1 %1795  ;;  %v1789_v35 = vpop.xlane.xlu0 %1788  ;;  %5217 = vmatprep.subr.bf16.mxu1 %v5830_v0 }
 0xf2e   :  { %v1799_v55 = vmul.f32 0.0078125, %v1796_v33  ;;  %v1792_v38 = vmul.f32 0.0078125, %v1789_v35 }
 0xf30   :  { %v1803_v39 = vsub.f32 %v1799_v55, %v1801_v37  ;;  %v1802_v42 = vmul.f32 %v1792_v38, %v1792_v38  ;;  %v1806_v51 = vsub.f32 %v6549_v6, %v1792_v38  ;;  %v5831_v6 = vld [vmem:[#allocation7 + $0xc4] sm:$0xff]   ;;  %v5834_v55 = vld [vmem:[#allocation5 + $0x16c] ss:$12 sps:$4 sm:$0xff]  }
 0xf31   :  { %v1798_v40 = vpop.xlane.xlu0 %1797  ;;  %5218 = vmatpush3.bf16.msra.mxu1 %v5831_v6  ;;  %v5832_v38 = vld [vmem:[#allocation5 + $0x168] ss:$12 sps:$4 sm:$0xff]   ;;  %2375 = vmatprep.subr.bf16.mxu0 %v5834_v55 }
 0xf32   :  { %v1807_v41 = vadd.f32 1e-05, %v1803_v39  ;;  %v1800_v26 = vmul.f32 0.0078125, %v1798_v40  ;;  %5530 = vmatprep.subr.bf16.mxu1 %v6233_v34  ;;  %v5835_v39 = vld [vmem:[#allocation5 + $0x170] ss:$12 sps:$4 sm:$0xff]  }
 0xf33   :  { %v5838_v40 = vld [vmem:[#allocation5 + $0x154] ss:$12 sps:$4 sm:$0xff]  }
 0xf34   :  { %6040 = vrsqrt.f32 %v1807_v41  ;;  %v1804_v43 = vsub.f32 %v1800_v26, %v1802_v42  ;;  %v5836_v41 = vld [vmem:[#allocation5 + $0x150] ss:$12 sps:$4 sm:$0xff]   ;;  %v5839_v42 = vld [vmem:[#allocation5 + $0x158] ss:$12 sps:$4 sm:$0xff]  }
 0xf35   :  { %v5842_v26 = vld [vmem:[#allocation5 + $0x13c] ss:$12 sps:$4 sm:$0xff]  }
 0xf36   :  { %v1808_v44 = vadd.f32 1e-05, %v1804_v43  ;;  %v5840_v43 = vld [vmem:[#allocation5 + $0x138] ss:$12 sps:$4 sm:$0xff]  }
 0xf38   :  { %6042 = vrsqrt.f32 %v1808_v44  ;;  %v5843_v44 = vld [vmem:[#allocation5 + $0x140] ss:$12 sps:$4 sm:$0xff]  }
 0xf41   :  { %v6041_v46 = vpop.eup %6040 }
 0xf42   :  { %v1811_v48 = vmul.f32 %v6041_v46, %v1784_v45  ;;  %v5846_v46 = vld [vmem:[#allocation5 + $0x124] ss:$12 sps:$4 sm:$0xff]  }
 0xf44   :  { %v1813_v56 = vmul.f32 %v1811_v48, %v1805_v49  ;;  %v5847_v48 = vld [vmem:[#allocation5 + $0x128] ss:$12 sps:$4 sm:$0xff]   ;;  %v5850_v49 = vld [vmem:[#allocation5 + $0x10c] ss:$12 sps:$4 sm:$0xff]  }
 0xf45   :  { %v6043_v50 = vpop.eup %6042 }
 0xf46   :  { %v1812_v53 = vmul.f32 %v6043_v50, %v1784_v45  ;;  %v1815_v62 = vadd.f32 %v1813_v56, %v1785_v58  ;;  %v5844_v45 = vld [vmem:[#allocation5 + $0x120] ss:$12 sps:$4 sm:$0xff]   ;;  %v5848_v50 = vld [vmem:[#allocation5 + $0x108] ss:$12 sps:$4 sm:$0xff]   ;;  %v5852_v56 = vld [vmem:[#allocation5 + $0xf0] ss:$12 sps:$4 sm:$0xff]  }
 0xf48   :  { %v1814_v61 = vmul.f32 %v1812_v53, %v1806_v51  ;;  %v5851_v51 = vld [vmem:[#allocation5 + $0x110] ss:$12 sps:$4 sm:$0xff]   ;;  %v5854_v53 = vld [vmem:[#allocation5 + $0xf4] ss:$12 sps:$4 sm:$0xff]  }
 0xf4a   :  { %v1816_v63 = vadd.f32 %v1814_v61, %v1785_v58  ;;  %v5855_v58 = vld [vmem:[#allocation5 + $0xf8] ss:$12 sps:$4 sm:$0xff]   ;;  %v5858_v61 = vld [vmem:[#allocation5 + $0xdc] ss:$12 sps:$4 sm:$0xff]  }
 0xf4c   :  { %v1817_v1 = vpack.c.bf16 %v1816_v63, %v1815_v62 }
 0xf4e   :  { %1944 = vmatmul.mubr.bf16.vlgmr.msra.gmra.mxu0 %v1817_v1  ;;  %v5862_v1 = vld [vmem:[#allocation5 + $0xc4] ss:$12 sps:$4 sm:$0xff]  }
 0xf4f   :  { %2407 = vmatprep.mubr.bf16.mxu0 %v6232_v28  ;;  %2376 = vmatpush1.bf16.msra.mxu0 %v5832_v38 }
 0xf50   :  { %2377 = vmatprep.subr.bf16.mxu0 %v5838_v40 }
 0xf53   :  { %2378 = vmatpush1.bf16.msra.mxu0 %v5836_v41 }
 0xf54   :  { %2379 = vmatprep.subr.bf16.mxu0 %v5842_v26 }
 0xf57   :  { %2380 = vmatpush1.bf16.msra.mxu0 %v5840_v43 }
 0xf58   :  { %2381 = vmatprep.subr.bf16.mxu0 %v5846_v46 }
 0xf5b   :  { %2382 = vmatpush1.bf16.msra.mxu0 %v5844_v45 }
 0xf5c   :  { %2383 = vmatprep.subr.bf16.mxu0 %v5850_v49 }
 0xf5f   :  { %2384 = vmatpush1.bf16.msra.mxu0 %v5848_v50 }
 0xf60   :  { %2385 = vmatprep.subr.bf16.mxu0 %v5854_v53 }
 0xf63   :  { %2386 = vmatpush1.bf16.msra.mxu0 %v5852_v56 }
 0xf64   :  { %2387 = vmatprep.subr.bf16.mxu0 %v5858_v61 }
0x100e   :  { %v1945_v11 = vpop.f32.mrf.mxu0 }
0x100f   :  { %v1946_v15 = vadd.f32 %v1945_v11, %v1824_v54 }
0x1010   :  { %v1947_v13 = vpop.f32.mrf.mxu0 }
0x1011   :  { %v1948_v60 = vadd.f32 %v1947_v13, %v1828_v12  ;;  %v1954_v20 = vmax.f32 %v1946_v15, 0.0 }
0x1012   :  { %v1949_v30 = vpop.f32.mrf.mxu0 }
0x1013   :  { %v1950_v14 = vadd.f32 %v1949_v30, %v1824_v54  ;;  %v1955_v18 = vmax.f32 %v1948_v60, 0.0 }
0x1014   :  { %v1951_v3 = vpop.f32.mrf.mxu0 }
0x1015   :  { %v1952_v16 = vadd.f32 %v1951_v3, %v1828_v12  ;;  %v1956_v17 = vmax.f32 %v1950_v14, 0.0 }
0x1017   :  { %v1957_v19 = vmax.f32 %v1952_v16, 0.0  ;;  %v1958_v52 = vpack.c.bf16 %v1956_v17, %v1954_v20  ;;  %v2100_v16 = vld [vmem:[#allocation10 + $0x6] ss:$0 sm:$0xff] }
0x1019   :  { %v1959_v21 = vpack.c.bf16 %v1957_v19, %v1955_v18 }
0x101b   :  { %2089 = vmatprep.mubr.bf16.mxu1 %v1959_v21 }
0x101c   :  { %2090 = vmatmul.mubr.bf16.vlgmr.msra.gmra.mxu1 %v1958_v52 }
0x101d   :  { %5546 = vmatprep.mubr.msk.bf16.mxu1 %vm6234_vm9, %v6233_v34  ;;  %5531 = vmatpush3.bf16.msra.mxu1 %v5835_v39 }
0x101e   :  { %5532 = vmatprep.subr.bf16.mxu1 %v6233_v34 }
0x1021   :  { %5533 = vmatpush3.bf16.msra.mxu1 %v5839_v42 }
0x1022   :  { %5534 = vmatprep.subr.bf16.mxu1 %v6233_v34 }
0x1025   :  { %5535 = vmatpush3.bf16.msra.mxu1 %v5843_v44 }
0x1026   :  { %5536 = vmatprep.subr.bf16.mxu1 %v6233_v34 }
0x1029   :  { %5537 = vmatpush3.bf16.msra.mxu1 %v5847_v48 }
0x102a   :  { %5538 = vmatprep.subr.bf16.mxu1 %v6233_v34 }
0x102d   :  { %5539 = vmatpush3.bf16.msra.mxu1 %v5851_v51 }
0x102e   :  { %5540 = vmatprep.subr.bf16.mxu1 %v6233_v34 }
0x1031   :  { %5541 = vmatpush3.bf16.msra.mxu1 %v5855_v58 }
0x1032   :  { %5542 = vmatprep.subr.bf16.mxu1 %v6233_v34 }
0x10dc   :  { %v5219_v10 = vpop.f32.mrf.mxu1 }
0x10de   :  { %v5220_v23 = vpop.f32.mrf.mxu1 }
0x10df   :  { %v5221_v24 = vadd.f32 %v5220_v23, %v5219_v10 }
0x10e0   :  { %v5222_v57 = vpop.f32.mrf.mxu1 }
0x10e1   :  { %v2092_v47 = vadd.f32 %v5221_v24, %v1960_v22 }
0x10e2   :  { %v5223_v25 = vpop.f32.mrf.mxu1 }
0x10e3   :  { %v5224_v27 = vadd.f32 %v5223_v25, %v5222_v57  ;;  %v6562_v59 = vadd.f32 %v2092_v47, %v1815_v62  ;;  %v5856_v62 = vld [vmem:[#allocation5 + $0xd8] ss:$12 sps:$4 sm:$0xff]  }
0x10e4   :  { %2388 = vmatpush1.bf16.msra.mxu0 %v5856_v62  ;;  %v2230_v25 = vld [vmem:[#allocation10 + $0x20] ss:$8 sm:$0x7] }
0x10e5   :  { %v2095_v32 = vadd.f32 %v5224_v27, %v1960_v22  ;;  %2102 = vadd.xlane.f32.xlu1 %v6562_v59  ;;  %v2108_v35 = vmul.f32 %v6562_v59, %v6562_v59  ;;  %2389 = vmatprep.subr.bf16.mxu0 %v5862_v1  ;;  %v2101_v22 = vld [vmem:[#allocation10 + $0x7] ss:$0 sm:$0xff]  ;;  %v2239_v27 = vrot.slane %v2230_v25, %v6312_v31 }
0x10e6   :  { %v2235_v40 = vrot.slane %v2230_v25, %v6293_v9 }
0x10e7   :  { %v6565_v33 = vadd.f32 %v2095_v32, %v1816_v63  ;;  %v5859_v63 = vld [vmem:[#allocation5 + $0xe0] ss:$12 sps:$4 sm:$0xff]  }
0x10e8   :  { %5543 = vmatpush3.bf16.msra.mxu1 %v5859_v63  ;;  %2390 = vmatpush1.bf16.msra.mxu0 %v5860_v2 }
0x10e9   :  { %2104 = vadd.xlane.f32.xlu0 %v6565_v33  ;;  %2110 = vadd.xlane.f32.xlu1 %v2108_v35  ;;  %v2109_v37 = vmul.f32 %v6565_v33, %v6565_v33 }
0x10ea   :  { %5544 = vmatprep.subr.bf16.mxu1 %v6233_v34  ;;  %5550 = vmatprep.subr.bf16.mxu0 %v6233_v34 }
0x10ec   :  { %5545 = vmatpush3.bf16.msra.mxu1 %v5863_v5 }
0x10ed   :  { %2112 = vadd.xlane.f32.xlu0 %v2109_v37  ;;  %5556 = vmatprep.subr.bf16.mxu1 %v6233_v34  ;;  %v2243_v37 = vrot.slane %v2230_v25, %v6356_v36 }
0x116e   :  { %v2103_v7 = vpop.xlane.xlu1 %2102 }
0x116f   :  { %v2106_v8 = vmul.f32 0.0078125, %v2103_v7 }
0x1171   :  { %v2116_v29 = vmul.f32 %v2106_v8, %v2106_v8  ;;  %v2120_v19 = vsub.f32 %v6562_v59, %v2106_v8 }
0x1172   :  { %v2105_v0 = vpop.xlane.xlu0 %2104  ;;  %v2111_v6 = vpop.xlane.xlu1 %2110 }
0x1173   :  { %v2107_v11 = vmul.f32 0.0078125, %v2105_v0  ;;  %v2114_v12 = vmul.f32 0.0078125, %v2111_v6 }
0x1175   :  { %v2118_v54 = vsub.f32 %v2114_v12, %v2116_v29  ;;  %v2117_v30 = vmul.f32 %v2107_v11, %v2107_v11  ;;  %v2121_v21 = vsub.f32 %v6565_v33, %v2107_v11 }
0x1176   :  { %v2113_v13 = vpop.xlane.xlu0 %2112 }
0x1177   :  { %v2122_v60 = vadd.f32 1e-05, %v2118_v54  ;;  %v2115_v14 = vmul.f32 0.0078125, %v2113_v13 }
0x1179   :  { %6044 = vrsqrt.f32 %v2122_v60  ;;  %v2119_v15 = vsub.f32 %v2115_v14, %v2117_v30 }
0x117b   :  { %v2123_v3 = vadd.f32 1e-05, %v2119_v15 }
0x117d   :  { %6046 = vrsqrt.f32 %v2123_v3 }
0x1186   :  { %v6045_v17 = vpop.eup %6044 }
0x1187   :  { %v2126_v18 = vmul.f32 %v6045_v17, %v2100_v16 }
0x1189   :  { %v2128_v10 = vmul.f32 %v2126_v18, %v2120_v19 }
0x118a   :  { %v6047_v20 = vpop.eup %6046 }
0x118b   :  { %v2127_v52 = vmul.f32 %v6047_v20, %v2100_v16  ;;  %v6583_v24 = vadd.f32 %v2128_v10, %v2101_v22 }
0x118d   :  { %v2129_v23 = vmul.f32 %v2127_v52, %v2121_v21 }
0x118f   :  { %v6585_v57 = vadd.f32 %v2129_v23, %v2101_v22 }
0x1191   :  { %v2228_v47 = vpack.c.bf16 %v6585_v57, %v6583_v24 }
0x1193   :  { %2408 = vmatmul.mubr.bf16.vlgmr.msra.gmra.mxu0 %v2228_v47  ;;  %5547 = vmatmul.mubr.bf16.vlgmr.msra.gmra.mxu1 %v2228_v47 }
0x1194   :  { %5552 = vmatprep.mubr.msk.bf16.mxu0 %vm6234_vm9, %v6233_v34  ;;  %5558 = vmatprep.mubr.msk.bf16.mxu1 %vm6234_vm9, %v6233_v34 }
0x1253   :  { %v2409_v59 = vpop.f32.mrf.mxu0  ;;  %v2452_v32 = vpop.f32.mrf.mxu1 }
0x1254   :  { %v2453_v43 = vadd.f32 %v2452_v32, %v2243_v37  ;;  %v2410_v46 = vadd.f32 %v2409_v59, %v2235_v40 }
0x1255   :  { %v2411_v33 = vpop.f32.mrf.mxu0  ;;  %v5548_v35 = vpop.f32.mrf.mxu1 }
0x1256   :  { %v2412_v55 = vadd.f32 %v2411_v33, %v2239_v27  ;;  %v6603_v49 = vpack.c.bf16 %v2453_v43, %v2453_v43  ;;  %v6607_v53 = vpack.c.bf16 %v2410_v46, %v2410_v46 }
0x1257   :  { %v2413_v38 = vpop.f32.mrf.mxu0  ;;  %v2455_v39 = vpop.f32.mrf.mxu1 }
0x1258   :  { %v6596_v41 = vpack.c.bf16 %v2412_v55, %v2412_v55  ;;  %v2456_v50 = vadd.f32 %v2455_v39, %v2243_v37  ;;  %v2414_v56 = vadd.f32 %v2413_v38, %v2235_v40  ;;  %v2597_v61 = vsel %vm797_vm2, %v6603_v49, 0 }
0x1259   :  { %v2415_v42 = vpop.f32.mrf.mxu0  ;;  %v5549_v26 = vpop.f32.mrf.mxu1 }
0x125a   :  { %v2416_v44 = vadd.f32 %v2415_v42, %v2239_v27  ;;  %v2481_v45 = vsel %vm677_vm1, %v6596_v41, 0  ;;  %v6610_v58 = vpack.c.bf16 %v2456_v50, %v2456_v50  ;;  %v6618_v62 = vpack.c.bf16 %v2414_v56, %v2414_v56 }
0x125b   :  { %5551 = vmatpush3.bf16.xpose.msra.mxu0 %v2481_v45 }
0x125c   :  { %v6600_v48 = vpack.c.bf16 %v2416_v44, %v2416_v44  ;;  %5562 = vmatprep.subr.bf16.mxu0 %v6233_v34  ;;  %v2643_v63 = vsel %vm797_vm2, %v6610_v58, 0 }
0x125e   :  { %v2527_v51 = vsel %vm677_vm1, %v6600_v48, 0 }
0x125f   :  { %5557 = vmatpush3.bf16.xpose.msra.mxu1 %v2527_v51 }
0x1260   :  { %5568 = vmatprep.subr.bf16.mxu1 %v6233_v34 }
0x1262   :  { %5553 = vmatmul.mubr.msk.bf16.vlgmr.msra.gmra.mxu0 %vm677_vm1, %v6607_v53 }
0x1263   :  { %5563 = vmatpush3.bf16.msra.mxu0 %v2597_v61  ;;  %5564 = vmatprep.mubr.msk.bf16.mxu0 %vm6234_vm9, %v6233_v34 }
0x1264   :  { %5574 = vmatprep.subr.bf16.mxu0 %v6233_v34 }
0x1266   :  { %5559 = vmatmul.mubr.msk.bf16.vlgmr.msra.gmra.mxu1 %vm677_vm1, %v6618_v62 }
0x1267   :  { %5569 = vmatpush3.bf16.msra.mxu1 %v2643_v63  ;;  %5570 = vmatprep.mubr.msk.bf16.mxu1 %vm6234_vm9, %v6233_v34 }
0x1268   :  { %5580 = vmatprep.subr.bf16.mxu1 %v6233_v34 }
0x1322   :  { %v2517_v1 = vpop.f32.mrf.mxu0 }
0x1323   :  { %v2569_v2 = vsel %vm138_vm5, %v2517_v1, -inf }
0x1324   :  { %2570 = vmax.xlane.f32.xlu1 %v2569_v2  ;;  %v5554_v5 = vpop.f32.mrf.mxu0 }
0x1326   :  { %v2520_v7 = vpop.f32.mrf.mxu0  ;;  %v2563_v8 = vpop.f32.mrf.mxu1 }
0x1327   :  { %v2572_v0 = vsel %vm138_vm5, %v2563_v8, -inf }
0x1328   :  { %2573 = vmax.xlane.f32.xlu0 %v2572_v0  ;;  %v5555_v6 = vpop.f32.mrf.mxu0  ;;  %v5560_v29 = vpop.f32.mrf.mxu1 }
0x132a   :  { %v2566_v11 = vpop.f32.mrf.mxu1 }
0x132c   :  { %v5561_v12 = vpop.f32.mrf.mxu1 }
0x1335   :  { %2688 = vrot.lane.b32.xlu1 %v6596_v41, %s6236_s2 }
0x13ad   :  { %v2571_v54 = vpop.xlane.xlu1 %2570 }
0x13ae   :  { %v2575_v13 = vsub.f32 %v2517_v1, %v2571_v54 }
0x13b0   :  { %v2577_v30 = vmul.f32 1.442695, %v2575_v13 }
0x13b1   :  { %v2574_v60 = vpop.xlane.xlu0 %2573  ;;  %v2689_v19 = vpop.permute.xlu1 %2688 }
0x13b2   :  { %6048 = vpow2.f32 %v2577_v30  ;;  %v2576_v14 = vsub.f32 %v2563_v8, %v2574_v60  ;;  %v2694_v47 = vsel %vm677_vm1, %v2689_v19, 0 }
0x13b4   :  { %v2579_v15 = vmul.f32 1.442695, %v2576_v14 }
0x13b6   :  { %6050 = vpow2.f32 %v2579_v15 }
0x13bf   :  { %v6049_v3 = vpop.eup %6048 }
0x13c0   :  { %v2581_v16 = vsel %vm138_vm5, %v6049_v3, 0.0 }
0x13c1   :  { %2582 = vadd.xlane.f32.xlu1 %v2581_v16 }
0x13c3   :  { %v6051_v17 = vpop.eup %6050 }
0x13c4   :  { %v2584_v18 = vsel %vm138_vm5, %v6051_v17, 0.0 }
0x13c5   :  { %2585 = vadd.xlane.f32.xlu0 %v2584_v18 }
0x13d2   :  { %2686 = vrot.lane.b32.xlu1 %v6607_v53, %s6236_s2 }
0x13d6   :  { %2736 = vrot.lane.b32.xlu1 %v6618_v62, %s6236_s2 }
0x13db   :  { %2738 = vrot.lane.b32.xlu0 %v6600_v48, %s6236_s2 }
0x144a   :  { %v2583_v20 = vpop.xlane.xlu1 %2582 }
0x144b   :  { %6052 = vrcp.f32 %v2583_v20  ;;  %v5866_v20 = vld [vmem:[#allocation7 + $0x9c] sm:$0xff]  }
0x144e   :  { %v2586_v21 = vpop.xlane.xlu0 %2585  ;;  %v2687_v33 = vpop.permute.xlu1 %2686 }
0x144f   :  { %6054 = vrcp.f32 %v2586_v21 }
0x1452   :  { %v2739_v27 = vpop.permute.xlu0 %2738  ;;  %v2737_v35 = vpop.permute.xlu1 %2736 }
0x1453   :  { %v2744_v32 = vsel %vm677_vm1, %v2739_v27, 0 }
0x1458   :  { %v6053_v52 = vpop.eup %6052 }
0x1459   :  { %v2589_v10 = vmul.f32 %v6053_v52, %v6049_v3 }
0x145b   :  { %v2591_v22 = vpack.c.bf16 %v2589_v10, %v2589_v10 }
0x145c   :  { %v6055_v23 = vpop.eup %6054 }
0x145d   :  { %5565 = vmatmul.mubr.msk.bf16.vlgmr.msra.gmra.mxu0 %vm138_vm5, %v2591_v22  ;;  %v2590_v25 = vmul.f32 %v6055_v23, %v6051_v17  ;;  %v5864_v22 = vld [vmem:[#allocation7 + $0x8c] sm:$0xff]  }
0x145e   :  { %5575 = vmatpush3.bf16.xpose.msra.mxu0 %v2694_v47  ;;  %5576 = vmatprep.mubr.msk.bf16.mxu0 %vm6234_vm9, %v6233_v34 }
0x145f   :  { %v2592_v59 = vpack.c.bf16 %v2590_v25, %v2590_v25  ;;  %5586 = vmatprep.subr.bf16.mxu0 %v6233_v34  ;;  %v5865_v25 = vld [vmem:[#allocation7 + $0x84] sm:$0xff]  }
0x1461   :  { %5571 = vmatmul.mubr.msk.bf16.vlgmr.msra.gmra.mxu1 %vm138_vm5, %v2592_v59 }
0x1462   :  { %5581 = vmatpush3.bf16.xpose.msra.mxu1 %v2744_v32  ;;  %5582 = vmatprep.mubr.msk.bf16.mxu1 %vm6234_vm9, %v6233_v34 }
0x1463   :  { %5592 = vmatprep.subr.bf16.mxu1 %v6233_v34 }
0x1465   :  { %5577 = vmatmul.mubr.msk.bf16.vlgmr.msra.gmra.mxu0 %vm677_vm1, %v2687_v33  ;;  %v5867_v33 = vld [vmem:[#allocation7 + $0x94] sm:$0xff]  }
0x1466   :  { %5588 = vmatprep.mubr.msk.bf16.mxu0 %vm6234_vm9, %v6233_v34 }
0x1469   :  { %5583 = vmatmul.mubr.msk.bf16.vlgmr.msra.gmra.mxu1 %vm677_vm1, %v2737_v35 }
0x146a   :  { %5594 = vmatprep.mubr.msk.bf16.mxu1 %vm6234_vm9, %v6233_v34 }
0x151d   :  { %v6656_v37 = vpop.f32.mrf.mxu0 }
0x151f   :  { %v5566_v55 = vpop.f32.mrf.mxu0 }
0x1521   :  { %v2636_v38 = vpop.f32.mrf.mxu0  ;;  %v6658_v39 = vpop.f32.mrf.mxu1 }
0x1522   :  { %v2685_v40 = vpack.c.bf16 %v6658_v39, %v6656_v37 }
0x1523   :  { %v5567_v42 = vpop.f32.mrf.mxu0  ;;  %v5572_v26 = vpop.f32.mrf.mxu1 }
0x1525   :  { %v2682_v43 = vpop.f32.mrf.mxu1  ;;  %v2730_v44 = vpop.f32.mrf.mxu0 }
0x1526   :  { %v2786_v45 = vsel %vm138_vm5, %v2730_v44, -inf }
0x1527   :  { %v5573_v46 = vpop.f32.mrf.mxu1  ;;  %2787 = vmax.xlane.f32.xlu0 %v2786_v45  ;;  %v5578_v50 = vpop.f32.mrf.mxu0 }
0x1529   :  { %v2733_v51 = vpop.f32.mrf.mxu0  ;;  %v2780_v56 = vpop.f32.mrf.mxu1 }
0x152a   :  { %v2789_v61 = vsel %vm138_vm5, %v2780_v56, -inf }
0x152b   :  { %2790 = vmax.xlane.f32.xlu1 %v2789_v61  ;;  %v5579_v63 = vpop.f32.mrf.mxu0  ;;  %v5584_v1 = vpop.f32.mrf.mxu1 }
0x152d   :  { %v2783_v2 = vpop.f32.mrf.mxu1 }
0x152f   :  { %v5585_v5 = vpop.f32.mrf.mxu1 }
0x153c   :  { %2810 = vrot.lane.b32.xlu1 %v6603_v49, %s6236_s2 }
0x1540   :  { %3021 = vrot.lane.b32.xlu1 %v6596_v41, %s6226_s3 }
0x1544   :  { %3071 = vrot.lane.b32.xlu1 %v6600_v48, %s6226_s3 }
0x1548   :  { %3069 = vrot.lane.b32.xlu1 %v6618_v62, %s6226_s3 }
0x15b0   :  { %v2788_v7 = vpop.xlane.xlu0 %2787 }
0x15b1   :  { %v2792_v8 = vsub.f32 %v2730_v44, %v2788_v7 }
0x15b3   :  { %v2794_v0 = vmul.f32 1.442695, %v2792_v8 }
0x15b4   :  { %v2791_v6 = vpop.xlane.xlu1 %2790 }
0x15b5   :  { %6056 = vpow2.f32 %v2794_v0  ;;  %v2793_v29 = vsub.f32 %v2780_v56, %v2791_v6 }
0x15b7   :  { %v2796_v11 = vmul.f32 1.442695, %v2793_v29 }
0x15b8   :  { %v2811_v12 = vpop.permute.xlu1 %2810 }
0x15b9   :  { %6058 = vpow2.f32 %v2796_v11  ;;  %v2816_v54 = vsel %vm797_vm2, %v2811_v12, 0 }
0x15ba   :  { %5587 = vmatpush3.bf16.msra.mxu0 %v2816_v54 }
0x15bb   :  { %5598 = vmatprep.subr.bf16.mxu0 %v6233_v34 }
0x15bc   :  { %v3022_v47 = vpop.permute.xlu1 %3021 }
0x15bd   :  { %v3027_v26 = vsel %vm677_vm1, %v3022_v47, 0 }
0x15c0   :  { %v3072_v27 = vpop.permute.xlu1 %3071 }
0x15c1   :  { %v3077_v59 = vsel %vm677_vm1, %v3072_v27, 0 }
0x15c2   :  { %v6057_v13 = vpop.eup %6056 }
0x15c3   :  { %v2798_v30 = vsel %vm138_vm5, %v6057_v13, 0.0 }
0x15c4   :  { %2799 = vadd.xlane.f32.xlu0 %v2798_v30  ;;  %v3070_v32 = vpop.permute.xlu1 %3069 }
0x15c6   :  { %v6059_v60 = vpop.eup %6058 }
0x15c7   :  { %v2801_v14 = vsel %vm138_vm5, %v6059_v60, 0.0 }
0x15c8   :  { %2802 = vadd.xlane.f32.xlu0 %v2801_v14 }
0x15de   :  { %2858 = vrot.lane.b32.xlu0 %v6610_v58, %s6236_s2 }
0x15e2   :  { %3019 = vrot.lane.b32.xlu0 %v6607_v53, %s6226_s3 }
0x164d   :  { %v2800_v15 = vpop.xlane.xlu0 %2799 }
0x164e   :  { %6060 = vrcp.f32 %v2800_v15 }
0x1651   :  { %v2803_v3 = vpop.xlane.xlu0 %2802 }
0x1652   :  { %6062 = vrcp.f32 %v2803_v3 }
0x1655   :  { %v2859_v16 = vpop.permute.xlu0 %2858 }
0x1656   :  { %v2864_v17 = vsel %vm797_vm2, %v2859_v16, 0 }
0x1657   :  { %5593 = vmatpush3.bf16.msra.mxu1 %v2864_v17 }
0x1658   :  { %5606 = vmatprep.subr.bf16.mxu1 %v6233_v34 }
0x1659   :  { %v3020_v46 = vpop.permute.xlu0 %3019 }
0x165b   :  { %v6061_v18 = vpop.eup %6060 }
0x165c   :  { %v2806_v19 = vmul.f32 %v6061_v18, %v6057_v13 }
0x165e   :  { %v2808_v21 = vpack.c.bf16 %v2806_v19, %v2806_v19 }
0x165f   :  { %v6063_v52 = vpop.eup %6062 }
0x1660   :  { %5589 = vmatmul.mubr.msk.bf16.vlgmr.msra.gmra.mxu0 %vm138_vm5, %v2808_v21  ;;  %v2807_v10 = vmul.f32 %v6063_v52, %v6059_v60 }
0x1661   :  { %5599 = vmatpush3.bf16.msra.mxu0 %v5866_v20  ;;  %5602 = vmatprep.mubr.msk.bf16.mxu0 %vm6234_vm9, %v6233_v34 }
0x1662   :  { %v2809_v23 = vpack.c.bf16 %v2807_v10, %v2807_v10  ;;  %5600 = vmatprep.subr.bf16.mxu0 %v6233_v34 }
0x1664   :  { %5595 = vmatmul.mubr.msk.bf16.vlgmr.msra.gmra.mxu1 %vm138_vm5, %v2809_v23 }
0x1665   :  { %5607 = vmatpush3.bf16.msra.mxu1 %v5864_v22  ;;  %5610 = vmatprep.mubr.msk.bf16.mxu1 %vm6234_vm9, %v6233_v34 }
0x1666   :  { %5608 = vmatprep.subr.bf16.mxu1 %v6233_v34  ;;  %5601 = vmatpush3.bf16.msra.mxu0 %v5867_v33 }
0x1667   :  { %5614 = vmatprep.subr.bf16.mxu0 %v6233_v34 }
0x1669   :  { %5609 = vmatpush3.bf16.msra.mxu1 %v5865_v25 }
0x166a   :  { %5620 = vmatprep.subr.bf16.mxu1 %v6233_v34 }
0x166c   :  { %5611 = vmatmul.mubr.msk.bf16.vlgmr.msra.gmra.mxu1 %vm677_vm1, %v2685_v40 }
0x166d   :  { %5621 = vmatpush3.bf16.xpose.msra.mxu1 %v3077_v59  ;;  %5622 = vmatprep.mubr.msk.bf16.mxu1 %vm6234_vm9, %v6233_v34 }
0x166e   :  { %5632 = vmatprep.subr.bf16.mxu1 %v6233_v34 }
0x1674   :  { %5623 = vmatmul.mubr.msk.bf16.vlgmr.msra.gmra.mxu1 %vm677_vm1, %v3070_v32 }
0x1675   :  { %5634 = vmatprep.mubr.msk.bf16.mxu1 %vm6234_vm9, %v6233_v34 }
0x1720   :  { %v2852_v35 = vpop.f32.mrf.mxu0 }
0x1722   :  { %v5590_v37 = vpop.f32.mrf.mxu0 }
0x1723   :  { %v5869_v37 = vld [vmem:[#allocation7 + $0xa4] sm:$0xff]  }
0x1724   :  { %v2855_v55 = vpop.f32.mrf.mxu0  ;;  %v2900_v38 = vpop.f32.mrf.mxu1 }
0x1725   :  { %v2906_v39 = vpack.c.bf16 %v2900_v38, %v2852_v35  ;;  %v5868_v35 = vld [vmem:[#allocation7 + $0xac] sm:$0xff]  }
0x1726   :  { %v5591_v40 = vpop.f32.mrf.mxu0  ;;  %v5596_v42 = vpop.f32.mrf.mxu1 }
0x1727   :  { %5603 = vmatmul.mubr.msk.bf16.vlgmr.msra.gmra.mxu0 %vm677_vm1, %v2906_v39 }
0x1728   :  { %5615 = vmatpush3.bf16.xpose.msra.mxu0 %v3027_v26  ;;  %v2903_v43 = vpop.f32.mrf.mxu1  ;;  %5616 = vmatprep.mubr.msk.bf16.mxu0 %vm6234_vm9, %v6233_v34 }
0x1729   :  { %5626 = vmatprep.subr.bf16.mxu0 %v6233_v34 }
0x172a   :  { %v5597_v44 = vpop.f32.mrf.mxu1 }
0x172c   :  { %v6708_v45 = vpop.f32.mrf.mxu1 }
0x172e   :  { %v5612_v50 = vpop.f32.mrf.mxu1 }
0x172f   :  { %5617 = vmatmul.mubr.msk.bf16.vlgmr.msra.gmra.mxu0 %vm677_vm1, %v3020_v46 }
0x1730   :  { %v6711_v51 = vpop.f32.mrf.mxu1  ;;  %5628 = vmatprep.mubr.msk.bf16.mxu0 %vm6234_vm9, %v6233_v34 }
0x1732   :  { %v5613_v56 = vpop.f32.mrf.mxu1 }
0x1734   :  { %v3113_v61 = vpop.f32.mrf.mxu1 }
0x1735   :  { %v3122_v63 = vsel %vm138_vm5, %v3113_v61, -inf }
0x1736   :  { %3123 = vmax.xlane.f32.xlu1 %v3122_v63  ;;  %v5624_v1 = vpop.f32.mrf.mxu1 }
0x1738   :  { %v3116_v2 = vpop.f32.mrf.mxu1 }
0x173a   :  { %v5625_v5 = vpop.f32.mrf.mxu1 }
0x1747   :  { %3143 = vrot.lane.b32.xlu1 %v6603_v49, %s6226_s3 }
0x174b   :  { %3300 = vrot.lane.b32.xlu1 %v6596_v41, %s6230_s20 }
0x174f   :  { %3350 = vrot.lane.b32.xlu1 %v6600_v48, %s6230_s20 }
0x1753   :  { %3348 = vrot.lane.b32.xlu1 %v6618_v62, %s6230_s20 }
0x17bf   :  { %v3124_v7 = vpop.xlane.xlu1 %3123 }
0x17c0   :  { %v3126_v6 = vsub.f32 %v3113_v61, %v3124_v7 }
0x17c2   :  { %v3129_v29 = vmul.f32 1.442695, %v3126_v6 }
0x17c3   :  { %v3144_v8 = vpop.permute.xlu1 %3143 }
0x17c4   :  { %v3149_v0 = vsel %vm797_vm2, %v3144_v8, 0  ;;  %6064 = vpow2.f32 %v3129_v29 }
0x17c5   :  { %5627 = vmatpush3.bf16.msra.mxu0 %v3149_v0 }
0x17c6   :  { %5638 = vmatprep.subr.bf16.mxu0 %v6233_v34 }
0x17c7   :  { %v3301_v47 = vpop.permute.xlu1 %3300 }
0x17c8   :  { %v3306_v27 = vsel %vm677_vm1, %v3301_v47, 0  ;;  %v5870_v47 = vld [vmem:[#allocation7 + $0xbc] sm:$0xff]  }
0x17cb   :  { %v3351_v26 = vpop.permute.xlu1 %3350 }
0x17cc   :  { %v3356_v63 = vsel %vm677_vm1, %v3351_v26, 0 }
0x17cf   :  { %v3349_v7 = vpop.permute.xlu1 %3348 }
0x17d1   :  { %v6065_v62 = vpop.eup %6064 }
0x17d2   :  { %v3134_v14 = vsel %vm138_vm5, %v6065_v62, 0.0 }
0x17e7   :  { %v6726_v11 = vpop.f32.mrf.mxu0 }
0x17e9   :  { %v5604_v12 = vpop.f32.mrf.mxu0 }
0x17eb   :  { %v6728_v41 = vpop.f32.mrf.mxu0 }
0x17ed   :  { %v5605_v54 = vpop.f32.mrf.mxu0 }
0x17ee   :  { %v3013_v54 = vadd.f32 %v6708_v45, %v6726_v11 }
0x17ef   :  { %v3063_v48 = vpop.f32.mrf.mxu0 }
0x17f0   :  { %v3119_v13 = vsel %vm138_vm5, %v3063_v48, -inf }
0x17f1   :  { %3120 = vmax.xlane.f32.xlu0 %v3119_v13  ;;  %v5618_v30 = vpop.f32.mrf.mxu0 }
0x17f2   :  { %v3016_v30 = vadd.f32 %v6711_v51, %v6728_v41 }
0x17f3   :  { %v3066_v60 = vpop.f32.mrf.mxu0 }
0x17f5   :  { %3135 = vadd.xlane.f32.xlu0 %v3134_v14  ;;  %v5619_v15 = vpop.f32.mrf.mxu0 }
0x187a   :  { %v3121_v3 = vpop.xlane.xlu0 %3120 }
0x187b   :  { %v3125_v16 = vsub.f32 %v3063_v48, %v3121_v3 }
0x187d   :  { %v3127_v17 = vmul.f32 1.442695, %v3125_v16 }
0x187e   :  { %v3136_v20 = vpop.xlane.xlu0 %3135 }
0x187f   :  { %6066 = vpow2.f32 %v3127_v17 }
0x1880   :  { %6068 = vrcp.f32 %v3136_v20 }
0x188c   :  { %v6067_v18 = vpop.eup %6066 }
0x188d   :  { %v3131_v19 = vsel %vm138_vm5, %v6067_v18, 0.0  ;;  %v6069_v21 = vpop.eup %6068 }
0x188e   :  { %3132 = vadd.xlane.f32.xlu0 %v3131_v19  ;;  %v3140_v10 = vmul.f32 %v6069_v21, %v6065_v62 }
0x1890   :  { %v3142_v25 = vpack.c.bf16 %v3140_v10, %v3140_v10 }
0x18a4   :  { %3191 = vrot.lane.b32.xlu0 %v6610_v58, %s6226_s3 }
0x18a8   :  { %3298 = vrot.lane.b32.xlu0 %v6607_v53, %s6230_s20 }
0x1917   :  { %v3133_v52 = vpop.xlane.xlu0 %3132 }
0x1918   :  { %6070 = vrcp.f32 %v3133_v52 }
0x191b   :  { %v3192_v22 = vpop.permute.xlu0 %3191 }
0x191c   :  { %v3197_v23 = vsel %vm797_vm2, %v3192_v22, 0 }
0x191d   :  { %5633 = vmatpush3.bf16.msra.mxu1 %v3197_v23 }
0x191e   :  { %5646 = vmatprep.subr.bf16.mxu1 %v6233_v34 }
0x191f   :  { %v3299_v32 = vpop.permute.xlu0 %3298 }
0x1920   :  { %5635 = vmatmul.mubr.msk.bf16.vlgmr.msra.gmra.mxu1 %vm138_vm5, %v3142_v25 }
0x1921   :  { %5647 = vmatpush3.bf16.xpose.msra.mxu1 %v3306_v27  ;;  %5648 = vmatprep.mubr.msk.bf16.mxu1 %vm6234_vm9, %v6233_v34 }
0x1922   :  { %5658 = vmatprep.subr.bf16.mxu1 %v6233_v34 }
0x1925   :  { %v6071_v53 = vpop.eup %6070 }
0x1926   :  { %v3139_v59 = vmul.f32 %v6071_v53, %v6067_v18 }
0x1928   :  { %5649 = vmatmul.mubr.msk.bf16.vlgmr.msra.gmra.mxu1 %vm677_vm1, %v3299_v32  ;;  %v3141_v33 = vpack.c.bf16 %v3139_v59, %v3139_v59 }
0x1929   :  { %5660 = vmatprep.mubr.msk.bf16.mxu1 %vm6234_vm9, %v6233_v34 }
0x192a   :  { %5629 = vmatmul.mubr.msk.bf16.vlgmr.msra.gmra.mxu0 %vm138_vm5, %v3141_v33 }
0x192b   :  { %5642 = vmatprep.mubr.msk.bf16.mxu0 %vm6234_vm9, %v6233_v34  ;;  %5639 = vmatpush3.bf16.msra.mxu0 %v5868_v35 }
0x192c   :  { %5640 = vmatprep.subr.bf16.mxu0 %v6233_v34 }
0x192f   :  { %5641 = vmatpush3.bf16.msra.mxu0 %v5869_v37 }
0x1930   :  { %5652 = vmatprep.subr.bf16.mxu0 %v6233_v34 }
0x19e0   :  { %v3233_v55 = vpop.f32.mrf.mxu1 }
0x19e2   :  { %v5636_v38 = vpop.f32.mrf.mxu1 }
0x19e3   :  { %v5871_v38 = vld [vmem:[#allocation7 + $0xb4] sm:$0xff]  }
0x19e4   :  { %v3236_v39 = vpop.f32.mrf.mxu1 }
0x19e6   :  { %v5637_v40 = vpop.f32.mrf.mxu1 }
0x19e8   :  { %v3342_v42 = vpop.f32.mrf.mxu1 }
0x19e9   :  { %v3398_v43 = vsel %vm138_vm5, %v3342_v42, -inf }
0x19ea   :  { %3399 = vmax.xlane.f32.xlu0 %v3398_v43  ;;  %v3185_v44 = vpop.f32.mrf.mxu0  ;;  %v5650_v46 = vpop.f32.mrf.mxu1 }
0x19eb   :  { %v3239_v50 = vpack.c.bf16 %v3233_v55, %v3185_v44  ;;  %v3577_v46 = vld [vmem:[#allocation10 + $0x21] ss:$0 sm:$0xff] }
0x19ec   :  { %v5630_v56 = vpop.f32.mrf.mxu0  ;;  %v3345_v61 = vpop.f32.mrf.mxu1 }
0x19ed   :  { %5643 = vmatmul.mubr.msk.bf16.vlgmr.msra.gmra.mxu0 %vm677_vm1, %v3239_v50 }
0x19ee   :  { %5653 = vmatpush3.bf16.xpose.msra.mxu0 %v3356_v63  ;;  %v3188_v1 = vpop.f32.mrf.mxu0  ;;  %v5651_v2 = vpop.f32.mrf.mxu1  ;;  %5654 = vmatprep.mubr.msk.bf16.mxu0 %vm6234_vm9, %v6233_v34 }
0x19ef   :  { %5664 = vmatprep.subr.bf16.mxu0 %v6233_v34 }
0x19f0   :  { %v5631_v5 = vpop.f32.mrf.mxu0 }
0x19f5   :  { %5655 = vmatmul.mubr.msk.bf16.vlgmr.msra.gmra.mxu0 %vm677_vm1, %v3349_v7 }
0x19f6   :  { %5666 = vmatprep.mubr.msk.bf16.mxu0 %vm6234_vm9, %v6233_v34 }
0x1a73   :  { %v3400_v8 = vpop.xlane.xlu0 %3399 }
0x1a74   :  { %v3404_v0 = vsub.f32 %v3342_v42, %v3400_v8 }
0x1a76   :  { %v3406_v6 = vmul.f32 1.442695, %v3404_v0 }
0x1a78   :  { %6072 = vpow2.f32 %v3406_v6 }
0x1a85   :  { %v6073_v29 = vpop.eup %6072 }
0x1a86   :  { %v3410_v12 = vsel %vm138_vm5, %v6073_v29, 0.0 }
0x1a87   :  { %3411 = vadd.xlane.f32.xlu0 %v3410_v12  ;;  %v5877_v12 = vld [vmem:[#allocation8 + $0xcc] ss:$16 sps:$4 sm:$0xff]  }
0x1aad   :  { %v3289_v48 = vpop.f32.mrf.mxu0 }
0x1aae   :  { %v3296_v13 = vadd.f32 %v3289_v48, %v3013_v54  ;;  %v5875_v54 = vld [vmem:[#allocation8 + $0xc8] ss:$16 sps:$4 sm:$0xff]   ;;  %v5880_v48 = vld [vmem:[#allocation8 + $0xac] ss:$16 sps:$4 sm:$0xff]  }
0x1aaf   :  { %v5644_v62 = vpop.f32.mrf.mxu0 }
0x1ab0   :  { %v5883_v62 = vld [vmem:[#allocation8 + $0x8c] ss:$16 sps:$4 sm:$0xff]  }
0x1ab1   :  { %v3292_v60 = vpop.f32.mrf.mxu0 }
0x1ab2   :  { %v3297_v14 = vadd.f32 %v3292_v60, %v3016_v30  ;;  %v5886_v30 = vld [vmem:[#allocation8 + $0x6c] ss:$16 sps:$4 sm:$0xff]   ;;  %v5884_v60 = vld [vmem:[#allocation8 + $0x68] ss:$16 sps:$4 sm:$0xff]  }
0x1ab3   :  { %v5645_v15 = vpop.f32.mrf.mxu0 }
0x1ab4   :  { %v5887_v15 = vld [vmem:[#allocation8 + $0x48] ss:$16 sps:$4 sm:$0xff]  }
0x1ab5   :  { %v3392_v3 = vpop.f32.mrf.mxu0 }
0x1ab6   :  { %v3401_v16 = vsel %vm138_vm5, %v3392_v3, -inf }
0x1ab7   :  { %3402 = vmax.xlane.f32.xlu1 %v3401_v16  ;;  %v5656_v17 = vpop.f32.mrf.mxu0  ;;  %v5890_v16 = vld [vmem:[#allocation8 + $0x28] ss:$16 sps:$4 sm:$0xff]  }
0x1ab8   :  { %v5895_v17 = vld [vmem:[#allocation8 + $0xc] ss:$16 sps:$4 sm:$0xff]  }
0x1ab9   :  { %v3395_v18 = vpop.f32.mrf.mxu0 }
0x1aba   :  { %v5893_v18 = vld [vmem:[#allocation8 + $0x8] ss:$16 sps:$4 sm:$0xff]  }
0x1abb   :  { %v5657_v19 = vpop.f32.mrf.mxu0 }
0x1abc   :  { %v5896_v19 = vld [vmem:[#allocation7 + $0x1bc] sm:$0xff]  }
0x1ac8   :  { %3422 = vrot.lane.b32.xlu1 %v6603_v49, %s6230_s20 }
0x1b10   :  { %v3412_v45 = vpop.xlane.xlu0 %3411 }
0x1b11   :  { %6074 = vrcp.f32 %v3412_v45  ;;  %v5897_v45 = vld [vmem:[#allocation7 + $0x17c] sm:$0xff]  }
0x1b1e   :  { %v6075_v11 = vpop.eup %6074 }
0x1b1f   :  { %v3418_v51 = vmul.f32 %v6075_v11, %v6073_v29  ;;  %v5874_v29 = vld [vmem:[#allocation8 + $0xec] ss:$16 sps:$4 sm:$0xff]   ;;  %v5898_v11 = vld [vmem:[#allocation7 + $0x1b4] sm:$0xff]  }
0x1b21   :  { %v3420_v22 = vpack.c.bf16 %v3418_v51, %v3418_v51  ;;  %v5902_v51 = vld [vmem:[#allocation7 + $0x1a4] sm:$0xff]  }
0x1b40   :  { %v3403_v20 = vpop.xlane.xlu1 %3402 }
0x1b41   :  { %v3405_v21 = vsub.f32 %v3392_v3, %v3403_v20  ;;  %v5892_v3 = vld [vmem:[#allocation8 + $0x2c] ss:$16 sps:$4 sm:$0xff]   ;;  %v5899_v20 = vld [vmem:[#allocation7 + $0x174] sm:$0xff]  }
0x1b43   :  { %v3408_v52 = vmul.f32 1.442695, %v3405_v21  ;;  %v5900_v21 = vld [vmem:[#allocation7 + $0x1ac] sm:$0xff]  }
0x1b44   :  { %v3423_v41 = vpop.permute.xlu1 %3422 }
0x1b45   :  { %6076 = vpow2.f32 %v3408_v52  ;;  %v3428_v10 = vsel %vm797_vm2, %v3423_v41, 0  ;;  %v5901_v52 = vld [vmem:[#allocation7 + $0x16c] sm:$0xff]   ;;  %v5903_v41 = vld [vmem:[#allocation7 + $0x164] sm:$0xff]  }
0x1b46   :  { %5659 = vmatpush3.bf16.msra.mxu1 %v3428_v10  ;;  %v5904_v10 = vld [vmem:[#allocation7 + $0x19c] sm:$0xff]  }
0x1b47   :  { %5670 = vmatprep.subr.bf16.mxu1 %v6233_v34 }
0x1b49   :  { %5661 = vmatmul.mubr.msk.bf16.vlgmr.msra.gmra.mxu1 %vm138_vm5, %v3420_v22  ;;  %v5905_v22 = vld [vmem:[#allocation7 + $0x15c] sm:$0xff]  }
0x1b4a   :  { %5674 = vmatprep.mubr.msk.bf16.mxu1 %vm6234_vm9, %v6233_v34  ;;  %5671 = vmatpush3.bf16.msra.mxu1 %v5870_v47 }
0x1b4b   :  { %5672 = vmatprep.subr.bf16.mxu1 %v6233_v34 }
0x1b4e   :  { %5673 = vmatpush3.bf16.msra.mxu1 %v5871_v38 }
0x1b4f   :  { %5278 = vmatprep.subr.bf16.mxu1 %v5896_v19 }
0x1b52   :  { %v6077_v49 = vpop.eup %6076 }
0x1b53   :  { %v3413_v23 = vsel %vm138_vm5, %v6077_v49, 0.0 }
0x1b54   :  { %3414 = vadd.xlane.f32.xlu0 %v3413_v23 }
0x1b6a   :  { %3470 = vrot.lane.b32.xlu0 %v6610_v58, %s6230_s20 }
0x1bdd   :  { %v3415_v25 = vpop.xlane.xlu0 %3414 }
0x1bde   :  { %6078 = vrcp.f32 %v3415_v25 }
0x1be1   :  { %v3471_v27 = vpop.permute.xlu0 %3470 }
0x1be2   :  { %v3476_v53 = vsel %vm797_vm2, %v3471_v27, 0 }
0x1be3   :  { %5665 = vmatpush3.bf16.msra.mxu0 %v3476_v53 }
0x1be4   :  { %3708 = vmatprep.subr.bf16.mxu0 %v5874_v29  ;;  %v5909_v29 = vld [vmem:[#allocation7 + $0x14c] sm:$0xff]  }
0x1beb   :  { %v6079_v59 = vpop.eup %6078 }
0x1bec   :  { %v3419_v32 = vmul.f32 %v6079_v59, %v6077_v49 }
0x1bee   :  { %v3421_v33 = vpack.c.bf16 %v3419_v32, %v3419_v32 }
0x1bf0   :  { %5667 = vmatmul.mubr.msk.bf16.vlgmr.msra.gmra.mxu0 %vm138_vm5, %v3421_v33 }
0x1bf1   :  { %3740 = vmatprep.mubr.bf16.mxu0 %v6232_v28 }
0x1c09   :  { %v3464_v35 = vpop.f32.mrf.mxu1 }
0x1c0b   :  { %v5662_v37 = vpop.f32.mrf.mxu1 }
0x1c0d   :  { %v3467_v58 = vpop.f32.mrf.mxu1 }
0x1c0f   :  { %v5663_v55 = vpop.f32.mrf.mxu1 }
0x1cb0   :  { %v3512_v39 = vpop.f32.mrf.mxu0 }
0x1cb1   :  { %v3518_v40 = vpack.c.bf16 %v3512_v39, %v3464_v35  ;;  %v3582_v39 = vld [vmem:[#allocation10 + $0x22] ss:$0 sm:$0xff] }
0x1cb2   :  { %v5668_v42 = vpop.f32.mrf.mxu0 }
0x1cb3   :  { %5675 = vmatmul.mubr.msk.bf16.vlgmr.msra.gmra.mxu1 %vm677_vm1, %v3518_v40 }
0x1cb4   :  { %v3515_v26 = vpop.f32.mrf.mxu0  ;;  %5279 = vmatpush3.bf16.msra.mxu1 %v5897_v45 }
0x1cb5   :  { %5280 = vmatprep.subr.bf16.mxu1 %v5898_v11 }
0x1cb6   :  { %v5669_v43 = vpop.f32.mrf.mxu0 }
0x1cb8   :  { %5281 = vmatpush3.bf16.msra.mxu1 %v5899_v20  ;;  %v3757_v20 = vld [vmem:[#allocation10 + $0x25] ss:$0 sm:$0xff] }
0x1cb9   :  { %5282 = vmatprep.subr.bf16.mxu1 %v5900_v21 }
0x1cbc   :  { %5283 = vmatpush3.bf16.msra.mxu1 %v5901_v52 }
0x1cbd   :  { %5284 = vmatprep.subr.bf16.mxu1 %v5902_v51 }
0x1cc0   :  { %5285 = vmatpush3.bf16.msra.mxu1 %v5903_v41 }
0x1cc1   :  { %5286 = vmatprep.subr.bf16.mxu1 %v5904_v10 }
0x1cc4   :  { %5287 = vmatpush3.bf16.msra.mxu1 %v5905_v22 }
0x1d73   :  { %v3568_v44 = vpop.f32.mrf.mxu1 }
0x1d74   :  { %v3575_v50 = vadd.f32 %v3568_v44, %v3296_v13  ;;  %v5878_v13 = vld [vmem:[#allocation8 + $0xa8] ss:$16 sps:$4 sm:$0xff]  }
0x1d75   :  { %v5676_v56 = vpop.f32.mrf.mxu1 }
0x1d76   :  { %v3578_v61 = vadd.f32 %v3577_v46, %v3575_v50  ;;  %v3583_v56 = vld [vmem:[#allocation10 + $0x23] ss:$0 sm:$0xff] }
0x1d77   :  { %v3571_v63 = vpop.f32.mrf.mxu1 }
0x1d78   :  { %v3576_v1 = vadd.f32 %v3571_v63, %v3297_v14  ;;  %v6783_v2 = vadd.f32 %v3578_v61, %v6583_v24  ;;  %v5872_v24 = vld [vmem:[#allocation8 + $0xe8] ss:$16 sps:$4 sm:$0xff]   ;;  %v5889_v14 = vld [vmem:[#allocation8 + $0x4c] ss:$16 sps:$4 sm:$0xff]  }
0x1d79   :  { %v5677_v5 = vpop.f32.mrf.mxu1  ;;  %3709 = vmatpush1.bf16.msra.mxu0 %v5872_v24  ;;  %v3616_v24 = vld [vmem:[#allocation10 + $0x24] ss:$8 sm:$0x3] }
0x1d7a   :  { %v3579_v7 = vadd.f32 %v3577_v46, %v3576_v1  ;;  %3584 = vadd.xlane.f32.xlu1 %v6783_v2  ;;  %v3590_v8 = vmul.f32 %v6783_v2, %v6783_v2  ;;  %3710 = vmatprep.subr.bf16.mxu0 %v5877_v12 }
0x1d7c   :  { %v6789_v0 = vadd.f32 %v3579_v7, %v6585_v57  ;;  %v5881_v57 = vld [vmem:[#allocation8 + $0x88] ss:$16 sps:$4 sm:$0xff]   ;;  %v5906_v7 = vld [vmem:[#allocation7 + $0x194] sm:$0xff]  }
0x1d7d   :  { %3711 = vmatpush1.bf16.msra.mxu0 %v5875_v54  ;;  %5288 = vmatprep.subr.bf16.mxu1 %v5906_v7  ;;  %v3625_v54 = vrot.slane %v3616_v24, %v6312_v31 }
0x1d7e   :  { %3592 = vadd.xlane.f32.xlu1 %v3590_v8  ;;  %3586 = vadd.xlane.f32.xlu0 %v6789_v0  ;;  %v3591_v6 = vmul.f32 %v6789_v0, %v6789_v0  ;;  %v5907_v8 = vld [vmem:[#allocation7 + $0x154] sm:$0xff]  }
0x1d7f   :  { %3712 = vmatprep.subr.bf16.mxu0 %v5880_v48  ;;  %5289 = vmatpush3.bf16.msra.mxu1 %v5907_v8  ;;  %v3621_v48 = vrot.slane %v3616_v24, %v6293_v9 }
0x1d81   :  { %3713 = vmatpush1.bf16.msra.mxu0 %v5878_v13 }
0x1d82   :  { %3594 = vadd.xlane.f32.xlu0 %v3591_v6  ;;  %3714 = vmatprep.subr.bf16.mxu0 %v5883_v62  ;;  %v5908_v6 = vld [vmem:[#allocation7 + $0x18c] sm:$0xff]  }
0x1d83   :  { %5290 = vmatprep.subr.bf16.mxu1 %v5908_v6 }
0x1d84   :  { %5291 = vmatpush3.bf16.msra.mxu1 %v5909_v29 }
0x1d85   :  { %3715 = vmatpush1.bf16.msra.mxu0 %v5881_v57 }
0x1d86   :  { %3716 = vmatprep.subr.bf16.mxu0 %v5886_v30 }
0x1d89   :  { %3717 = vmatpush1.bf16.msra.mxu0 %v5884_v60 }
0x1d8a   :  { %3718 = vmatprep.subr.bf16.mxu0 %v5889_v14 }
0x1d8d   :  { %3719 = vmatpush1.bf16.msra.mxu0 %v5887_v15 }
0x1d8e   :  { %3720 = vmatprep.subr.bf16.mxu0 %v5892_v3 }
0x1d91   :  { %3721 = vmatpush1.bf16.msra.mxu0 %v5890_v16 }
0x1d92   :  { %3722 = vmatprep.subr.bf16.mxu0 %v5895_v17 }
0x1d95   :  { %3723 = vmatpush1.bf16.msra.mxu0 %v5893_v18 }
0x1e03   :  { %v3585_v49 = vpop.xlane.xlu1 %3584 }
0x1e04   :  { %v3588_v23 = vmul.f32 0.0078125, %v3585_v49 }
0x1e06   :  { %v3598_v27 = vmul.f32 %v3588_v23, %v3588_v23  ;;  %v3602_v26 = vsub.f32 %v6783_v2, %v3588_v23  ;;  %v5910_v2 = vld [vmem:[#allocation7 + $0x184] sm:$0xff]  }
0x1e07   :  { %v3593_v47 = vpop.xlane.xlu1 %3592  ;;  %v3587_v25 = vpop.xlane.xlu0 %3586  ;;  %5292 = vmatprep.subr.bf16.mxu1 %v5910_v2 }
0x1e08   :  { %v3596_v53 = vmul.f32 0.0078125, %v3593_v47  ;;  %v3589_v59 = vmul.f32 0.0078125, %v3587_v25 }
0x1e0a   :  { %v3600_v32 = vsub.f32 %v3596_v53, %v3598_v27  ;;  %v3599_v37 = vmul.f32 %v3589_v59, %v3589_v59  ;;  %v3603_v44 = vsub.f32 %v6789_v0, %v3589_v59  ;;  %v5911_v0 = vld [vmem:[#allocation7 + $0x144] sm:$0xff]  }
0x1e0b   :  { %v3595_v33 = vpop.xlane.xlu0 %3594  ;;  %5293 = vmatpush3.bf16.msra.mxu1 %v5911_v0 }
0x1e0c   :  { %v3604_v35 = vadd.f32 1e-05, %v3600_v32  ;;  %v3597_v58 = vmul.f32 0.0078125, %v3595_v33 }
0x1e0e   :  { %6080 = vrsqrt.f32 %v3604_v35  ;;  %v3601_v55 = vsub.f32 %v3597_v58, %v3599_v37 }
0x1e10   :  { %v3605_v38 = vadd.f32 1e-05, %v3601_v55 }
0x1e12   :  { %6082 = vrsqrt.f32 %v3605_v38 }
0x1e1b   :  { %v6081_v40 = vpop.eup %6080 }
0x1e1c   :  { %v3608_v42 = vmul.f32 %v6081_v40, %v3582_v39 }
0x1e1e   :  { %v3610_v50 = vmul.f32 %v3608_v42, %v3602_v26 }
0x1e1f   :  { %v6083_v43 = vpop.eup %6082 }
0x1e20   :  { %v3609_v46 = vmul.f32 %v6083_v43, %v3582_v39  ;;  %v3612_v63 = vadd.f32 %v3610_v50, %v3583_v56  ;;  %v3897_v43 = vld [vmem:[#allocation10 + $0x26] ss:$0 sm:$0xff] }
0x1e22   :  { %v3611_v61 = vmul.f32 %v3609_v46, %v3603_v44 }
0x1e24   :  { %v3613_v1 = vadd.f32 %v3611_v61, %v3583_v56 }
0x1e26   :  { %v3614_v5 = vpack.c.bf16 %v3613_v1, %v3612_v63 }
0x1e28   :  { %3741 = vmatmul.mubr.bf16.vlgmr.msra.gmra.mxu0 %v3614_v5  ;;  %v3898_v5 = vld [vmem:[#allocation10 + $0x27] ss:$0 sm:$0xff] }
0x1e29   :  { %4324 = vmatprep.mubr.bf16.mxu0 %v6232_v28 }
0x1ee8   :  { %v3742_v12 = vpop.f32.mrf.mxu0 }
0x1ee9   :  { %v3743_v60 = vadd.f32 %v3742_v12, %v3621_v48 }
0x1eea   :  { %v3744_v13 = vpop.f32.mrf.mxu0 }
0x1eeb   :  { %v3745_v62 = vadd.f32 %v3744_v13, %v3625_v54  ;;  %v3751_v18 = vmax.f32 %v3743_v60, 0.0  ;;  %v5915_v60 = vld [vmem:[#allocation8 + $0x1e8] ss:$16 sps:$4 sm:$0xff]  }
0x1eec   :  { %v3746_v57 = vpop.f32.mrf.mxu0 }
0x1eed   :  { %v3747_v30 = vadd.f32 %v3746_v57, %v3621_v48  ;;  %v3752_v16 = vmax.f32 %v3745_v62, 0.0  ;;  %v5914_v57 = vld [vmem:[#allocation8 + $0x1e4] ss:$16 sps:$4 sm:$0xff]   ;;  %v5917_v62 = vld [vmem:[#allocation8 + $0x1ec] ss:$16 sps:$4 sm:$0xff]  }
0x1eee   :  { %v3748_v14 = vpop.f32.mrf.mxu0  ;;  %4292 = vmatprep.subr.bf16.mxu0 %v5914_v57  ;;  %4333 = vmatprep.subr.bf16.mxu1 %v5917_v62 }
0x1eef   :  { %v3749_v15 = vadd.f32 %v3748_v14, %v3625_v54  ;;  %v3753_v3 = vmax.f32 %v3747_v30, 0.0  ;;  %v5912_v30 = vld [vmem:[#allocation8 + $0x1e0] ss:$16 sps:$4 sm:$0xff]   ;;  %v5920_v14 = vld [vmem:[#allocation8 + $0x1c4] ss:$16 sps:$4 sm:$0xff]  }
0x1ef0   :  { %4293 = vmatpush1.bf16.msra.mxu0 %v5912_v30  ;;  %v5962_v30 = vld [vmem:[#allocation7 + $0x1fc] sm:$0xff]  }
0x1ef1   :  { %v3754_v17 = vmax.f32 %v3749_v15, 0.0  ;;  %v3755_v45 = vpack.c.bf16 %v3753_v3, %v3751_v18  ;;  %v5923_v15 = vld [vmem:[#allocation8 + $0x1cc] ss:$16 sps:$4 sm:$0xff]   ;;  %v5918_v3 = vld [vmem:[#allocation8 + $0x1c0] ss:$16 sps:$4 sm:$0xff]   ;;  %4294 = vmatprep.subr.bf16.mxu0 %v5920_v14 }
0x1ef2   :  { %v5929_v18 = vld [vmem:[#allocation8 + $0x1ac] ss:$16 sps:$4 sm:$0xff]  }
0x1ef3   :  { %v3756_v19 = vpack.c.bf16 %v3754_v17, %v3752_v16  ;;  %v5921_v16 = vld [vmem:[#allocation8 + $0x1c8] ss:$16 sps:$4 sm:$0xff]   ;;  %v5926_v17 = vld [vmem:[#allocation8 + $0x1a4] ss:$16 sps:$4 sm:$0xff]  }
0x1ef4   :  { %4295 = vmatpush1.bf16.msra.mxu0 %v5918_v3  ;;  %v5967_v3 = vld [vmem:[#allocation7 + $0x274] sm:$0xff]  }
0x1ef5   :  { %3886 = vmatprep.mubr.bf16.mxu1 %v3756_v19  ;;  %v5924_v19 = vld [vmem:[#allocation8 + $0x1a0] ss:$16 sps:$4 sm:$0xff]   ;;  %4296 = vmatprep.subr.bf16.mxu0 %v5926_v17  ;;  %v5969_v17 = vld [vmem:[#allocation7 + $0x2ac] sm:$0xff]  }
0x1ef6   :  { %3887 = vmatmul.mubr.bf16.vlgmr.msra.gmra.mxu1 %v3755_v45  ;;  %v5927_v45 = vld [vmem:[#allocation8 + $0x1a8] ss:$16 sps:$4 sm:$0xff]  }
0x1ef7   :  { %4365 = vmatprep.mubr.bf16.mxu1 %v6232_v28  ;;  %4334 = vmatpush1.bf16.msra.mxu1 %v5915_v60  ;;  %v5963_v60 = vld [vmem:[#allocation7 + $0x27c] sm:$0xff]  }
0x1ef8   :  { %4335 = vmatprep.subr.bf16.mxu1 %v5923_v15  ;;  %4297 = vmatpush1.bf16.msra.mxu0 %v5924_v19  ;;  %v5965_v15 = vld [vmem:[#allocation7 + $0x2b4] sm:$0xff]   ;;  %v5971_v19 = vld [vmem:[#allocation7 + $0x26c] sm:$0xff]  }
0x1efb   :  { %4336 = vmatpush1.bf16.msra.mxu1 %v5921_v16  ;;  %v5968_v16 = vld [vmem:[#allocation7 + $0x22c] sm:$0xff]  }
0x1efc   :  { %4337 = vmatprep.subr.bf16.mxu1 %v5929_v18  ;;  %v5970_v18 = vld [vmem:[#allocation7 + $0x1ec] sm:$0xff]  }
0x1eff   :  { %4338 = vmatpush1.bf16.msra.mxu1 %v5927_v45  ;;  %v5972_v45 = vld [vmem:[#allocation7 + $0x224] sm:$0xff]  }
0x1fb6   :  { %v5294_v11 = vpop.f32.mrf.mxu1 }
0x1fb8   :  { %v5295_v21 = vpop.f32.mrf.mxu1 }
0x1fb9   :  { %v5296_v52 = vadd.f32 %v5295_v21, %v5294_v11  ;;  %v5932_v11 = vld [vmem:[#allocation8 + $0x184] ss:$16 sps:$4 sm:$0xff]   ;;  %v5930_v21 = vld [vmem:[#allocation8 + $0x180] ss:$16 sps:$4 sm:$0xff]  }
0x1fba   :  { %v5297_v51 = vpop.f32.mrf.mxu1  ;;  %4298 = vmatprep.subr.bf16.mxu0 %v5932_v11  ;;  %v5973_v11 = vld [vmem:[#allocation7 + $0x2a4] sm:$0xff]  }
0x1fbb   :  { %v3889_v41 = vadd.f32 %v5296_v52, %v3757_v20  ;;  %v5933_v52 = vld [vmem:[#allocation8 + $0x188] ss:$16 sps:$4 sm:$0xff]   ;;  %4299 = vmatpush1.bf16.msra.mxu0 %v5930_v21  ;;  %v5975_v21 = vld [vmem:[#allocation7 + $0x264] sm:$0xff]  }
0x1fbc   :  { %v5298_v10 = vpop.f32.mrf.mxu1 }
0x1fbd   :  { %v5299_v22 = vadd.f32 %v5298_v10, %v5297_v51  ;;  %v3895_v49 = vadd.f32 %v3889_v41, %v3612_v63  ;;  %v5936_v51 = vld [vmem:[#allocation8 + $0x160] ss:$16 sps:$4 sm:$0xff]   ;;  %v5938_v41 = vld [vmem:[#allocation8 + $0x164] ss:$16 sps:$4 sm:$0xff]   ;;  %v5939_v10 = vld [vmem:[#allocation8 + $0x168] ss:$16 sps:$4 sm:$0xff]  }
0x1fbe   :  { %4300 = vmatprep.subr.bf16.mxu0 %v5938_v41  ;;  %v5978_v41 = vld [vmem:[#allocation7 + $0x1dc] sm:$0xff]  }
0x1fbf   :  { %v3892_v23 = vadd.f32 %v5299_v22, %v3757_v20  ;;  %3899 = vadd.xlane.f32.xlu0 %v3895_v49  ;;  %v3905_v25 = vmul.f32 %v3895_v49, %v3895_v49  ;;  %v5935_v20 = vld [vmem:[#allocation8 + $0x18c] ss:$16 sps:$4 sm:$0xff]   ;;  %4301 = vmatpush1.bf16.msra.mxu0 %v5936_v51 }
0x1fc0   :  { %4339 = vmatprep.subr.bf16.mxu1 %v5935_v20  ;;  %v5941_v22 = vld [vmem:[#allocation8 + $0x16c] ss:$16 sps:$4 sm:$0xff]   ;;  %v5974_v20 = vld [vmem:[#allocation7 + $0x1e4] sm:$0xff]  }
0x1fc1   :  { %v3896_v47 = vadd.f32 %v3892_v23, %v3613_v1  ;;  %4340 = vmatpush1.bf16.msra.mxu1 %v5933_v52  ;;  %v5947_v23 = vld [vmem:[#allocation8 + $0x14c] ss:$16 sps:$4 sm:$0xff]  }
0x1fc2   :  { %4341 = vmatprep.subr.bf16.mxu1 %v5941_v22  ;;  %v5976_v52 = vld [vmem:[#allocation7 + $0x21c] sm:$0xff]   ;;  %v5980_v22 = vld [vmem:[#allocation7 + $0x214] sm:$0xff]  }
0x1fc3   :  { %3901 = vadd.xlane.f32.xlu1 %v3896_v47  ;;  %3907 = vadd.xlane.f32.xlu0 %v3905_v25  ;;  %v3906_v27 = vmul.f32 %v3896_v47, %v3896_v47  ;;  %v5945_v25 = vld [vmem:[#allocation8 + $0x148] ss:$16 sps:$4 sm:$0xff]  }
0x1fc4   :  { %v5977_v51 = vld [vmem:[#allocation7 + $0x29c] sm:$0xff]  }
0x1fc5   :  { %4342 = vmatpush1.bf16.msra.mxu1 %v5939_v10  ;;  %v5979_v10 = vld [vmem:[#allocation7 + $0x25c] sm:$0xff]  }
0x1fc6   :  { %4343 = vmatprep.subr.bf16.mxu1 %v5947_v23  ;;  %v5982_v23 = vld [vmem:[#allocation7 + $0x1d4] sm:$0xff]  }
0x1fc7   :  { %3909 = vadd.xlane.f32.xlu1 %v3906_v27  ;;  %v5950_v27 = vld [vmem:[#allocation8 + $0x124] ss:$16 sps:$4 sm:$0xff]  }
0x1fc9   :  { %4344 = vmatpush1.bf16.msra.mxu1 %v5945_v25  ;;  %v5984_v25 = vld [vmem:[#allocation7 + $0x20c] sm:$0xff]  }
0x2048   :  { %v3900_v53 = vpop.xlane.xlu0 %3899 }
0x2049   :  { %v3903_v59 = vmul.f32 0.0078125, %v3900_v53  ;;  %v5953_v53 = vld [vmem:[#allocation8 + $0x12c] ss:$16 sps:$4 sm:$0xff]  }
0x204a   :  { %4345 = vmatprep.subr.bf16.mxu1 %v5953_v53  ;;  %v5986_v53 = vld [vmem:[#allocation7 + $0x1cc] sm:$0xff]  }
0x204b   :  { %v3913_v33 = vmul.f32 %v3903_v59, %v3903_v59  ;;  %v3917_v50 = vsub.f32 %v3895_v49, %v3903_v59  ;;  %v5944_v49 = vld [vmem:[#allocation8 + $0x144] ss:$16 sps:$4 sm:$0xff]   ;;  %v5948_v59 = vld [vmem:[#allocation8 + $0x120] ss:$16 sps:$4 sm:$0xff]  }
0x204c   :  { %v3902_v28 = vpop.xlane.xlu1 %3901  ;;  %v3908_v32 = vpop.xlane.xlu0 %3907  ;;  %4302 = vmatprep.subr.bf16.mxu0 %v5944_v49  ;;  %v5981_v49 = vld [vmem:[#allocation7 + $0x294] sm:$0xff]  }
0x204d   :  { %v3904_v35 = vmul.f32 0.0078125, %v3902_v28  ;;  %v3911_v37 = vmul.f32 0.0078125, %v3908_v32  ;;  %v5951_v28 = vld [vmem:[#allocation8 + $0x128] ss:$16 sps:$4 sm:$0xff]   ;;  %v5956_v32 = vld [vmem:[#allocation8 + $0x104] ss:$16 sps:$4 sm:$0xff]  }
0x204e   :  { %4346 = vmatpush1.bf16.msra.mxu1 %v5951_v28  ;;  %v5988_v28 = vld [vmem:[#allocation7 + $0x204] sm:$0xff]  }
0x204f   :  { %v3915_v58 = vsub.f32 %v3911_v37, %v3913_v33  ;;  %v3914_v38 = vmul.f32 %v3904_v35, %v3904_v35  ;;  %v3918_v61 = vsub.f32 %v3896_v47, %v3904_v35  ;;  %v5942_v47 = vld [vmem:[#allocation8 + $0x140] ss:$16 sps:$4 sm:$0xff]   ;;  %v5959_v33 = vld [vmem:[#allocation8 + $0x10c] ss:$16 sps:$4 sm:$0xff]   ;;  %v5957_v37 = vld [vmem:[#allocation8 + $0x108] ss:$16 sps:$4 sm:$0xff]  }
0x2050   :  { %v3910_v55 = vpop.xlane.xlu1 %3909  ;;  %4303 = vmatpush1.bf16.msra.mxu0 %v5942_v47  ;;  %v5954_v35 = vld [vmem:[#allocation8 + $0x100] ss:$16 sps:$4 sm:$0xff]   ;;  %4347 = vmatprep.subr.bf16.mxu1 %v5959_v33 }
0x2051   :  { %v3919_v39 = vadd.f32 1e-05, %v3915_v58  ;;  %v3912_v40 = vmul.f32 0.0078125, %v3910_v55  ;;  %4304 = vmatprep.subr.bf16.mxu0 %v5950_v27  ;;  %v5960_v58 = vld [vmem:[#allocation7 + $0x23c] sm:$0xff]   ;;  %v5983_v47 = vld [vmem:[#allocation7 + $0x254] sm:$0xff]   ;;  %v5985_v27 = vld [vmem:[#allocation7 + $0x28c] sm:$0xff]  }
0x2052   :  { %4348 = vmatpush1.bf16.msra.mxu1 %v5957_v37  ;;  %v5961_v55 = vld [vmem:[#allocation7 + $0x2bc] sm:$0xff]   ;;  %v5990_v33 = vld [vmem:[#allocation7 + $0x1c4] sm:$0xff]  }
0x2053   :  { %6084 = vrsqrt.f32 %v3919_v39  ;;  %v3916_v42 = vsub.f32 %v3912_v40, %v3914_v38  ;;  %5322 = vmatprep.subr.bf16.mxu1 %v5961_v55  ;;  %v4102_v37 = vld [vmem:[#allocation10 + $0x42] ss:$8 sm:$0xf] }
0x2054   :  { %4305 = vmatpush1.bf16.msra.mxu0 %v5948_v59  ;;  %v5987_v59 = vld [vmem:[#allocation7 + $0x24c] sm:$0xff]   ;;  %v4107_v55 = vrot.slane %v4102_v37, %v6293_v9 }
0x2055   :  { %v3920_v26 = vadd.f32 1e-05, %v3916_v42  ;;  %4306 = vmatprep.subr.bf16.mxu0 %v5956_v32  ;;  %v5989_v32 = vld [vmem:[#allocation7 + $0x284] sm:$0xff]  }
0x2057   :  { %6086 = vrsqrt.f32 %v3920_v26 }
0x2058   :  { %4307 = vmatpush1.bf16.msra.mxu0 %v5954_v35  ;;  %v5991_v35 = vld [vmem:[#allocation7 + $0x244] sm:$0xff]  }
0x2059   :  { %5300 = vmatprep.subr.bf16.mxu0 %v5960_v58  ;;  %v4118_v58 = vsub.s32 3, %v6288_v4 }
0x2060   :  { %v6085_v44 = vpop.eup %6084 }
0x2061   :  { %v3923_v46 = vmul.f32 %v6085_v44, %v3897_v43 }
0x2063   :  { %v3925_v1 = vmul.f32 %v3923_v46, %v3917_v50  ;;  %v3929_v46 = vld [vmem:[#allocation10 + $0x40] ss:$0 sm:$0xff] }
0x2064   :  { %v6087_v56 = vpop.eup %6086 }
0x2065   :  { %v3924_v63 = vmul.f32 %v6087_v56, %v3897_v43  ;;  %v6800_v8 = vadd.f32 %v3925_v1, %v3898_v5  ;;  %v3930_v1 = vld [vmem:[#allocation10 + $0x41] ss:$0 sm:$0xff] }
0x2067   :  { %v3926_v7 = vmul.f32 %v3924_v63, %v3918_v61  ;;  %v3941_v24 = vmul.f32 %v6800_v8, %v6800_v8 }
0x2069   :  { %v6802_v6 = vadd.f32 %v3926_v7, %v3898_v5 }
0x206b   :  { %v3933_v29 = vrot.slane %v6802_v6, 7  ;;  %v3942_v2 = vmul.f32 %v6802_v6, %v6802_v6 }
0x206d   :  { %v3934_v0 = vsel %vm157_vm6, %v3933_v29, %v6800_v8  ;;  %v3945_v12 = vrot.slane %v3942_v2, 7 }
0x206e   :  { %v3937_v54 = vsel %vm3936_vm3, %v3934_v0, 0.0 }
0x206f   :  { %3938 = vadd.xlane.f32.xlu1 %v3937_v54  ;;  %v3946_v48 = vsel %vm157_vm6, %v3945_v12, %v3941_v24 }
0x2070   :  { %v3948_v13 = vsel %vm3936_vm3, %v3946_v48, 0.0 }
0x2071   :  { %3949 = vadd.xlane.f32.xlu0 %v3948_v13 }
0x20f8   :  { %v3939_v38 = vpop.xlane.xlu1 %3938 }
0x20f9   :  { %v3940_v39 = vmul.f32 0.0078125, %v3939_v38  ;;  %v4115_v38 = vrot.slane %v4102_v37, %v6356_v36 }
0x20fa   :  { %v3950_v40 = vpop.xlane.xlu0 %3949 }
0x20fb   :  { %v3951_v42 = vmul.f32 0.0078125, %v3950_v40  ;;  %v3952_v26 = vmul.f32 %v3940_v39, %v3940_v39  ;;  %v3955_v50 = vrot.slane %v3940_v39, 1  ;;  %v3958_v61 = vsub.f32 %v6800_v8, %v3940_v39  ;;  %v5964_v8 = vld [vmem:[#allocation7 + $0x234] sm:$0xff]  }
0x20fc   :  { %v4111_v39 = vrot.slane %v4102_v37, %v6312_v31  ;;  %v4119_v40 = vrot.slane %v4102_v37, %v4118_v58  ;;  %v5992_v31 = vld [vmem:[#allocation7 + $0x2fc] sm:$0xff]  }
0x20fd   :  { %v3953_v43 = vsub.f32 %v3951_v42, %v3952_v26  ;;  %v3959_v5 = vsub.f32 %v6802_v6, %v3955_v50  ;;  %v5966_v6 = vld [vmem:[#allocation7 + $0x1f4] sm:$0xff]  }
0x20ff   :  { %v3960_v44 = vadd.f32 1e-05, %v3953_v43 }
0x2101   :  { %6088 = vrsqrt.f32 %v3960_v44 }
0x210e   :  { %v6089_v56 = vpop.eup %6088 }
0x210f   :  { %v3962_v63 = vmul.f32 %v6089_v56, %v3929_v46 }
0x2111   :  { %v3964_v7 = vrot.slane %v3962_v63, 1  ;;  %v3967_v29 = vmul.f32 %v3962_v63, %v3958_v61 }
0x2113   :  { %v3968_v2 = vmul.f32 %v3964_v7, %v3959_v5  ;;  %v3969_v0 = vadd.f32 %v3967_v29, %v3930_v1 }
0x2115   :  { %v3970_v24 = vadd.f32 %v3968_v2, %v3930_v1  ;;  %v4099_v12 = vpack.c.bf16 %v3969_v0, %v3969_v0 }
0x2117   :  { %v4100_v54 = vpack.c.bf16 %v3970_v24, %v3970_v24  ;;  %v4126_v13 = vunpack.c.l.b16 %v4099_v12 }
0x2119   :  { %v4127_v48 = vunpack.c.l.b16 %v4100_v54  ;;  %v5993_v54 = vld [vmem:[#allocation7 + $0x2f4] sm:$0xff]  }
0x211b   :  { %v4128_v57 = vrot.slane %v4127_v48, 7  ;;  %v5994_v48 = vld [vmem:[#allocation7 + $0x2ec] sm:$0xff]  }
0x211d   :  { %v4129_v62 = vsel %vm157_vm6, %v4128_v57, %v4126_v13  ;;  %v5995_v13 = vld [vmem:[#allocation7 + $0x2e4] sm:$0xff]   ;;  %v5996_v57 = vld [vmem:[#allocation7 + $0x2dc] sm:$0xff]  }
0x211e   :  { %v4130_v14 = vpack.c.b16 %v4129_v62, %v4129_v62  ;;  %v5997_v62 = vld [vmem:[#allocation7 + $0x2d4] sm:$0xff]  }
0x2120   :  { %4325 = vmatmul.mubr.bf16.vlgmr.msra.gmra.mxu0 %v4130_v14  ;;  %4366 = vmatmul.mubr.bf16.vlgmr.msra.gmra.mxu1 %v4130_v14  ;;  %v6000_v14 = vld [vmem:[#allocation7 + $0x33c] sm:$0xff]  }
0x2121   :  { %5301 = vmatpush3.bf16.msra.mxu0 %v5962_v30  ;;  %5323 = vmatpush3.bf16.msra.mxu1 %v5963_v60  ;;  %v5998_v30 = vld [vmem:[#allocation7 + $0x2cc] sm:$0xff]   ;;  %v5999_v60 = vld [vmem:[#allocation7 + $0x2c4] sm:$0xff]  }
0x2122   :  { %5302 = vmatprep.subr.bf16.mxu0 %v5964_v8  ;;  %5324 = vmatprep.subr.bf16.mxu1 %v5965_v15  ;;  %v6001_v8 = vld [vmem:[#allocation7 + $0x334] sm:$0xff]   ;;  %v6002_v15 = vld [vmem:[#allocation7 + $0x32c] sm:$0xff]  }
0x2125   :  { %5303 = vmatpush3.bf16.msra.mxu0 %v5966_v6  ;;  %5325 = vmatpush3.bf16.msra.mxu1 %v5967_v3  ;;  %v6003_v6 = vld [vmem:[#allocation7 + $0x324] sm:$0xff]   ;;  %v6004_v3 = vld [vmem:[#allocation7 + $0x31c] sm:$0xff]  }
0x2126   :  { %5304 = vmatprep.subr.bf16.mxu0 %v5968_v16  ;;  %5326 = vmatprep.subr.bf16.mxu1 %v5969_v17  ;;  %v6005_v16 = vld [vmem:[#allocation7 + $0x314] sm:$0xff]  }
0x2129   :  { %5305 = vmatpush3.bf16.msra.mxu0 %v5970_v18  ;;  %5327 = vmatpush3.bf16.msra.mxu1 %v5971_v19  ;;  %v4382_v19 = vld [vmem:[#allocation10 + $0x43] ss:$0 sm:$0xff] }
0x212a   :  { %5306 = vmatprep.subr.bf16.mxu0 %v5972_v45  ;;  %5328 = vmatprep.subr.bf16.mxu1 %v5973_v11 }
0x212d   :  { %5307 = vmatpush3.bf16.msra.mxu0 %v5974_v20  ;;  %5329 = vmatpush3.bf16.msra.mxu1 %v5975_v21 }
0x212e   :  { %5308 = vmatprep.subr.bf16.mxu0 %v5976_v52  ;;  %5330 = vmatprep.subr.bf16.mxu1 %v5977_v51 }
0x2131   :  { %5309 = vmatpush3.bf16.msra.mxu0 %v5978_v41  ;;  %5331 = vmatpush3.bf16.msra.mxu1 %v5979_v10 }
0x2132   :  { %5310 = vmatprep.subr.bf16.mxu0 %v5980_v22  ;;  %5332 = vmatprep.subr.bf16.mxu1 %v5981_v49 }
0x2135   :  { %5311 = vmatpush3.bf16.msra.mxu0 %v5982_v23  ;;  %5333 = vmatpush3.bf16.msra.mxu1 %v5983_v47 }
0x2136   :  { %5312 = vmatprep.subr.bf16.mxu0 %v5984_v25  ;;  %5334 = vmatprep.subr.bf16.mxu1 %v5985_v27  ;;  %v6006_v25 = vld [vmem:[#allocation7 + $0x30c] sm:$0xff]   ;;  %v6007_v27 = vld [vmem:[#allocation7 + $0x304] sm:$0xff]  }
0x2139   :  { %5313 = vmatpush3.bf16.msra.mxu0 %v5986_v53  ;;  %5335 = vmatpush3.bf16.msra.mxu1 %v5987_v59  ;;  %v4657_v53 = vld [vmem:[#allocation10 + $0x44] ss:$0 sm:$0xff] }
0x213a   :  { %5314 = vmatprep.subr.bf16.mxu0 %v5988_v28  ;;  %5336 = vmatprep.subr.bf16.mxu1 %v5989_v32 }
0x213d   :  { %5315 = vmatpush3.bf16.msra.mxu0 %v5990_v33  ;;  %5337 = vmatpush3.bf16.msra.mxu1 %v5991_v35 }
0x213e   :  { %5678 = vmatprep.subr.bf16.mxu0 %v6233_v34  ;;  %5698 = vmatprep.subr.bf16.mxu1 %v6233_v34 }
0x21e0   :  { %v4326_v42 = vpop.f32.mrf.mxu0  ;;  %v4367_v26 = vpop.f32.mrf.mxu1 }
0x21e1   :  { %v4327_v43 = vadd.f32 %v4326_v42, %v4107_v55  ;;  %v4368_v44 = vadd.f32 %v4367_v26, %v4115_v38  ;;  %v4748_v55 = vld [vmem:[#allocation10 + $0x45] ss:$0 sm:$0xff] }
0x21e2   :  { %v4328_v46 = vpop.f32.mrf.mxu0  ;;  %v4369_v50 = vpop.f32.mrf.mxu1 }
0x21e3   :  { %v4329_v56 = vadd.f32 %v4328_v46, %v4111_v39  ;;  %v4370_v61 = vadd.f32 %v4369_v50, %v4119_v40  ;;  %v4374_v63 = vmax.f32 %v4327_v43, 0.0  ;;  %v4376_v1 = vmax.f32 %v4368_v44, 0.0 }
0x21e4   :  { %v4330_v5 = vpop.f32.mrf.mxu0  ;;  %v4371_v7 = vpop.f32.mrf.mxu1 }
0x21e5   :  { %v4375_v4 = vmax.f32 %v4329_v56, 0.0  ;;  %v4377_v29 = vmax.f32 %v4370_v61, 0.0  ;;  %v4378_v24 = vpack.c.bf16 %v4374_v63, %v4374_v63  ;;  %v4380_v12 = vpack.c.bf16 %v4376_v1, %v4376_v1 }
0x21e6   :  { %v4331_v9 = vpop.f32.mrf.mxu0  ;;  %v4372_v2 = vpop.f32.mrf.mxu1 }
0x21e7   :  { %v4379_v36 = vpack.c.bf16 %v4375_v4, %v4375_v4  ;;  %v4381_v0 = vpack.c.bf16 %v4377_v29, %v4377_v29 }
0x21e9   :  { %4607 = vmatprep.mubr.bf16.mxu0 %v4379_v36  ;;  %4647 = vmatprep.mubr.bf16.mxu1 %v4381_v0 }
0x21ea   :  { %4608 = vmatmul.mubr.bf16.vlgmr.msra.gmra.mxu0 %v4378_v24  ;;  %4648 = vmatmul.mubr.bf16.vlgmr.msra.gmra.mxu1 %v4380_v12 }
0x21eb   :  { %5679 = vmatpush3.bf16.msra.mxu0 %v5992_v31  ;;  %5694 = vmatprep.mubr.msk.bf16.mxu0 %vm6234_vm9, %v6233_v34 }
0x21ec   :  { %5680 = vmatprep.subr.bf16.mxu0 %v6233_v34  ;;  %5714 = vmatprep.mubr.msk.bf16.mxu1 %vm6234_vm9, %v6233_v34 }
0x21ed   :  { %5699 = vmatpush3.bf16.msra.mxu1 %v6000_v14 }
0x21ee   :  { %5700 = vmatprep.subr.bf16.mxu1 %v6233_v34 }
0x21ef   :  { %5681 = vmatpush3.bf16.msra.mxu0 %v5993_v54 }
0x21f0   :  { %5682 = vmatprep.subr.bf16.mxu0 %v6233_v34 }
0x21f1   :  { %5701 = vmatpush3.bf16.msra.mxu1 %v6001_v8 }
0x21f2   :  { %5702 = vmatprep.subr.bf16.mxu1 %v6233_v34 }
0x21f3   :  { %5683 = vmatpush3.bf16.msra.mxu0 %v5994_v48 }
0x21f4   :  { %5684 = vmatprep.subr.bf16.mxu0 %v6233_v34 }
0x21f5   :  { %5703 = vmatpush3.bf16.msra.mxu1 %v6002_v15 }
0x21f6   :  { %5704 = vmatprep.subr.bf16.mxu1 %v6233_v34 }
0x21f7   :  { %5685 = vmatpush3.bf16.msra.mxu0 %v5995_v13 }
0x21f8   :  { %5686 = vmatprep.subr.bf16.mxu0 %v6233_v34 }
0x21f9   :  { %5705 = vmatpush3.bf16.msra.mxu1 %v6003_v6 }
0x21fa   :  { %5706 = vmatprep.subr.bf16.mxu1 %v6233_v34 }
0x21fb   :  { %5687 = vmatpush3.bf16.msra.mxu0 %v5996_v57 }
0x21fc   :  { %5688 = vmatprep.subr.bf16.mxu0 %v6233_v34 }
0x21fd   :  { %5707 = vmatpush3.bf16.msra.mxu1 %v6004_v3 }
0x21fe   :  { %5708 = vmatprep.subr.bf16.mxu1 %v6233_v34 }
0x21ff   :  { %5689 = vmatpush3.bf16.msra.mxu0 %v5997_v62 }
0x2200   :  { %5690 = vmatprep.subr.bf16.mxu0 %v6233_v34 }
0x2201   :  { %5709 = vmatpush3.bf16.msra.mxu1 %v6005_v16 }
0x2202   :  { %5710 = vmatprep.subr.bf16.mxu1 %v6233_v34 }
0x2203   :  { %5691 = vmatpush3.bf16.msra.mxu0 %v5998_v30 }
0x2204   :  { %5692 = vmatprep.subr.bf16.mxu0 %v6233_v34 }
0x2205   :  { %5711 = vmatpush3.bf16.msra.mxu1 %v6006_v25 }
0x2206   :  { %5712 = vmatprep.subr.bf16.mxu1 %v6233_v34 }
0x2207   :  { %5693 = vmatpush3.bf16.msra.mxu0 %v5999_v60 }
0x2209   :  { %5713 = vmatpush3.bf16.msra.mxu1 %v6007_v27 }
0x22aa   :  { %v5316_v17 = vpop.f32.mrf.mxu0  ;;  %v5338_v18 = vpop.f32.mrf.mxu1 }
0x22ac   :  { %v5317_v45 = vpop.f32.mrf.mxu0  ;;  %v5339_v11 = vpop.f32.mrf.mxu1 }
0x22ad   :  { %v5318_v20 = vadd.f32 %v5317_v45, %v5316_v17  ;;  %v5340_v41 = vadd.f32 %v5339_v11, %v5338_v18 }
0x22ae   :  { %v5319_v21 = vpop.f32.mrf.mxu0  ;;  %v5341_v52 = vpop.f32.mrf.mxu1 }
0x22af   :  { %v4610_v51 = vadd.f32 %v5318_v20, %v4382_v19 }
0x22b0   :  { %v5320_v10 = vpop.f32.mrf.mxu0  ;;  %v5342_v22 = vpop.f32.mrf.mxu1 }
0x22b1   :  { %v4650_v49 = vadd.f32 %v5340_v41, %v4610_v51 }
0x22b3   :  { %v4655_v23 = vmax.f32 %v4650_v49, 0.0 }
0x22b5   :  { %v4656_v47 = vpack.c.bf16 %v4655_v23, %v4655_v23 }
0x22b7   :  { %5695 = vmatmul.mubr.bf16.vlgmr.msra.gmra.mxu0 %v4656_v47 }
0x2377   :  { %v4740_v59 = vpop.f32.mrf.mxu0 }
0x2378   :  { %v4741_v28 = vadd.f32 %v4740_v59, %v4657_v53 }
0x2379   :  { %v5696_v32 = vpop.f32.mrf.mxu0 }
0x237a   :  { %v4746_v33 = vmax.f32 %v4741_v28, 0.0 }
0x237b   :  { %v4743_v35 = vpop.f32.mrf.mxu0 }
0x237c   :  { %v4747_v37 = vpack.c.bf16 %v4746_v33, %v4746_v33 }
0x237d   :  { %v5697_v58 = vpop.f32.mrf.mxu0 }
0x237e   :  { %5715 = vmatmul.mubr.bf16.vlgmr.msra.gmra.mxu1 %v4747_v37 }
0x243e   :  { %v4831_v38 = vpop.f32.mrf.mxu1 }
0x243f   :  { %v4832_v39 = vadd.f32 %v4831_v38, %v4748_v55 }
0x2440   :  { %v5716_v40 = vpop.f32.mrf.mxu1 }
0x2441   :  { %4837 = vst [vmem:[#allocation11] sm:$0x3] %v4832_v39 }
0x2442   :  { %v4834_v34 = vpop.f32.mrf.mxu1 }
0x2443   :  { %6201 = shalt.err (!%p6198_p1)
}
0x2444   :  { %4847 = dma.vmem_to_hbm [thread:$0]  %s4845_s23, 32, %s6847_s5, [#allocation4]   ;;  %v5717_v42 = vpop.f32.mrf.mxu1 }
0x2445   :  { %6216 = dma.done.wait [#allocation4], 32  }
0x2446   :  { %6217 = vsyncadd [#allocation4], 4294967264 }
0x2447   :  { %4851 = vsyncpa [#allocation3], 1 }
0x2448   :  { %4852 = vsyncpa [#allocation6], 1 }
0x2449   :  { %4853 = vsyncpa [#allocation9], 1 }
0x244a   :  { %4854 = vsyncpa [#allocation4], 1 }

</bundles_post_ra>
